<compile_context>
chip_gen: v6e
topology: v6e:2x2x1
jax: 0.10.0
libtpu: 0.0.40
codegen_flags: <defaults>
</compile_context>

<pallas_src>
import math
from functools import partial

import numpy as np
import jax
import jax.numpy as jnp
from jax.experimental import pallas as pl
from jax.experimental.pallas import tpu as pltpu


def _round_up(x, m):
    return (x + m - 1) // m * m


# ----------------------------------------------------------------------------------
# Fused decoder kernel: packed word attention + LSTM step (T steps) + deferred vocab
# projection.  Everything stays VMEM-resident for the whole decode loop.
# ----------------------------------------------------------------------------------
def make_decoder_kernel(T, Bp, H, Lwg, apply_mask):
    def kernel(wlrp_ref, sent_ref, mask_ref, w2_ref, w4s_ref, w4w_ref,
               mrep_ref, msum_ref, mfold_ref, wgx_ref, wgh_ref, b_ref,
               wout_ref, bout_ref, seq_ref, grep_ref, h_all_ref):
        f32 = jnp.float32
        Hp = msum_ref.shape[0]
        Vp = bout_ref.shape[1]

        # ---- hoist every time-invariant load / broadcast out of the recurrence ----
        wlrp = wlrp_ref[...]                                    # (Lwg, Bp, Hp) packed bank
        bank = [wlrp[g] for g in range(Lwg)]                    # Lwg x (Bp, Hp)
        mrep = mrep_ref[...]                                    # (H, Hp)  replicate h per group
        msum = msum_ref[...]                                    # (Hp, Hp) in-group sum+broadcast
        mfold = mfold_ref[...]                                  # (Hp, H)  fold groups back to H
        w4w = w4w_ref[...]                                      # (H, H)
        wgx = wgx_ref[...]                                      # (H, 4H)  input->gates
        wgh = wgh_ref[...]                                      # (H, 4H)  hidden->gates
        w2b = jnp.broadcast_to(w2_ref[...], (Bp, Hp))           # hoisted (no per-step broadcast)
        bb = jnp.broadcast_to(b_ref[...], (Bp, 4 * H))
        if apply_mask:
            mask = mask_ref[...]
            maskb = [jnp.broadcast_to(mask[g:g + 1, :], (Bp, Hp)) for g in range(Lwg)]

        # Sentence attention over a single memory slot is the identity (softmax of one
        # element == 1), so its W4 contribution is constant across time -> hoist.
        sent_contrib = jnp.dot(sent_ref[...], w4s_ref[...],
                               preferred_element_type=f32)      # (Bp, H)

        h = jnp.zeros((Bp, H), f32)
        c = jnp.zeros((Bp, H), f32)

        # max_len is small & static -> full static unroll of the recurrence.
        # (For larger T switch to lax.fori_loop with dynamic h_all writes.)
        for t in range(T):
            # ---- word-level additive attention, P words packed per 128-lane block ----
            h_rep = jnp.dot(h, mrep, preferred_element_type=f32)         # (Bp, Hp)
            sc, m = [], None
            for g in range(Lwg):
                w = jnp.tanh(bank[g] + h_rep) * w2b                      # (Bp, Hp)
                s_g = jnp.dot(w, msum, preferred_element_type=f32)       # per-word scores (replicated)
                sc.append(s_g)
                mg = jnp.max(s_g, axis=-1, keepdims=True)
                m = mg if m is None else jnp.maximum(m, mg)
            e, l = [], None
            for g in range(Lwg):
                e_g = jnp.exp(sc[g] - m)
                if apply_mask:
                    e_g = e_g * maskb[g]
                e.append(e_g)
                lg = jnp.sum(e_g, axis=-1, keepdims=True)
                l = lg if l is None else l + lg
            # each word's exp() appears H times along lanes -> true denominator = l / H
            wcp = e[0] * bank[0]
            for g in range(1, Lwg):
                wcp = wcp + e[g] * bank[g]
            wcp = wcp * (float(H) / l)                                   # packed weighted sum
            word_ctx = jnp.dot(wcp, mfold, preferred_element_type=f32)   # (Bp, H)

            # ---- decoder input: tanh(W4 [sent_ctx, word_ctx]), sentence half hoisted ----
            x_t = jnp.tanh(sent_contrib +
                           jnp.dot(word_ctx, w4w, preferred_element_type=f32))

            # ---- LSTM cell: two dots on pre-split weights, gates dense at 4H lanes ----
            gates = (jnp.dot(x_t, wgx, preferred_element_type=f32) +
                     jnp.dot(h, wgh, preferred_element_type=f32) + bb)   # (Bp, 4H)
            sig = jax.nn.sigmoid(gates)                                  # one whole-vreg sigmoid
            i_g = sig[:, 0:H]
            f_g = sig[:, H:2 * H]
            o_g = sig[:, 3 * H:4 * H]
            g_g = jnp.tanh(gates[:, 2 * H:3 * H])
            c = f_g * c + i_g * g_g
            h = o_g * jnp.tanh(c)

            # stash h_t; the vocab projection is deferred off the serial critical path
            h_all_ref[pl.ds(t * Bp, Bp), :] = h

        # ---- deferred vocab projection: one (T*Bp, H) @ (H, Vp) pass, lane-dense store ----
        # (For large vocabs, tile Vp with a grid axis + BlockSpecs on wout/seq - v7x VMEM.)
        boutb = jnp.broadcast_to(bout_ref[...], (T * Bp, Vp))
        seq_ref[...] = jnp.dot(h_all_ref[...], wout_ref[...],
                               preferred_element_type=f32) + boutb
        grep_ref[...] = h

    return kernel


# ----------------------------------------------------------------------------------
# Parameter init (mirrors the PyTorch module's parameter set)
# ----------------------------------------------------------------------------------
def init_params(key, hidden_dim, vocab_size):
    H, V = hidden_dim, vocab_size
    ks = jax.random.split(key, 9)

    def u(kk, shape, bound):
        return jax.random.uniform(kk, shape, jnp.float32, minval=-bound, maxval=bound)

    kl = 1.0 / math.sqrt(H)
    return {
        "w_ih": u(ks[0], (4 * H, H), kl),          # decoder_lstm.weight_ih_l0
        "w_hh": u(ks[1], (4 * H, H), kl),          # decoder_lstm.weight_hh_l0
        "b_ih": u(ks[2], (4 * H,), kl),
        "b_hh": u(ks[3], (4 * H,), kl),
        "w2": u(ks[4], (1, H), 1.0 / math.sqrt(H)),            # W2 (no bias)
        "w3": u(ks[5], (1, H), 1.0 / math.sqrt(H)),            # W3: unused in forward
        "w4": u(ks[6], (H, 2 * H), 1.0 / math.sqrt(2 * H)),    # W4 (no bias)
        "w_out": u(ks[7], (V, H), 1.0 / math.sqrt(H)),         # output_layer.weight
        "b_out": u(ks[8], (V,), 1.0 / math.sqrt(H)),           # output_layer.bias
    }


# ----------------------------------------------------------------------------------
# One-time parameter prep: transposes, lane-packing matrices, padded vocab weights.
# ----------------------------------------------------------------------------------
def prepare_params(params, hidden_dim, vocab_size):
    H, V = hidden_dim, vocab_size
    Hp = _round_up(H, 128)
    Vp = _round_up(V, 128)
    P = Hp // H if Hp % H == 0 else 1          # words packed per 128-lane block

    w2 = np.asarray(params["w2"], np.float32)[0]
    w2rep = np.zeros((1, Hp), np.float32)
    mrep = np.zeros((H, Hp), np.float32)        # h  -> h replicated per group
    msum = np.zeros((Hp, Hp), np.float32)       # in-group sum, broadcast back to group lanes
    mfold = np.zeros((Hp, H), np.float32)       # fold packed groups back to width H
    for p in range(P):
        o = p * H
        w2rep[0, o:o + H] = w2
        mrep[np.arange(H), o + np.arange(H)] = 1.0
        msum[o:o + H, o:o + H] = 1.0
        mfold[o + np.arange(H), np.arange(H)] = 1.0

    W4 = np.asarray(params["w4"], np.float32)                      # (H, 2H)
    w4s = np.ascontiguousarray(W4[:, :H].T)                        # sentence half
    w4w = np.ascontiguousarray(W4[:, H:].T)                        # word-context half

    wg_x = np.ascontiguousarray(np.asarray(params["w_ih"], np.float32).T)   # (H, 4H) i|f|g|o
    wg_h = np.ascontiguousarray(np.asarray(params["w_hh"], np.float32).T)   # (H, 4H)
    b = (np.asarray(params["b_ih"], np.float32) +
         np.asarray(params["b_hh"], np.float32))[None, :]                    # (1, 4H)

    wout = np.zeros((H, Vp), np.float32)
    wout[:, :V] = np.asarray(params["w_out"], np.float32).T
    bout = np.zeros((1, Vp), np.float32)
    bout[0, :V] = np.asarray(params["b_out"], np.float32)

    arrs = dict(w2rep=w2rep, mrep=mrep, msum=msum, mfold=mfold, w4s=w4s, w4w=w4w,
                wg_x=wg_x, wg_h=wg_h, b=b, wout=wout, bout=bout)
    return {k: jnp.asarray(v) for k, v in arrs.items()}


# ----------------------------------------------------------------------------------
# Full forward (mirrors HierarchicalAttentionDecoder.forward)
# ----------------------------------------------------------------------------------
@partial(jax.jit, static_argnames=("max_len", "hidden_dim", "vocab_size"))
def hierarchical_attention_decoder_forward(prep, word_level_rep, sentence_level_rep,
                                           max_len, hidden_dim, vocab_size):
    B, Lw, H = word_level_rep.shape
    T = max_len
    Hp = prep["w2rep"].shape[1]
    Vp = prep["bout"].shape[1]
    P = Hp // H if Hp % H == 0 else 1
    Bp = _round_up(B, 8)
    Lwp = _round_up(Lw, P)
    Lwg = Lwp // P

    # Pack P consecutive words of width H into each 128-lane block (cuts the per-step
    # padded-lane tanh work ~P x).  wlrp[g, b, p*H + j] = wlr[b, g*P + p, j]
    x = jnp.zeros((Bp, Lwp, H), jnp.float32).at[:B, :Lw, :].set(
        word_level_rep.astype(jnp.float32))
    x = x.reshape(Bp, Lwg, P * H)
    if P * H < Hp:
        x = jnp.concatenate(
            [x, jnp.zeros((Bp, Lwg, Hp - P * H), jnp.float32)], axis=-1)
    wlrp = jnp.transpose(x, (1, 0, 2))                                  # (Lwg, Bp, Hp)

    sent = jnp.zeros((Bp, H), jnp.float32).at[:B, :].set(
        sentence_level_rep.astype(jnp.float32))

    # word/lane validity mask; only applied when packing leaves unused lanes
    apply_mask = (Lw % P != 0) or (P * H != Hp)
    mask_np = np.zeros((Lwg, Hp), np.float32)
    for word in range(Lw):
        g, p = divmod(word, P)
        mask_np[g, p * H:(p + 1) * H] = 1.0
    mask = jnp.asarray(mask_np)

    vmem = pl.BlockSpec(memory_space=pltpu.MemorySpace.VMEM)
    seq, grep = pl.pallas_call(
        make_decoder_kernel(T, Bp, H, Lwg, apply_mask),
        out_shape=(jax.ShapeDtypeStruct((T * Bp, Vp), jnp.float32),
                   jax.ShapeDtypeStruct((Bp, H), jnp.float32)),
        in_specs=[vmem] * 14,
        out_specs=(vmem, vmem),
        scratch_shapes=[pltpu.VMEM((T * Bp, H), jnp.float32)],
        compiler_params=pltpu.CompilerParams(vmem_limit_bytes=32 * 1024 * 1024),
    )(wlrp, sent, mask, prep["w2rep"], prep["w4s"], prep["w4w"],
      prep["mrep"], prep["msum"], prep["mfold"],
      prep["wg_x"], prep["wg_h"], prep["b"], prep["wout"], prep["bout"])

    generated_sequence = jnp.transpose(
        seq.reshape(T, Bp, Vp)[:, :B, :vocab_size], (1, 0, 2))           # (B, T, V)
    G_rep = grep[:B, :]                                                  # (B, H)
    return generated_sequence, G_rep


# ----------------------------------------------------------------------------------
# Pure-JAX reference (faithful transcription of the PyTorch forward)
# ----------------------------------------------------------------------------------
def ref_forward(params, word_level_rep, sentence_level_rep, max_len):
    B, Lw, H = word_level_rep.shape
    w2 = params["w2"][0]
    W4 = params["w4"]
    bias = params["b_ih"] + params["b_hh"]
    h = jnp.zeros((B, H), jnp.float32)
    c = jnp.zeros((B, H), jnp.float32)
    sent_bank = sentence_level_rep[:, None, :]                    # (B, 1, H)

    def attn_ctx(hid, bank):
        s = jnp.tanh(bank + hid[:, None, :])
        scores = jnp.einsum("bmh,h->bm", s, w2)
        w = jax.nn.softmax(scores, axis=1)
        return jnp.einsum("bm,bmh->bh", w, bank)

    outs = []
    for _ in range(max_len):
        sent_ctx = attn_ctx(h, sent_bank)
        word_ctx = attn_ctx(h, word_level_rep)
        comb = jnp.concatenate([sent_ctx, word_ctx], axis=-1)
        x_t = jnp.tanh(comb @ W4.T)
        gates = x_t @ params["w_ih"].T + h @ params["w_hh"].T + bias
        i = jax.nn.sigmoid(gates[:, :H])
        f = jax.nn.sigmoid(gates[:, H:2 * H])
        g = jnp.tanh(gates[:, 2 * H:3 * H])
        o = jax.nn.sigmoid(gates[:, 3 * H:])
        c = f * c + i * g
        h = o * jnp.tanh(c)
        outs.append(h @ params["w_out"].T + params["b_out"])
    return jnp.stack(outs, axis=1), h


if __name__ == "__main__":
    B, Lw = 2, 8                       # batch, word-level memory length
    hidden_dim, vocab_size = 32, 100
    max_len = 6

    key = jax.random.PRNGKey(0)
    kp, kw, ks = jax.random.split(key, 3)
    params = init_params(kp, hidden_dim, vocab_size)
    word_level_rep = jax.random.normal(kw, (B, Lw, hidden_dim), jnp.float32)
    sentence_level_rep = jax.random.normal(ks, (B, hidden_dim), jnp.float32)

    prep = prepare_params(params, hidden_dim, vocab_size)
    generated, g_rep = hierarchical_attention_decoder_forward(
        prep, word_level_rep, sentence_level_rep,
        max_len=max_len, hidden_dim=hidden_dim, vocab_size=vocab_size)
    jax.block_until_ready((generated, g_rep))

    # Reference in full-f32 matmul precision (the in-kernel dots run as f32 on the MXU).
    with jax.default_matmul_precision("highest"):
        ref_gen, ref_grep = ref_forward(params, word_level_rep, sentence_level_rep, max_len)
    ref_gen, ref_grep = jax.block_until_ready((ref_gen, ref_grep))

    assert generated.shape == (B, max_len, vocab_size)
    assert g_rep.shape == (B, hidden_dim)
    # Tolerance allows for MXU f32 precision-path differences between Mosaic and XLA.
    assert jnp.allclose(generated, ref_gen, rtol=5e-3, atol=5e-3)
    assert jnp.allclose(g_rep, ref_grep, rtol=5e-3, atol=5e-3)

    print("KERNEL_OK")
</pallas_src>

<mosaic_0001>
module attributes {stable_mosaic.version = 11 : i64} {
  func.func @kernel(%arg0: memref<2x8x128xf32, #tpu.memory_space<vmem>>, %arg1: memref<8x32xf32, #tpu.memory_space<vmem>>, %arg2: memref<2x128xf32, #tpu.memory_space<vmem>>, %arg3: memref<1x128xf32, #tpu.memory_space<vmem>>, %arg4: memref<32x32xf32, #tpu.memory_space<vmem>>, %arg5: memref<32x32xf32, #tpu.memory_space<vmem>>, %arg6: memref<32x128xf32, #tpu.memory_space<vmem>>, %arg7: memref<128x128xf32, #tpu.memory_space<vmem>>, %arg8: memref<128x32xf32, #tpu.memory_space<vmem>>, %arg9: memref<32x128xf32, #tpu.memory_space<vmem>>, %arg10: memref<32x128xf32, #tpu.memory_space<vmem>>, %arg11: memref<1x128xf32, #tpu.memory_space<vmem>>, %arg12: memref<32x128xf32, #tpu.memory_space<vmem>>, %arg13: memref<1x128xf32, #tpu.memory_space<vmem>>, %arg14: memref<48x128xf32, #tpu.memory_space<vmem>>, %arg15: memref<8x32xf32, #tpu.memory_space<vmem>>, %arg16: memref<48x32xf32, #tpu.memory_space<vmem>>) attributes {dimension_semantics = [], scalar_prefetch = 0 : i64, scratch_operands = 1 : i64, tpu.core_type = #tpu.core_type<tc>} {
    %c0 = arith.constant 0 : index
    %c0_0 = arith.constant 0 : index
    %c0_1 = arith.constant 0 : index
    %0 = vector.load %arg0[%c0, %c0_0, %c0_1] : memref<2x8x128xf32, #tpu.memory_space<vmem>>, vector<2x8x128xf32>
    %1 = vector.extract_strided_slice %0 {offsets = [0, 0, 0], sizes = [1, 8, 128], strides = [1, 1, 1]} : vector<2x8x128xf32> to vector<1x8x128xf32>
    %2 = vector.shape_cast %1 : vector<1x8x128xf32> to vector<8x128xf32>
    %3 = vector.extract_strided_slice %0 {offsets = [1, 0, 0], sizes = [1, 8, 128], strides = [1, 1, 1]} : vector<2x8x128xf32> to vector<1x8x128xf32>
    %4 = vector.shape_cast %3 : vector<1x8x128xf32> to vector<8x128xf32>
    %c0_2 = arith.constant 0 : index
    %c0_3 = arith.constant 0 : index
    %5 = vector.load %arg6[%c0_2, %c0_3] : memref<32x128xf32, #tpu.memory_space<vmem>>, vector<32x128xf32>
    %c0_4 = arith.constant 0 : index
    %c0_5 = arith.constant 0 : index
    %6 = vector.load %arg7[%c0_4, %c0_5] : memref<128x128xf32, #tpu.memory_space<vmem>>, vector<128x128xf32>
    %c0_6 = arith.constant 0 : index
    %c0_7 = arith.constant 0 : index
    %7 = vector.load %arg8[%c0_6, %c0_7] : memref<128x32xf32, #tpu.memory_space<vmem>>, vector<128x32xf32>
    %c0_8 = arith.constant 0 : index
    %c0_9 = arith.constant 0 : index
    %8 = vector.load %arg5[%c0_8, %c0_9] : memref<32x32xf32, #tpu.memory_space<vmem>>, vector<32x32xf32>
    %c0_10 = arith.constant 0 : index
    %c0_11 = arith.constant 0 : index
    %9 = vector.load %arg9[%c0_10, %c0_11] : memref<32x128xf32, #tpu.memory_space<vmem>>, vector<32x128xf32>
    %c0_12 = arith.constant 0 : index
    %c0_13 = arith.constant 0 : index
    %10 = vector.load %arg10[%c0_12, %c0_13] : memref<32x128xf32, #tpu.memory_space<vmem>>, vector<32x128xf32>
    %c0_14 = arith.constant 0 : index
    %c0_15 = arith.constant 0 : index
    %11 = vector.load %arg3[%c0_14, %c0_15] : memref<1x128xf32, #tpu.memory_space<vmem>>, vector<1x128xf32>
    %12 = vector.shape_cast %11 : vector<1x128xf32> to vector<1x128xf32>
    %13 = vector.broadcast %12 : vector<1x128xf32> to vector<8x128xf32>
    %c0_16 = arith.constant 0 : index
    %c0_17 = arith.constant 0 : index
    %14 = vector.load %arg11[%c0_16, %c0_17] : memref<1x128xf32, #tpu.memory_space<vmem>>, vector<1x128xf32>
    %15 = vector.shape_cast %14 : vector<1x128xf32> to vector<1x128xf32>
    %16 = vector.broadcast %15 : vector<1x128xf32> to vector<8x128xf32>
    %c0_18 = arith.constant 0 : index
    %c0_19 = arith.constant 0 : index
    %17 = vector.load %arg1[%c0_18, %c0_19] : memref<8x32xf32, #tpu.memory_space<vmem>>, vector<8x32xf32>
    %c0_20 = arith.constant 0 : index
    %c0_21 = arith.constant 0 : index
    %18 = vector.load %arg4[%c0_20, %c0_21] : memref<32x32xf32, #tpu.memory_space<vmem>>, vector<32x32xf32>
    %cst = arith.constant dense<0.000000e+00> : vector<8x32xf32>
    %19 = tpu.matmul %17, %18, %cst {dimension_numbers = #tpu.dot_dimension_numbers<[1], [0], [0], [1], [0, 0, 1, 1], [], []>} : vector<8x32xf32>, vector<32x32xf32>, vector<8x32xf32> -> vector<8x32xf32>
    %cst_22 = arith.constant 0.000000e+00 : f32
    %20 = vector.broadcast %cst_22 : f32 to vector<8x32xf32>
    %cst_23 = arith.constant 0.000000e+00 : f32
    %21 = vector.broadcast %cst_23 : f32 to vector<8x32xf32>
    %cst_24 = arith.constant dense<0.000000e+00> : vector<8x128xf32>
    %22 = tpu.matmul %20, %5, %cst_24 {dimension_numbers = #tpu.dot_dimension_numbers<[1], [0], [0], [1], [0, 0, 1, 1], [], []>} : vector<8x32xf32>, vector<32x128xf32>, vector<8x128xf32> -> vector<8x128xf32>
    %23 = arith.addf %2, %22 : vector<8x128xf32>
    %24 = math.tanh %23 : vector<8x128xf32>
    %25 = arith.mulf %24, %13 : vector<8x128xf32>
    %cst_25 = arith.constant dense<0.000000e+00> : vector<8x128xf32>
    %26 = tpu.matmul %25, %6, %cst_25 {dimension_numbers = #tpu.dot_dimension_numbers<[1], [0], [0], [1], [0, 0, 1, 1], [], []>} : vector<8x128xf32>, vector<128x128xf32>, vector<8x128xf32> -> vector<8x128xf32>
    %cst_26 = arith.constant dense<0xFF800000> : vector<8xf32>
    %27 = vector.multi_reduction <maximumf>, %26, %cst_26 [1] : vector<8x128xf32> to vector<8xf32>
    %28 = vector.shape_cast %27 : vector<8xf32> to vector<8x1xf32>
    %29 = arith.addf %4, %22 : vector<8x128xf32>
    %30 = math.tanh %29 : vector<8x128xf32>
    %31 = arith.mulf %30, %13 : vector<8x128xf32>
    %cst_27 = arith.constant dense<0.000000e+00> : vector<8x128xf32>
    %32 = tpu.matmul %31, %6, %cst_27 {dimension_numbers = #tpu.dot_dimension_numbers<[1], [0], [0], [1], [0, 0, 1, 1], [], []>} : vector<8x128xf32>, vector<128x128xf32>, vector<8x128xf32> -> vector<8x128xf32>
    %cst_28 = arith.constant dense<0xFF800000> : vector<8xf32>
    %33 = vector.multi_reduction <maximumf>, %32, %cst_28 [1] : vector<8x128xf32> to vector<8xf32>
    %34 = vector.shape_cast %33 : vector<8xf32> to vector<8x1xf32>
    %35 = arith.maximumf %28, %34 : vector<8x1xf32>
    %36 = vector.broadcast %35 : vector<8x1xf32> to vector<8x128xf32>
    %37 = arith.subf %26, %36 : vector<8x128xf32>
    %38 = math.exp %37 : vector<8x128xf32>
    %cst_29 = arith.constant dense<0.000000e+00> : vector<8xf32>
    %39 = vector.multi_reduction <add>, %38, %cst_29 [1] : vector<8x128xf32> to vector<8xf32>
    %40 = vector.shape_cast %39 : vector<8xf32> to vector<8x1xf32>
    %41 = vector.broadcast %35 : vector<8x1xf32> to vector<8x128xf32>
    %42 = arith.subf %32, %41 : vector<8x128xf32>
    %43 = math.exp %42 : vector<8x128xf32>
    %cst_30 = arith.constant dense<0.000000e+00> : vector<8xf32>
    %44 = vector.multi_reduction <add>, %43, %cst_30 [1] : vector<8x128xf32> to vector<8xf32>
    %45 = vector.shape_cast %44 : vector<8xf32> to vector<8x1xf32>
    %46 = arith.addf %40, %45 : vector<8x1xf32>
    %47 = arith.mulf %38, %2 : vector<8x128xf32>
    %48 = arith.mulf %43, %4 : vector<8x128xf32>
    %49 = arith.addf %47, %48 : vector<8x128xf32>
    %cst_31 = arith.constant 3.200000e+01 : f32
    %50 = vector.broadcast %cst_31 : f32 to vector<8x1xf32>
    %51 = arith.divf %50, %46 : vector<8x1xf32>
    %52 = vector.broadcast %51 : vector<8x1xf32> to vector<8x128xf32>
    %53 = arith.mulf %49, %52 : vector<8x128xf32>
    %cst_32 = arith.constant dense<0.000000e+00> : vector<8x32xf32>
    %54 = tpu.matmul %53, %7, %cst_32 {dimension_numbers = #tpu.dot_dimension_numbers<[1], [0], [0], [1], [0, 0, 1, 1], [], []>} : vector<8x128xf32>, vector<128x32xf32>, vector<8x32xf32> -> vector<8x32xf32>
    %cst_33 = arith.constant dense<0.000000e+00> : vector<8x32xf32>
    %55 = tpu.matmul %54, %8, %cst_33 {dimension_numbers = #tpu.dot_dimension_numbers<[1], [0], [0], [1], [0, 0, 1, 1], [], []>} : vector<8x32xf32>, vector<32x32xf32>, vector<8x32xf32> -> vector<8x32xf32>
    %56 = arith.addf %19, %55 : vector<8x32xf32>
    %57 = math.tanh %56 : vector<8x32xf32>
    %cst_34 = arith.constant dense<0.000000e+00> : vector<8x128xf32>
    %58 = tpu.matmul %57, %9, %cst_34 {dimension_numbers = #tpu.dot_dimension_numbers<[1], [0], [0], [1], [0, 0, 1, 1], [], []>} : vector<8x32xf32>, vector<32x128xf32>, vector<8x128xf32> -> vector<8x128xf32>
    %cst_35 = arith.constant dense<0.000000e+00> : vector<8x128xf32>
    %59 = tpu.matmul %20, %10, %cst_35 {dimension_numbers = #tpu.dot_dimension_numbers<[1], [0], [0], [1], [0, 0, 1, 1], [], []>} : vector<8x32xf32>, vector<32x128xf32>, vector<8x128xf32> -> vector<8x128xf32>
    %60 = arith.addf %58, %59 : vector<8x128xf32>
    %61 = arith.addf %60, %16 : vector<8x128xf32>
    %62 = arith.negf %61 : vector<8x128xf32>
    %63 = math.exp %62 : vector<8x128xf32>
    %cst_36 = arith.constant 1.000000e+00 : f32
    %64 = vector.broadcast %cst_36 : f32 to vector<8x128xf32>
    %65 = arith.addf %64, %63 : vector<8x128xf32>
    %66 = arith.divf %64, %65 : vector<8x128xf32>
    %67 = vector.extract_strided_slice %66 {offsets = [0, 0], sizes = [8, 32], strides = [1, 1]} : vector<8x128xf32> to vector<8x32xf32>
    %68 = vector.extract_strided_slice %66 {offsets = [0, 32], sizes = [8, 32], strides = [1, 1]} : vector<8x128xf32> to vector<8x32xf32>
    %69 = vector.extract_strided_slice %66 {offsets = [0, 96], sizes = [8, 32], strides = [1, 1]} : vector<8x128xf32> to vector<8x32xf32>
    %70 = vector.extract_strided_slice %61 {offsets = [0, 64], sizes = [8, 32], strides = [1, 1]} : vector<8x128xf32> to vector<8x32xf32>
    %71 = math.tanh %70 : vector<8x32xf32>
    %72 = arith.mulf %68, %21 : vector<8x32xf32>
    %73 = arith.mulf %67, %71 : vector<8x32xf32>
    %74 = arith.addf %72, %73 : vector<8x32xf32>
    %75 = math.tanh %74 : vector<8x32xf32>
    %76 = arith.mulf %69, %75 : vector<8x32xf32>
    %c0_37 = arith.constant 0 : index
    %c0_38 = arith.constant 0 : index
    %77 = vector.load %arg16[%c0_37, %c0_38] : memref<48x32xf32, #tpu.memory_space<vmem>>, vector<8x32xf32>
    tpu.vector_store %arg16[%c0_37, %c0_38], %76 {strides = array<i32>} : memref<48x32xf32, #tpu.memory_space<vmem>>, vector<8x32xf32>,
    %cst_39 = arith.constant dense<0.000000e+00> : vector<8x128xf32>
    %78 = tpu.matmul %76, %5, %cst_39 {dimension_numbers = #tpu.dot_dimension_numbers<[1], [0], [0], [1], [0, 0, 1, 1], [], []>} : vector<8x32xf32>, vector<32x128xf32>, vector<8x128xf32> -> vector<8x128xf32>
    %79 = arith.addf %2, %78 : vector<8x128xf32>
    %80 = math.tanh %79 : vector<8x128xf32>
    %81 = arith.mulf %80, %13 : vector<8x128xf32>
    %cst_40 = arith.constant dense<0.000000e+00> : vector<8x128xf32>
    %82 = tpu.matmul %81, %6, %cst_40 {dimension_numbers = #tpu.dot_dimension_numbers<[1], [0], [0], [1], [0, 0, 1, 1], [], []>} : vector<8x128xf32>, vector<128x128xf32>, vector<8x128xf32> -> vector<8x128xf32>
    %cst_41 = arith.constant dense<0xFF800000> : vector<8xf32>
    %83 = vector.multi_reduction <maximumf>, %82, %cst_41 [1] : vector<8x128xf32> to vector<8xf32>
    %84 = vector.shape_cast %83 : vector<8xf32> to vector<8x1xf32>
    %85 = arith.addf %4, %78 : vector<8x128xf32>
    %86 = math.tanh %85 : vector<8x128xf32>
    %87 = arith.mulf %86, %13 : vector<8x128xf32>
    %cst_42 = arith.constant dense<0.000000e+00> : vector<8x128xf32>
    %88 = tpu.matmul %87, %6, %cst_42 {dimension_numbers = #tpu.dot_dimension_numbers<[1], [0], [0], [1], [0, 0, 1, 1], [], []>} : vector<8x128xf32>, vector<128x128xf32>, vector<8x128xf32> -> vector<8x128xf32>
    %cst_43 = arith.constant dense<0xFF800000> : vector<8xf32>
    %89 = vector.multi_reduction <maximumf>, %88, %cst_43 [1] : vector<8x128xf32> to vector<8xf32>
    %90 = vector.shape_cast %89 : vector<8xf32> to vector<8x1xf32>
    %91 = arith.maximumf %84, %90 : vector<8x1xf32>
    %92 = vector.broadcast %91 : vector<8x1xf32> to vector<8x128xf32>
    %93 = arith.subf %82, %92 : vector<8x128xf32>
    %94 = math.exp %93 : vector<8x128xf32>
    %cst_44 = arith.constant dense<0.000000e+00> : vector<8xf32>
    %95 = vector.multi_reduction <add>, %94, %cst_44 [1] : vector<8x128xf32> to vector<8xf32>
    %96 = vector.shape_cast %95 : vector<8xf32> to vector<8x1xf32>
    %97 = vector.broadcast %91 : vector<8x1xf32> to vector<8x128xf32>
    %98 = arith.subf %88, %97 : vector<8x128xf32>
    %99 = math.exp %98 : vector<8x128xf32>
    %cst_45 = arith.constant dense<0.000000e+00> : vector<8xf32>
    %100 = vector.multi_reduction <add>, %99, %cst_45 [1] : vector<8x128xf32> to vector<8xf32>
    %101 = vector.shape_cast %100 : vector<8xf32> to vector<8x1xf32>
    %102 = arith.addf %96, %101 : vector<8x1xf32>
    %103 = arith.mulf %94, %2 : vector<8x128xf32>
    %104 = arith.mulf %99, %4 : vector<8x128xf32>
    %105 = arith.addf %103, %104 : vector<8x128xf32>
    %cst_46 = arith.constant 3.200000e+01 : f32
    %106 = vector.broadcast %cst_46 : f32 to vector<8x1xf32>
    %107 = arith.divf %106, %102 : vector<8x1xf32>
    %108 = vector.broadcast %107 : vector<8x1xf32> to vector<8x128xf32>
    %109 = arith.mulf %105, %108 : vector<8x128xf32>
    %cst_47 = arith.constant dense<0.000000e+00> : vector<8x32xf32>
    %110 = tpu.matmul %109, %7, %cst_47 {dimension_numbers = #tpu.dot_dimension_numbers<[1], [0], [0], [1], [0, 0, 1, 1], [], []>} : vector<8x128xf32>, vector<128x32xf32>, vector<8x32xf32> -> vector<8x32xf32>
    %cst_48 = arith.constant dense<0.000000e+00> : vector<8x32xf32>
    %111 = tpu.matmul %110, %8, %cst_48 {dimension_numbers = #tpu.dot_dimension_numbers<[1], [0], [0], [1], [0, 0, 1, 1], [], []>} : vector<8x32xf32>, vector<32x32xf32>, vector<8x32xf32> -> vector<8x32xf32>
    %112 = arith.addf %19, %111 : vector<8x32xf32>
    %113 = math.tanh %112 : vector<8x32xf32>
    %cst_49 = arith.constant dense<0.000000e+00> : vector<8x128xf32>
    %114 = tpu.matmul %113, %9, %cst_49 {dimension_numbers = #tpu.dot_dimension_numbers<[1], [0], [0], [1], [0, 0, 1, 1], [], []>} : vector<8x32xf32>, vector<32x128xf32>, vector<8x128xf32> -> vector<8x128xf32>
    %cst_50 = arith.constant dense<0.000000e+00> : vector<8x128xf32>
    %115 = tpu.matmul %76, %10, %cst_50 {dimension_numbers = #tpu.dot_dimension_numbers<[1], [0], [0], [1], [0, 0, 1, 1], [], []>} : vector<8x32xf32>, vector<32x128xf32>, vector<8x128xf32> -> vector<8x128xf32>
    %116 = arith.addf %114, %115 : vector<8x128xf32>
    %117 = arith.addf %116, %16 : vector<8x128xf32>
    %118 = arith.negf %117 : vector<8x128xf32>
    %119 = math.exp %118 : vector<8x128xf32>
    %cst_51 = arith.constant 1.000000e+00 : f32
    %120 = vector.broadcast %cst_51 : f32 to vector<8x128xf32>
    %121 = arith.addf %120, %119 : vector<8x128xf32>
    %122 = arith.divf %120, %121 : vector<8x128xf32>
    %123 = vector.extract_strided_slice %122 {offsets = [0, 0], sizes = [8, 32], strides = [1, 1]} : vector<8x128xf32> to vector<8x32xf32>
    %124 = vector.extract_strided_slice %122 {offsets = [0, 32], sizes = [8, 32], strides = [1, 1]} : vector<8x128xf32> to vector<8x32xf32>
    %125 = vector.extract_strided_slice %122 {offsets = [0, 96], sizes = [8, 32], strides = [1, 1]} : vector<8x128xf32> to vector<8x32xf32>
    %126 = vector.extract_strided_slice %117 {offsets = [0, 64], sizes = [8, 32], strides = [1, 1]} : vector<8x128xf32> to vector<8x32xf32>
    %127 = math.tanh %126 : vector<8x32xf32>
    %128 = arith.mulf %124, %74 : vector<8x32xf32>
    %129 = arith.mulf %123, %127 : vector<8x32xf32>
    %130 = arith.addf %128, %129 : vector<8x32xf32>
    %131 = math.tanh %130 : vector<8x32xf32>
    %132 = arith.mulf %125, %131 : vector<8x32xf32>
    %c8 = arith.constant 8 : index
    %c0_52 = arith.constant 0 : index
    %133 = vector.load %arg16[%c8, %c0_52] : memref<48x32xf32, #tpu.memory_space<vmem>>, vector<8x32xf32>
    tpu.vector_store %arg16[%c8, %c0_52], %132 {strides = array<i32>} : memref<48x32xf32, #tpu.memory_space<vmem>>, vector<8x32xf32>,
    %cst_53 = arith.constant dense<0.000000e+00> : vector<8x128xf32>
    %134 = tpu.matmul %132, %5, %cst_53 {dimension_numbers = #tpu.dot_dimension_numbers<[1], [0], [0], [1], [0, 0, 1, 1], [], []>} : vector<8x32xf32>, vector<32x128xf32>, vector<8x128xf32> -> vector<8x128xf32>
    %135 = arith.addf %2, %134 : vector<8x128xf32>
    %136 = math.tanh %135 : vector<8x128xf32>
    %137 = arith.mulf %136, %13 : vector<8x128xf32>
    %cst_54 = arith.constant dense<0.000000e+00> : vector<8x128xf32>
    %138 = tpu.matmul %137, %6, %cst_54 {dimension_numbers = #tpu.dot_dimension_numbers<[1], [0], [0], [1], [0, 0, 1, 1], [], []>} : vector<8x128xf32>, vector<128x128xf32>, vector<8x128xf32> -> vector<8x128xf32>
    %cst_55 = arith.constant dense<0xFF800000> : vector<8xf32>
    %139 = vector.multi_reduction <maximumf>, %138, %cst_55 [1] : vector<8x128xf32> to vector<8xf32>
    %140 = vector.shape_cast %139 : vector<8xf32> to vector<8x1xf32>
    %141 = arith.addf %4, %134 : vector<8x128xf32>
    %142 = math.tanh %141 : vector<8x128xf32>
    %143 = arith.mulf %142, %13 : vector<8x128xf32>
    %cst_56 = arith.constant dense<0.000000e+00> : vector<8x128xf32>
    %144 = tpu.matmul %143, %6, %cst_56 {dimension_numbers = #tpu.dot_dimension_numbers<[1], [0], [0], [1], [0, 0, 1, 1], [], []>} : vector<8x128xf32>, vector<128x128xf32>, vector<8x128xf32> -> vector<8x128xf32>
    %cst_57 = arith.constant dense<0xFF800000> : vector<8xf32>
    %145 = vector.multi_reduction <maximumf>, %144, %cst_57 [1] : vector<8x128xf32> to vector<8xf32>
    %146 = vector.shape_cast %145 : vector<8xf32> to vector<8x1xf32>
    %147 = arith.maximumf %140, %146 : vector<8x1xf32>
    %148 = vector.broadcast %147 : vector<8x1xf32> to vector<8x128xf32>
    %149 = arith.subf %138, %148 : vector<8x128xf32>
    %150 = math.exp %149 : vector<8x128xf32>
    %cst_58 = arith.constant dense<0.000000e+00> : vector<8xf32>
    %151 = vector.multi_reduction <add>, %150, %cst_58 [1] : vector<8x128xf32> to vector<8xf32>
    %152 = vector.shape_cast %151 : vector<8xf32> to vector<8x1xf32>
    %153 = vector.broadcast %147 : vector<8x1xf32> to vector<8x128xf32>
    %154 = arith.subf %144, %153 : vector<8x128xf32>
    %155 = math.exp %154 : vector<8x128xf32>
    %cst_59 = arith.constant dense<0.000000e+00> : vector<8xf32>
    %156 = vector.multi_reduction <add>, %155, %cst_59 [1] : vector<8x128xf32> to vector<8xf32>
    %157 = vector.shape_cast %156 : vector<8xf32> to vector<8x1xf32>
    %158 = arith.addf %152, %157 : vector<8x1xf32>
    %159 = arith.mulf %150, %2 : vector<8x128xf32>
    %160 = arith.mulf %155, %4 : vector<8x128xf32>
    %161 = arith.addf %159, %160 : vector<8x128xf32>
    %cst_60 = arith.constant 3.200000e+01 : f32
    %162 = vector.broadcast %cst_60 : f32 to vector<8x1xf32>
    %163 = arith.divf %162, %158 : vector<8x1xf32>
    %164 = vector.broadcast %163 : vector<8x1xf32> to vector<8x128xf32>
    %165 = arith.mulf %161, %164 : vector<8x128xf32>
    %cst_61 = arith.constant dense<0.000000e+00> : vector<8x32xf32>
    %166 = tpu.matmul %165, %7, %cst_61 {dimension_numbers = #tpu.dot_dimension_numbers<[1], [0], [0], [1], [0, 0, 1, 1], [], []>} : vector<8x128xf32>, vector<128x32xf32>, vector<8x32xf32> -> vector<8x32xf32>
    %cst_62 = arith.constant dense<0.000000e+00> : vector<8x32xf32>
    %167 = tpu.matmul %166, %8, %cst_62 {dimension_numbers = #tpu.dot_dimension_numbers<[1], [0], [0], [1], [0, 0, 1, 1], [], []>} : vector<8x32xf32>, vector<32x32xf32>, vector<8x32xf32> -> vector<8x32xf32>
    %168 = arith.addf %19, %167 : vector<8x32xf32>
    %169 = math.tanh %168 : vector<8x32xf32>
    %cst_63 = arith.constant dense<0.000000e+00> : vector<8x128xf32>
    %170 = tpu.matmul %169, %9, %cst_63 {dimension_numbers = #tpu.dot_dimension_numbers<[1], [0], [0], [1], [0, 0, 1, 1], [], []>} : vector<8x32xf32>, vector<32x128xf32>, vector<8x128xf32> -> vector<8x128xf32>
    %cst_64 = arith.constant dense<0.000000e+00> : vector<8x128xf32>
    %171 = tpu.matmul %132, %10, %cst_64 {dimension_numbers = #tpu.dot_dimension_numbers<[1], [0], [0], [1], [0, 0, 1, 1], [], []>} : vector<8x32xf32>, vector<32x128xf32>, vector<8x128xf32> -> vector<8x128xf32>
    %172 = arith.addf %170, %171 : vector<8x128xf32>
    %173 = arith.addf %172, %16 : vector<8x128xf32>
    %174 = arith.negf %173 : vector<8x128xf32>
    %175 = math.exp %174 : vector<8x128xf32>
    %cst_65 = arith.constant 1.000000e+00 : f32
    %176 = vector.broadcast %cst_65 : f32 to vector<8x128xf32>
    %177 = arith.addf %176, %175 : vector<8x128xf32>
    %178 = arith.divf %176, %177 : vector<8x128xf32>
    %179 = vector.extract_strided_slice %178 {offsets = [0, 0], sizes = [8, 32], strides = [1, 1]} : vector<8x128xf32> to vector<8x32xf32>
    %180 = vector.extract_strided_slice %178 {offsets = [0, 32], sizes = [8, 32], strides = [1, 1]} : vector<8x128xf32> to vector<8x32xf32>
    %181 = vector.extract_strided_slice %178 {offsets = [0, 96], sizes = [8, 32], strides = [1, 1]} : vector<8x128xf32> to vector<8x32xf32>
    %182 = vector.extract_strided_slice %173 {offsets = [0, 64], sizes = [8, 32], strides = [1, 1]} : vector<8x128xf32> to vector<8x32xf32>
    %183 = math.tanh %182 : vector<8x32xf32>
    %184 = arith.mulf %180, %130 : vector<8x32xf32>
    %185 = arith.mulf %179, %183 : vector<8x32xf32>
    %186 = arith.addf %184, %185 : vector<8x32xf32>
    %187 = math.tanh %186 : vector<8x32xf32>
    %188 = arith.mulf %181, %187 : vector<8x32xf32>
    %c16 = arith.constant 16 : index
    %c0_66 = arith.constant 0 : index
    %189 = vector.load %arg16[%c16, %c0_66] : memref<48x32xf32, #tpu.memory_space<vmem>>, vector<8x32xf32>
    tpu.vector_store %arg16[%c16, %c0_66], %188 {strides = array<i32>} : memref<48x32xf32, #tpu.memory_space<vmem>>, vector<8x32xf32>,
    %cst_67 = arith.constant dense<0.000000e+00> : vector<8x128xf32>
    %190 = tpu.matmul %188, %5, %cst_67 {dimension_numbers = #tpu.dot_dimension_numbers<[1], [0], [0], [1], [0, 0, 1, 1], [], []>} : vector<8x32xf32>, vector<32x128xf32>, vector<8x128xf32> -> vector<8x128xf32>
    %191 = arith.addf %2, %190 : vector<8x128xf32>
    %192 = math.tanh %191 : vector<8x128xf32>
    %193 = arith.mulf %192, %13 : vector<8x128xf32>
    %cst_68 = arith.constant dense<0.000000e+00> : vector<8x128xf32>
    %194 = tpu.matmul %193, %6, %cst_68 {dimension_numbers = #tpu.dot_dimension_numbers<[1], [0], [0], [1], [0, 0, 1, 1], [], []>} : vector<8x128xf32>, vector<128x128xf32>, vector<8x128xf32> -> vector<8x128xf32>
    %cst_69 = arith.constant dense<0xFF800000> : vector<8xf32>
    %195 = vector.multi_reduction <maximumf>, %194, %cst_69 [1] : vector<8x128xf32> to vector<8xf32>
    %196 = vector.shape_cast %195 : vector<8xf32> to vector<8x1xf32>
    %197 = arith.addf %4, %190 : vector<8x128xf32>
    %198 = math.tanh %197 : vector<8x128xf32>
    %199 = arith.mulf %198, %13 : vector<8x128xf32>
    %cst_70 = arith.constant dense<0.000000e+00> : vector<8x128xf32>
    %200 = tpu.matmul %199, %6, %cst_70 {dimension_numbers = #tpu.dot_dimension_numbers<[1], [0], [0], [1], [0, 0, 1, 1], [], []>} : vector<8x128xf32>, vector<128x128xf32>, vector<8x128xf32> -> vector<8x128xf32>
    %cst_71 = arith.constant dense<0xFF800000> : vector<8xf32>
    %201 = vector.multi_reduction <maximumf>, %200, %cst_71 [1] : vector<8x128xf32> to vector<8xf32>
    %202 = vector.shape_cast %201 : vector<8xf32> to vector<8x1xf32>
    %203 = arith.maximumf %196, %202 : vector<8x1xf32>
    %204 = vector.broadcast %203 : vector<8x1xf32> to vector<8x128xf32>
    %205 = arith.subf %194, %204 : vector<8x128xf32>
    %206 = math.exp %205 : vector<8x128xf32>
    %cst_72 = arith.constant dense<0.000000e+00> : vector<8xf32>
    %207 = vector.multi_reduction <add>, %206, %cst_72 [1] : vector<8x128xf32> to vector<8xf32>
    %208 = vector.shape_cast %207 : vector<8xf32> to vector<8x1xf32>
    %209 = vector.broadcast %203 : vector<8x1xf32> to vector<8x128xf32>
    %210 = arith.subf %200, %209 : vector<8x128xf32>
    %211 = math.exp %210 : vector<8x128xf32>
    %cst_73 = arith.constant dense<0.000000e+00> : vector<8xf32>
    %212 = vector.multi_reduction <add>, %211, %cst_73 [1] : vector<8x128xf32> to vector<8xf32>
    %213 = vector.shape_cast %212 : vector<8xf32> to vector<8x1xf32>
    %214 = arith.addf %208, %213 : vector<8x1xf32>
    %215 = arith.mulf %206, %2 : vector<8x128xf32>
    %216 = arith.mulf %211, %4 : vector<8x128xf32>
    %217 = arith.addf %215, %216 : vector<8x128xf32>
    %cst_74 = arith.constant 3.200000e+01 : f32
    %218 = vector.broadcast %cst_74 : f32 to vector<8x1xf32>
    %219 = arith.divf %218, %214 : vector<8x1xf32>
    %220 = vector.broadcast %219 : vector<8x1xf32> to vector<8x128xf32>
    %221 = arith.mulf %217, %220 : vector<8x128xf32>
    %cst_75 = arith.constant dense<0.000000e+00> : vector<8x32xf32>
    %222 = tpu.matmul %221, %7, %cst_75 {dimension_numbers = #tpu.dot_dimension_numbers<[1], [0], [0], [1], [0, 0, 1, 1], [], []>} : vector<8x128xf32>, vector<128x32xf32>, vector<8x32xf32> -> vector<8x32xf32>
    %cst_76 = arith.constant dense<0.000000e+00> : vector<8x32xf32>
    %223 = tpu.matmul %222, %8, %cst_76 {dimension_numbers = #tpu.dot_dimension_numbers<[1], [0], [0], [1], [0, 0, 1, 1], [], []>} : vector<8x32xf32>, vector<32x32xf32>, vector<8x32xf32> -> vector<8x32xf32>
    %224 = arith.addf %19, %223 : vector<8x32xf32>
    %225 = math.tanh %224 : vector<8x32xf32>
    %cst_77 = arith.constant dense<0.000000e+00> : vector<8x128xf32>
    %226 = tpu.matmul %225, %9, %cst_77 {dimension_numbers = #tpu.dot_dimension_numbers<[1], [0], [0], [1], [0, 0, 1, 1], [], []>} : vector<8x32xf32>, vector<32x128xf32>, vector<8x128xf32> -> vector<8x128xf32>
    %cst_78 = arith.constant dense<0.000000e+00> : vector<8x128xf32>
    %227 = tpu.matmul %188, %10, %cst_78 {dimension_numbers = #tpu.dot_dimension_numbers<[1], [0], [0], [1], [0, 0, 1, 1], [], []>} : vector<8x32xf32>, vector<32x128xf32>, vector<8x128xf32> -> vector<8x128xf32>
    %228 = arith.addf %226, %227 : vector<8x128xf32>
    %229 = arith.addf %228, %16 : vector<8x128xf32>
    %230 = arith.negf %229 : vector<8x128xf32>
    %231 = math.exp %230 : vector<8x128xf32>
    %cst_79 = arith.constant 1.000000e+00 : f32
    %232 = vector.broadcast %cst_79 : f32 to vector<8x128xf32>
    %233 = arith.addf %232, %231 : vector<8x128xf32>
    %234 = arith.divf %232, %233 : vector<8x128xf32>
    %235 = vector.extract_strided_slice %234 {offsets = [0, 0], sizes = [8, 32], strides = [1, 1]} : vector<8x128xf32> to vector<8x32xf32>
    %236 = vector.extract_strided_slice %234 {offsets = [0, 32], sizes = [8, 32], strides = [1, 1]} : vector<8x128xf32> to vector<8x32xf32>
    %237 = vector.extract_strided_slice %234 {offsets = [0, 96], sizes = [8, 32], strides = [1, 1]} : vector<8x128xf32> to vector<8x32xf32>
    %238 = vector.extract_strided_slice %229 {offsets = [0, 64], sizes = [8, 32], strides = [1, 1]} : vector<8x128xf32> to vector<8x32xf32>
    %239 = math.tanh %238 : vector<8x32xf32>
    %240 = arith.mulf %236, %186 : vector<8x32xf32>
    %241 = arith.mulf %235, %239 : vector<8x32xf32>
    %242 = arith.addf %240, %241 : vector<8x32xf32>
    %243 = math.tanh %242 : vector<8x32xf32>
    %244 = arith.mulf %237, %243 : vector<8x32xf32>
    %c24 = arith.constant 24 : index
    %c0_80 = arith.constant 0 : index
    %245 = vector.load %arg16[%c24, %c0_80] : memref<48x32xf32, #tpu.memory_space<vmem>>, vector<8x32xf32>
    tpu.vector_store %arg16[%c24, %c0_80], %244 {strides = array<i32>} : memref<48x32xf32, #tpu.memory_space<vmem>>, vector<8x32xf32>,
    %cst_81 = arith.constant dense<0.000000e+00> : vector<8x128xf32>
    %246 = tpu.matmul %244, %5, %cst_81 {dimension_numbers = #tpu.dot_dimension_numbers<[1], [0], [0], [1], [0, 0, 1, 1], [], []>} : vector<8x32xf32>, vector<32x128xf32>, vector<8x128xf32> -> vector<8x128xf32>
    %247 = arith.addf %2, %246 : vector<8x128xf32>
    %248 = math.tanh %247 : vector<8x128xf32>
    %249 = arith.mulf %248, %13 : vector<8x128xf32>
    %cst_82 = arith.constant dense<0.000000e+00> : vector<8x128xf32>
    %250 = tpu.matmul %249, %6, %cst_82 {dimension_numbers = #tpu.dot_dimension_numbers<[1], [0], [0], [1], [0, 0, 1, 1], [], []>} : vector<8x128xf32>, vector<128x128xf32>, vector<8x128xf32> -> vector<8x128xf32>
    %cst_83 = arith.constant dense<0xFF800000> : vector<8xf32>
    %251 = vector.multi_reduction <maximumf>, %250, %cst_83 [1] : vector<8x128xf32> to vector<8xf32>
    %252 = vector.shape_cast %251 : vector<8xf32> to vector<8x1xf32>
    %253 = arith.addf %4, %246 : vector<8x128xf32>
    %254 = math.tanh %253 : vector<8x128xf32>
    %255 = arith.mulf %254, %13 : vector<8x128xf32>
    %cst_84 = arith.constant dense<0.000000e+00> : vector<8x128xf32>
    %256 = tpu.matmul %255, %6, %cst_84 {dimension_numbers = #tpu.dot_dimension_numbers<[1], [0], [0], [1], [0, 0, 1, 1], [], []>} : vector<8x128xf32>, vector<128x128xf32>, vector<8x128xf32> -> vector<8x128xf32>
    %cst_85 = arith.constant dense<0xFF800000> : vector<8xf32>
    %257 = vector.multi_reduction <maximumf>, %256, %cst_85 [1] : vector<8x128xf32> to vector<8xf32>
    %258 = vector.shape_cast %257 : vector<8xf32> to vector<8x1xf32>
    %259 = arith.maximumf %252, %258 : vector<8x1xf32>
    %260 = vector.broadcast %259 : vector<8x1xf32> to vector<8x128xf32>
    %261 = arith.subf %250, %260 : vector<8x128xf32>
    %262 = math.exp %261 : vector<8x128xf32>
    %cst_86 = arith.constant dense<0.000000e+00> : vector<8xf32>
    %263 = vector.multi_reduction <add>, %262, %cst_86 [1] : vector<8x128xf32> to vector<8xf32>
    %264 = vector.shape_cast %263 : vector<8xf32> to vector<8x1xf32>
    %265 = vector.broadcast %259 : vector<8x1xf32> to vector<8x128xf32>
    %266 = arith.subf %256, %265 : vector<8x128xf32>
    %267 = math.exp %266 : vector<8x128xf32>
    %cst_87 = arith.constant dense<0.000000e+00> : vector<8xf32>
    %268 = vector.multi_reduction <add>, %267, %cst_87 [1] : vector<8x128xf32> to vector<8xf32>
    %269 = vector.shape_cast %268 : vector<8xf32> to vector<8x1xf32>
    %270 = arith.addf %264, %269 : vector<8x1xf32>
    %271 = arith.mulf %262, %2 : vector<8x128xf32>
    %272 = arith.mulf %267, %4 : vector<8x128xf32>
    %273 = arith.addf %271, %272 : vector<8x128xf32>
    %cst_88 = arith.constant 3.200000e+01 : f32
    %274 = vector.broadcast %cst_88 : f32 to vector<8x1xf32>
    %275 = arith.divf %274, %270 : vector<8x1xf32>
    %276 = vector.broadcast %275 : vector<8x1xf32> to vector<8x128xf32>
    %277 = arith.mulf %273, %276 : vector<8x128xf32>
    %cst_89 = arith.constant dense<0.000000e+00> : vector<8x32xf32>
    %278 = tpu.matmul %277, %7, %cst_89 {dimension_numbers = #tpu.dot_dimension_numbers<[1], [0], [0], [1], [0, 0, 1, 1], [], []>} : vector<8x128xf32>, vector<128x32xf32>, vector<8x32xf32> -> vector<8x32xf32>
    %cst_90 = arith.constant dense<0.000000e+00> : vector<8x32xf32>
    %279 = tpu.matmul %278, %8, %cst_90 {dimension_numbers = #tpu.dot_dimension_numbers<[1], [0], [0], [1], [0, 0, 1, 1], [], []>} : vector<8x32xf32>, vector<32x32xf32>, vector<8x32xf32> -> vector<8x32xf32>
    %280 = arith.addf %19, %279 : vector<8x32xf32>
    %281 = math.tanh %280 : vector<8x32xf32>
    %cst_91 = arith.constant dense<0.000000e+00> : vector<8x128xf32>
    %282 = tpu.matmul %281, %9, %cst_91 {dimension_numbers = #tpu.dot_dimension_numbers<[1], [0], [0], [1], [0, 0, 1, 1], [], []>} : vector<8x32xf32>, vector<32x128xf32>, vector<8x128xf32> -> vector<8x128xf32>
    %cst_92 = arith.constant dense<0.000000e+00> : vector<8x128xf32>
    %283 = tpu.matmul %244, %10, %cst_92 {dimension_numbers = #tpu.dot_dimension_numbers<[1], [0], [0], [1], [0, 0, 1, 1], [], []>} : vector<8x32xf32>, vector<32x128xf32>, vector<8x128xf32> -> vector<8x128xf32>
    %284 = arith.addf %282, %283 : vector<8x128xf32>
    %285 = arith.addf %284, %16 : vector<8x128xf32>
    %286 = arith.negf %285 : vector<8x128xf32>
    %287 = math.exp %286 : vector<8x128xf32>
    %cst_93 = arith.constant 1.000000e+00 : f32
    %288 = vector.broadcast %cst_93 : f32 to vector<8x128xf32>
    %289 = arith.addf %288, %287 : vector<8x128xf32>
    %290 = arith.divf %288, %289 : vector<8x128xf32>
    %291 = vector.extract_strided_slice %290 {offsets = [0, 0], sizes = [8, 32], strides = [1, 1]} : vector<8x128xf32> to vector<8x32xf32>
    %292 = vector.extract_strided_slice %290 {offsets = [0, 32], sizes = [8, 32], strides = [1, 1]} : vector<8x128xf32> to vector<8x32xf32>
    %293 = vector.extract_strided_slice %290 {offsets = [0, 96], sizes = [8, 32], strides = [1, 1]} : vector<8x128xf32> to vector<8x32xf32>
    %294 = vector.extract_strided_slice %285 {offsets = [0, 64], sizes = [8, 32], strides = [1, 1]} : vector<8x128xf32> to vector<8x32xf32>
    %295 = math.tanh %294 : vector<8x32xf32>
    %296 = arith.mulf %292, %242 : vector<8x32xf32>
    %297 = arith.mulf %291, %295 : vector<8x32xf32>
    %298 = arith.addf %296, %297 : vector<8x32xf32>
    %299 = math.tanh %298 : vector<8x32xf32>
    %300 = arith.mulf %293, %299 : vector<8x32xf32>
    %c32 = arith.constant 32 : index
    %c0_94 = arith.constant 0 : index
    %301 = vector.load %arg16[%c32, %c0_94] : memref<48x32xf32, #tpu.memory_space<vmem>>, vector<8x32xf32>
    tpu.vector_store %arg16[%c32, %c0_94], %300 {strides = array<i32>} : memref<48x32xf32, #tpu.memory_space<vmem>>, vector<8x32xf32>,
    %cst_95 = arith.constant dense<0.000000e+00> : vector<8x128xf32>
    %302 = tpu.matmul %300, %5, %cst_95 {dimension_numbers = #tpu.dot_dimension_numbers<[1], [0], [0], [1], [0, 0, 1, 1], [], []>} : vector<8x32xf32>, vector<32x128xf32>, vector<8x128xf32> -> vector<8x128xf32>
    %303 = arith.addf %2, %302 : vector<8x128xf32>
    %304 = math.tanh %303 : vector<8x128xf32>
    %305 = arith.mulf %304, %13 : vector<8x128xf32>
    %cst_96 = arith.constant dense<0.000000e+00> : vector<8x128xf32>
    %306 = tpu.matmul %305, %6, %cst_96 {dimension_numbers = #tpu.dot_dimension_numbers<[1], [0], [0], [1], [0, 0, 1, 1], [], []>} : vector<8x128xf32>, vector<128x128xf32>, vector<8x128xf32> -> vector<8x128xf32>
    %cst_97 = arith.constant dense<0xFF800000> : vector<8xf32>
    %307 = vector.multi_reduction <maximumf>, %306, %cst_97 [1] : vector<8x128xf32> to vector<8xf32>
    %308 = vector.shape_cast %307 : vector<8xf32> to vector<8x1xf32>
    %309 = arith.addf %4, %302 : vector<8x128xf32>
    %310 = math.tanh %309 : vector<8x128xf32>
    %311 = arith.mulf %310, %13 : vector<8x128xf32>
    %cst_98 = arith.constant dense<0.000000e+00> : vector<8x128xf32>
    %312 = tpu.matmul %311, %6, %cst_98 {dimension_numbers = #tpu.dot_dimension_numbers<[1], [0], [0], [1], [0, 0, 1, 1], [], []>} : vector<8x128xf32>, vector<128x128xf32>, vector<8x128xf32> -> vector<8x128xf32>
    %cst_99 = arith.constant dense<0xFF800000> : vector<8xf32>
    %313 = vector.multi_reduction <maximumf>, %312, %cst_99 [1] : vector<8x128xf32> to vector<8xf32>
    %314 = vector.shape_cast %313 : vector<8xf32> to vector<8x1xf32>
    %315 = arith.maximumf %308, %314 : vector<8x1xf32>
    %316 = vector.broadcast %315 : vector<8x1xf32> to vector<8x128xf32>
    %317 = arith.subf %306, %316 : vector<8x128xf32>
    %318 = math.exp %317 : vector<8x128xf32>
    %cst_100 = arith.constant dense<0.000000e+00> : vector<8xf32>
    %319 = vector.multi_reduction <add>, %318, %cst_100 [1] : vector<8x128xf32> to vector<8xf32>
    %320 = vector.shape_cast %319 : vector<8xf32> to vector<8x1xf32>
    %321 = vector.broadcast %315 : vector<8x1xf32> to vector<8x128xf32>
    %322 = arith.subf %312, %321 : vector<8x128xf32>
    %323 = math.exp %322 : vector<8x128xf32>
    %cst_101 = arith.constant dense<0.000000e+00> : vector<8xf32>
    %324 = vector.multi_reduction <add>, %323, %cst_101 [1] : vector<8x128xf32> to vector<8xf32>
    %325 = vector.shape_cast %324 : vector<8xf32> to vector<8x1xf32>
    %326 = arith.addf %320, %325 : vector<8x1xf32>
    %327 = arith.mulf %318, %2 : vector<8x128xf32>
    %328 = arith.mulf %323, %4 : vector<8x128xf32>
    %329 = arith.addf %327, %328 : vector<8x128xf32>
    %cst_102 = arith.constant 3.200000e+01 : f32
    %330 = vector.broadcast %cst_102 : f32 to vector<8x1xf32>
    %331 = arith.divf %330, %326 : vector<8x1xf32>
    %332 = vector.broadcast %331 : vector<8x1xf32> to vector<8x128xf32>
    %333 = arith.mulf %329, %332 : vector<8x128xf32>
    %cst_103 = arith.constant dense<0.000000e+00> : vector<8x32xf32>
    %334 = tpu.matmul %333, %7, %cst_103 {dimension_numbers = #tpu.dot_dimension_numbers<[1], [0], [0], [1], [0, 0, 1, 1], [], []>} : vector<8x128xf32>, vector<128x32xf32>, vector<8x32xf32> -> vector<8x32xf32>
    %cst_104 = arith.constant dense<0.000000e+00> : vector<8x32xf32>
    %335 = tpu.matmul %334, %8, %cst_104 {dimension_numbers = #tpu.dot_dimension_numbers<[1], [0], [0], [1], [0, 0, 1, 1], [], []>} : vector<8x32xf32>, vector<32x32xf32>, vector<8x32xf32> -> vector<8x32xf32>
    %336 = arith.addf %19, %335 : vector<8x32xf32>
    %337 = math.tanh %336 : vector<8x32xf32>
    %cst_105 = arith.constant dense<0.000000e+00> : vector<8x128xf32>
    %338 = tpu.matmul %337, %9, %cst_105 {dimension_numbers = #tpu.dot_dimension_numbers<[1], [0], [0], [1], [0, 0, 1, 1], [], []>} : vector<8x32xf32>, vector<32x128xf32>, vector<8x128xf32> -> vector<8x128xf32>
    %cst_106 = arith.constant dense<0.000000e+00> : vector<8x128xf32>
    %339 = tpu.matmul %300, %10, %cst_106 {dimension_numbers = #tpu.dot_dimension_numbers<[1], [0], [0], [1], [0, 0, 1, 1], [], []>} : vector<8x32xf32>, vector<32x128xf32>, vector<8x128xf32> -> vector<8x128xf32>
    %340 = arith.addf %338, %339 : vector<8x128xf32>
    %341 = arith.addf %340, %16 : vector<8x128xf32>
    %342 = arith.negf %341 : vector<8x128xf32>
    %343 = math.exp %342 : vector<8x128xf32>
    %cst_107 = arith.constant 1.000000e+00 : f32
    %344 = vector.broadcast %cst_107 : f32 to vector<8x128xf32>
    %345 = arith.addf %344, %343 : vector<8x128xf32>
    %346 = arith.divf %344, %345 : vector<8x128xf32>
    %347 = vector.extract_strided_slice %346 {offsets = [0, 0], sizes = [8, 32], strides = [1, 1]} : vector<8x128xf32> to vector<8x32xf32>
    %348 = vector.extract_strided_slice %346 {offsets = [0, 32], sizes = [8, 32], strides = [1, 1]} : vector<8x128xf32> to vector<8x32xf32>
    %349 = vector.extract_strided_slice %346 {offsets = [0, 96], sizes = [8, 32], strides = [1, 1]} : vector<8x128xf32> to vector<8x32xf32>
    %350 = vector.extract_strided_slice %341 {offsets = [0, 64], sizes = [8, 32], strides = [1, 1]} : vector<8x128xf32> to vector<8x32xf32>
    %351 = math.tanh %350 : vector<8x32xf32>
    %352 = arith.mulf %348, %298 : vector<8x32xf32>
    %353 = arith.mulf %347, %351 : vector<8x32xf32>
    %354 = arith.addf %352, %353 : vector<8x32xf32>
    %355 = math.tanh %354 : vector<8x32xf32>
    %356 = arith.mulf %349, %355 : vector<8x32xf32>
    %c40 = arith.constant 40 : index
    %c0_108 = arith.constant 0 : index
    %357 = vector.load %arg16[%c40, %c0_108] : memref<48x32xf32, #tpu.memory_space<vmem>>, vector<8x32xf32>
    tpu.vector_store %arg16[%c40, %c0_108], %356 {strides = array<i32>} : memref<48x32xf32, #tpu.memory_space<vmem>>, vector<8x32xf32>,
    %c0_109 = arith.constant 0 : index
    %c0_110 = arith.constant 0 : index
    %358 = vector.load %arg13[%c0_109, %c0_110] : memref<1x128xf32, #tpu.memory_space<vmem>>, vector<1x128xf32>
    %359 = vector.shape_cast %358 : vector<1x128xf32> to vector<1x128xf32>
    %360 = vector.broadcast %359 : vector<1x128xf32> to vector<48x128xf32>
    %c0_111 = arith.constant 0 : index
    %c0_112 = arith.constant 0 : index
    %361 = vector.load %arg16[%c0_111, %c0_112] : memref<48x32xf32, #tpu.memory_space<vmem>>, vector<48x32xf32>
    %c0_113 = arith.constant 0 : index
    %c0_114 = arith.constant 0 : index
    %362 = vector.load %arg12[%c0_113, %c0_114] : memref<32x128xf32, #tpu.memory_space<vmem>>, vector<32x128xf32>
    %cst_115 = arith.constant dense<0.000000e+00> : vector<48x128xf32>
    %363 = tpu.matmul %361, %362, %cst_115 {dimension_numbers = #tpu.dot_dimension_numbers<[1], [0], [0], [1], [0, 0, 1, 1], [], []>} : vector<48x32xf32>, vector<32x128xf32>, vector<48x128xf32> -> vector<48x128xf32>
    %364 = arith.addf %363, %360 : vector<48x128xf32>
    %c0_116 = arith.constant 0 : index
    %c0_117 = arith.constant 0 : index
    %365 = vector.load %arg14[%c0_116, %c0_117] : memref<48x128xf32, #tpu.memory_space<vmem>>, vector<48x128xf32>
    tpu.vector_store %arg14[%c0_116, %c0_117], %364 {strides = array<i32>} : memref<48x128xf32, #tpu.memory_space<vmem>>, vector<48x128xf32>,
    %c0_118 = arith.constant 0 : index
    %c0_119 = arith.constant 0 : index
    %366 = vector.load %arg15[%c0_118, %c0_119] : memref<8x32xf32, #tpu.memory_space<vmem>>, vector<8x32xf32>
    tpu.vector_store %arg15[%c0_118, %c0_119], %356 {strides = array<i32>} : memref<8x32xf32, #tpu.memory_space<vmem>>, vector<8x32xf32>,
    return
  }
}

</mosaic_0001>

<bundles_post_ra>
// kernel: hierarchical_attention_decoder_forward.1
= control target key start
LH: loop header
LB: loop body
LE: loop exit
PB: predicated region body
PF: predicated region fallthrough
CT: control target
= control target key end

     0   :  { %v7040_v0 = vmov 0.0   ;;  %vm5286_vm0 = vmmov 0   ;;  %vm118_vm1 = vcmask 261120   ;;  %s5287_s22 = smov 64   ;;  %s5288_s23 = smov 32   ;;  %s7023_s6 = inlined_call_operand.vmem [shape: f32[32,128], index: 6, kind: input, shape index: {}]   ;;  %s7024_s2 = inlined_call_operand.vmem [shape: f32[2,128], index: 2, kind: input, shape index: {}]   ;;  %s7025_s4 = inlined_call_operand.vmem [shape: f32[32,32], index: 4, kind: input, shape index: {}]   ;;  %s7026_s1 = inlined_call_operand.vmem [shape: f32[8,32], index: 1, kind: input, shape index: {}]   ;;  %s7027_s7 = inlined_call_operand.vmem [shape: f32[128,128], index: 7, kind: input, shape index: {}]   ;;  %s7028_s0 = inlined_call_operand.vmem [shape: f32[2,8,128], index: 0, kind: input, shape index: {}]   ;;  %s7029_s3 = inlined_call_operand.vmem [shape: f32[1,128], index: 3, kind: input, shape index: {}]   ;;  %s7030_s8 = inlined_call_operand.vmem [shape: f32[128,32], index: 8, kind: input, shape index: {}]   ;;  %s7031_s5 = inlined_call_operand.vmem [shape: f32[32,32], index: 5, kind: input, shape index: {}]   ;;  %s7032_s10 = inlined_call_operand.vmem [shape: f32[32,128], index: 10, kind: input, shape index: {}]   ;;  %s7033_s9 = inlined_call_operand.vmem [shape: f32[32,128], index: 9, kind: input, shape index: {}]   ;;  %s7034_s11 = inlined_call_operand.vmem [shape: f32[1,128], index: 11, kind: input, shape index: {}]   ;;  %s7035_s12 = inlined_call_operand.vmem [shape: f32[32,128], index: 12, kind: input, shape index: {}]   ;;  %s7036_s13 = inlined_call_operand.vmem [shape: f32[1,128], index: 13, kind: input, shape index: {}]   ;;  %s7037_s14 = inlined_call_operand.vmem [shape: f32[48,128], index: 14, kind: output, shape index: {0}]   ;;  %s7038_s15 = inlined_call_operand.vmem [shape: f32[8,32], index: 15, kind: output, shape index: {1}]  }
   0x1   :  { %4176 = vmatprep.subr.mxu1 %v7040_v0  ;;  %v5373_v1 = vld [vmem:[%s7023_s6 + $0x18] sm:$0xff]  ;;  %v5378_v2 = vld [vmem:[%s7023_s6 + $0x10] sm:$0xff]  ;;  %4184 = vmatprep.mubr.msk.f32.mxu1 %vm5286_vm0, %v7040_v0  ;;  %v5394_v5 = vld [vmem:[%s7023_s6 + $0x8] sm:$0xff] }
   0x2   :  { %4177 = vmatpush3.msra.mxu1 %v5373_v1  ;;  %4165 = vmatprep.subr.mxu0 %v7040_v0  ;;  %v117_v3 = vld [vmem:[%s7025_s4 + $0x18] sm:$0xff]  ;;  %v116_v4 = vld [vmem:[%s7025_s4 + $0x10] sm:$0xff]  ;;  %v115_v6 = vld [vmem:[%s7025_s4 + $0x8] sm:$0xff] }
   0x3   :  { %4178 = vmatprep.subr.mxu1 %v7040_v0  ;;  %4166 = vmatpush3.msra.mxu0 %v117_v3  ;;  %v5405_v7 = vld [vmem:[%s7023_s6] sm:$0xff]  ;;  %v5422_v10 = vld [vmem:[%s7027_s7 + $0x78] sm:$0xff]  ;;  %v5432_v11 = vld [vmem:[%s7027_s7 + $0x70] sm:$0xff] }
   0x4   :  { %4179 = vmatpush3.msra.mxu1 %v5378_v2  ;;  %4167 = vmatprep.subr.mxu0 %v7040_v0  ;;  %v114_v8 = vld [vmem:[%s7025_s4] sm:$0xff]  ;;  %v5441_v12 = vld [vmem:[%s7027_s7 + $0x68] sm:$0xff]  ;;  %v5459_v14 = vld [vmem:[%s7027_s7 + $0x58] sm:$0xff] }
   0x5   :  { %4180 = vmatprep.subr.mxu1 %v7040_v0  ;;  %4168 = vmatpush3.msra.mxu0 %v116_v4  ;;  %v113_v9 = vld [vmem:[%s7026_s1] sm:$0xff]  ;;  %v5468_v15 = vld [vmem:[%s7027_s7 + $0x50] sm:$0xff]  ;;  %v5485_v16 = vld [vmem:[%s7027_s7 + $0x48] sm:$0xff] }
   0x6   :  { %4181 = vmatpush3.msra.mxu1 %v5394_v5  ;;  %4169 = vmatprep.subr.mxu0 %v7040_v0  ;;  %v5450_v13 = vld [vmem:[%s7027_s7 + $0x60] sm:$0xff]  ;;  %v5503_v18 = vld [vmem:[%s7027_s7 + $0x38] sm:$0xff]  ;;  %v5508_v19 = vld [vmem:[%s7027_s7 + $0x30] sm:$0xff] }
   0x7   :  { %4182 = vmatprep.subr.mxu1 %v7040_v0  ;;  %4170 = vmatpush3.msra.mxu0 %v115_v6  ;;  %v5494_v17 = vld [vmem:[%s7027_s7 + $0x40] sm:$0xff]  ;;  %v5517_v20 = vld [vmem:[%s7027_s7 + $0x28] sm:$0xff]  ;;  %v5535_v22 = vld [vmem:[%s7027_s7 + $0x18] sm:$0xff] }
   0x8   :  { %4183 = vmatpush3.msra.mxu1 %v5405_v7  ;;  %4171 = vmatprep.subr.mxu0 %v7040_v0  ;;  %v5526_v21 = vld [vmem:[%s7027_s7 + $0x20] sm:$0xff]  ;;  %v5544_v23 = vld [vmem:[%s7027_s7 + $0x10] sm:$0xff]  ;;  %v5553_v24 = vld [vmem:[%s7027_s7 + $0x8] sm:$0xff] }
   0x9   :  { %4185 = vmatmul.mubr.f32.vlgmr.msra.gmra.mxu1 %v7040_v0  ;;  %4172 = vmatpush3.msra.mxu0 %v114_v8  ;;  %v5562_v25 = vld [vmem:[%s7027_s7] sm:$0xff]  ;;  %v5580_v27 = vld [vmem:[%s7028_s0 + $0x8] sm:$0xff]  ;;  %v5600_v43 = vld [vmem:[%s7030_s8 + $0x78] sm:$0xff] }
   0xa   :  { %4173 = vmatprep.mubr.msk.f32.mxu0 %vm5286_vm0, %v7040_v0  ;;  %4187 = vmatprep.subr.mxu0 %v7040_v0  ;;  %v5575_v26 = vld [vmem:[%s7028_s0] sm:$0xff]  ;;  %v5605_v44 = vld [vmem:[%s7030_s8 + $0x70] sm:$0xff]  ;;  %v5612_v45 = vld [vmem:[%s7030_s8 + $0x68] sm:$0xff] }
   0xb   :  { %4174 = vmatmul.mubr.msk.f32.vlgmr.msra.gmra.mxu0 %vm118_vm1, %v113_v9  ;;  %4222 = vmatprep.subr.mxu1 %v7040_v0  ;;  %v5589_v34 = vld [vmem:[%s7029_s3] ss:$0 sm:$0xff]  ;;  %v5630_v59 = vld [vmem:[%s7030_s8 + $0x58] sm:$0xff]  ;;  %v5635_v60 = vld [vmem:[%s7030_s8 + $0x50] sm:$0xff] }
   0xc   :  { %4188 = vmatpush3.msra.mxu0 %v5422_v10  ;;  %4223 = vmatpush3.msra.mxu1 %v5422_v10  ;;  %v5619_v46 = vld [vmem:[%s7030_s8 + $0x60] sm:$0xff]  ;;  %v5644_v61 = vld [vmem:[%s7030_s8 + $0x48] sm:$0xff]  ;;  %v5658_v63 = vld [vmem:[%s7030_s8 + $0x38] sm:$0xff] }
   0xd   :  { %4189 = vmatprep.subr.mxu0 %v7040_v0  ;;  %4224 = vmatprep.subr.mxu1 %v7040_v0  ;;  %v5651_v62 = vld [vmem:[%s7030_s8 + $0x40] sm:$0xff]  ;;  %v5665_v3 = vld [vmem:[%s7030_s8 + $0x30] sm:$0xff]  ;;  %v5672_v4 = vld [vmem:[%s7030_s8 + $0x28] sm:$0xff] }
   0xe   :  { %4190 = vmatpush3.msra.mxu0 %v5432_v11  ;;  %4225 = vmatpush3.msra.mxu1 %v5432_v11  ;;  %v5679_v6 = vld [vmem:[%s7030_s8 + $0x20] sm:$0xff]  ;;  %v5686_v8 = vld [vmem:[%s7030_s8 + $0x18] sm:$0xff]  ;;  %v5693_v9 = vld [vmem:[%s7030_s8 + $0x10] sm:$0xff] }
   0xf   :  { %4191 = vmatprep.subr.mxu0 %v7040_v0  ;;  %4226 = vmatprep.subr.mxu1 %v7040_v0  ;;  %7045 = vst [vmem:[#allocation3_spill] sm:$0xff] %v5686_v8  ;;  %7046 = vst [vmem:[#allocation4_spill] sm:$0xff] %v5693_v9 }
  0x10   :  { %4192 = vmatpush3.msra.mxu0 %v5441_v12  ;;  %4227 = vmatpush3.msra.mxu1 %v5441_v12 }
  0x11   :  { %4193 = vmatprep.subr.mxu0 %v7040_v0  ;;  %4228 = vmatprep.subr.mxu1 %v7040_v0 }
  0x12   :  { %4194 = vmatpush3.msra.mxu0 %v5450_v13  ;;  %4229 = vmatpush3.msra.mxu1 %v5450_v13 }
  0x13   :  { %4195 = vmatprep.subr.mxu0 %v7040_v0  ;;  %4230 = vmatprep.subr.mxu1 %v7040_v0 }
  0x14   :  { %4196 = vmatpush3.msra.mxu0 %v5459_v14  ;;  %4231 = vmatpush3.msra.mxu1 %v5459_v14 }
  0x15   :  { %4197 = vmatprep.subr.mxu0 %v7040_v0  ;;  %4232 = vmatprep.subr.mxu1 %v7040_v0 }
  0x16   :  { %4198 = vmatpush3.msra.mxu0 %v5468_v15  ;;  %4233 = vmatpush3.msra.mxu1 %v5468_v15 }
  0x17   :  { %4199 = vmatprep.subr.mxu0 %v7040_v0  ;;  %4234 = vmatprep.subr.mxu1 %v7040_v0 }
  0x18   :  { %4219 = vmatprep.mubr.msk.f32.mxu0 %vm5286_vm0, %v7040_v0  ;;  %4254 = vmatprep.mubr.msk.f32.mxu1 %vm5286_vm0, %v7040_v0 }
  0x19   :  { %4200 = vmatpush3.msra.mxu0 %v5485_v16  ;;  %4235 = vmatpush3.msra.mxu1 %v5485_v16 }
  0x1a   :  { %4201 = vmatprep.subr.mxu0 %v7040_v0  ;;  %4236 = vmatprep.subr.mxu1 %v7040_v0 }
  0x1b   :  { %4202 = vmatpush3.msra.mxu0 %v5494_v17  ;;  %4237 = vmatpush3.msra.mxu1 %v5494_v17 }
  0x1c   :  { %4203 = vmatprep.subr.mxu0 %v7040_v0  ;;  %4238 = vmatprep.subr.mxu1 %v7040_v0 }
  0x1d   :  { %4204 = vmatpush3.msra.mxu0 %v5503_v18  ;;  %4239 = vmatpush3.msra.mxu1 %v5503_v18 }
  0x1e   :  { %4205 = vmatprep.subr.mxu0 %v7040_v0  ;;  %4240 = vmatprep.subr.mxu1 %v7040_v0 }
  0x1f   :  { %4206 = vmatpush3.msra.mxu0 %v5508_v19  ;;  %4241 = vmatpush3.msra.mxu1 %v5508_v19 }
  0x20   :  { %4207 = vmatprep.subr.mxu0 %v7040_v0  ;;  %4242 = vmatprep.subr.mxu1 %v7040_v0 }
  0x21   :  { %4208 = vmatpush3.msra.mxu0 %v5517_v20  ;;  %4243 = vmatpush3.msra.mxu1 %v5517_v20 }
  0x22   :  { %4209 = vmatprep.subr.mxu0 %v7040_v0  ;;  %4244 = vmatprep.subr.mxu1 %v7040_v0 }
  0x23   :  { %4210 = vmatpush3.msra.mxu0 %v5526_v21  ;;  %4245 = vmatpush3.msra.mxu1 %v5526_v21 }
  0x24   :  { %4211 = vmatprep.subr.mxu0 %v7040_v0  ;;  %4246 = vmatprep.subr.mxu1 %v7040_v0 }
  0x25   :  { %4212 = vmatpush3.msra.mxu0 %v5535_v22  ;;  %4247 = vmatpush3.msra.mxu1 %v5535_v22 }
  0x26   :  { %4213 = vmatprep.subr.mxu0 %v7040_v0  ;;  %4248 = vmatprep.subr.mxu1 %v7040_v0 }
  0x27   :  { %4214 = vmatpush3.msra.mxu0 %v5544_v23  ;;  %4249 = vmatpush3.msra.mxu1 %v5544_v23 }
  0x28   :  { %4215 = vmatprep.subr.mxu0 %v7040_v0  ;;  %4250 = vmatprep.subr.mxu1 %v7040_v0 }
  0x29   :  { %4216 = vmatpush3.msra.mxu0 %v5553_v24  ;;  %4251 = vmatpush3.msra.mxu1 %v5553_v24 }
  0x2a   :  { %4217 = vmatprep.subr.mxu0 %v7040_v0  ;;  %4252 = vmatprep.subr.mxu1 %v7040_v0 }
  0x2b   :  { %4218 = vmatpush3.msra.mxu0 %v5562_v25  ;;  %4253 = vmatpush3.msra.mxu1 %v5562_v25 }
  0x2c   :  { %4257 = vmatprep.subr.mxu0 %v7040_v0  ;;  %4292 = vmatprep.subr.mxu1 %v7040_v0 }
  0xc9   :  { %v261_v28 = vpop.f32.mrf.mxu1 }
  0xca   :  { %v265_v29 = vadd.f32 %v261_v28, %v5575_v26  ;;  %v340_v30 = vadd.f32 %v261_v28, %v5580_v27  ;;  %v5700_v28 = vld [vmem:[%s7030_s8 + $0x8] sm:$0xff] }
  0xcb   :  { %v4186_v31 = vpop.f32.mrf.mxu1  ;;  %v5584_v32 = vpop.f32.mrf.mxu0  ;;  %7047 = vst [vmem:[#allocation5_spill] sm:$0xff] %v5700_v28 }
  0xcc   :  { %5091 = vtanh.f32 %v265_v29  ;;  %v5706_v29 = vld [vmem:[%s7030_s8] sm:$0xff]  ;;  %v5718_v31 = vld [vmem:[%s7031_s5 + $0x10] sm:$0xff] }
  0xcd   :  { %5093 = vtanh.f32 %v340_v30  ;;  %v4175_v33 = vpop.f32.mrf.mxu0  ;;  %7048 = vst [vmem:[#allocation6_spill] sm:$0xff] %v5706_v29  ;;  %v5713_v30 = vld [vmem:[%s7031_s5 + $0x18] sm:$0xff] }
  0xce   :  { %v5726_v33 = vld [vmem:[%s7031_s5 + $0x8] sm:$0xff] }
  0xd9   :  { %v5092_v35 = vpop.eup %5091 }
  0xda   :  { %v5094_v36 = vpop.eup %5093  ;;  %v267_v37 = vmul.f32 %v5092_v35, %v5589_v34 }
  0xdb   :  { %v342_v38 = vmul.f32 %v5094_v36, %v5589_v34 }
  0xdc   :  { %4220 = vmatmul.mubr.f32.vlgmr.msra.gmra.mxu0 %v267_v37 }
  0xdd   :  { %4255 = vmatmul.mubr.f32.vlgmr.msra.gmra.mxu1 %v342_v38  ;;  %4289 = vmatprep.mubr.msk.f32.mxu0 %vm5286_vm0, %v7040_v0 }
  0xde   :  { %4300 = vmatprep.mubr.msk.f32.mxu1 %vm5286_vm0, %v7040_v0  ;;  %4258 = vmatpush3.msra.mxu0 %v5600_v43 }
  0xdf   :  { %4259 = vmatprep.subr.mxu0 %v7040_v0  ;;  %4293 = vmatpush3.msra.mxu1 %v5713_v30 }
  0xe0   :  { %4260 = vmatpush3.msra.mxu0 %v5605_v44  ;;  %4294 = vmatprep.subr.mxu1 %v7040_v0 }
  0xe1   :  { %4261 = vmatprep.subr.mxu0 %v7040_v0  ;;  %4295 = vmatpush3.msra.mxu1 %v5718_v31 }
  0xe2   :  { %4262 = vmatpush3.msra.mxu0 %v5612_v45  ;;  %4296 = vmatprep.subr.mxu1 %v7040_v0 }
  0xe3   :  { %4263 = vmatprep.subr.mxu0 %v7040_v0  ;;  %4297 = vmatpush3.msra.mxu1 %v5726_v33 }
  0xe4   :  { %4264 = vmatpush3.msra.mxu0 %v5619_v46  ;;  %4298 = vmatprep.subr.mxu1 %v7040_v0 }
  0xe5   :  { %4265 = vmatprep.subr.mxu0 %v7040_v0 }
  0xe6   :  { %4266 = vmatpush3.msra.mxu0 %v5630_v59 }
  0xe7   :  { %4267 = vmatprep.subr.mxu0 %v7040_v0 }
  0xe8   :  { %4268 = vmatpush3.msra.mxu0 %v5635_v60 }
  0xe9   :  { %4269 = vmatprep.subr.mxu0 %v7040_v0 }
  0xea   :  { %4270 = vmatpush3.msra.mxu0 %v5644_v61 }
  0xeb   :  { %4271 = vmatprep.subr.mxu0 %v7040_v0 }
  0xec   :  { %4272 = vmatpush3.msra.mxu0 %v5651_v62 }
  0xed   :  { %4273 = vmatprep.subr.mxu0 %v7040_v0 }
  0xee   :  { %4274 = vmatpush3.msra.mxu0 %v5658_v63 }
  0xef   :  { %4275 = vmatprep.subr.mxu0 %v7040_v0 }
  0xf0   :  { %4276 = vmatpush3.msra.mxu0 %v5665_v3 }
  0xf1   :  { %4277 = vmatprep.subr.mxu0 %v7040_v0 }
  0xf2   :  { %4278 = vmatpush3.msra.mxu0 %v5672_v4 }
  0xf3   :  { %4279 = vmatprep.subr.mxu0 %v7040_v0 }
  0xf4   :  { %4280 = vmatpush3.msra.mxu0 %v5679_v6 }
  0xf5   :  { %4281 = vmatprep.subr.mxu0 %v7040_v0 }
  0xf6   :  { %4282 = vmatpush3.msra.mxu0 %v5686_v8 }
  0xf7   :  { %4283 = vmatprep.subr.mxu0 %v7040_v0 }
  0xf8   :  { %4284 = vmatpush3.msra.mxu0 %v5693_v9 }
  0xf9   :  { %4285 = vmatprep.subr.mxu0 %v7040_v0 }
  0xfa   :  { %4286 = vmatpush3.msra.mxu0 %v5700_v28 }
  0xfb   :  { %4287 = vmatprep.subr.mxu0 %v7040_v0 }
  0xfc   :  { %4288 = vmatpush3.msra.mxu0 %v5706_v29 }
  0xfd   :  { %4336 = vmatprep.subr.mxu0 %v7040_v0 }
 0x19c   :  { %v334_v39 = vpop.f32.mrf.mxu0 }
 0x19d   :  { %v409_v40 = vpop.f32.mrf.mxu1  ;;  %338 = vmax.xlane.f32.xlu0 %v334_v39 }
 0x19e   :  { %v4221_v41 = vpop.f32.mrf.mxu0 }
 0x19f   :  { %v4256_v42 = vpop.f32.mrf.mxu1  ;;  %v5769_v41 = vld [vmem:[%s7031_s5] sm:$0xff] }
 0x1a0   :  { %4299 = vmatpush3.msra.mxu1 %v5769_v41 }
 0x1a1   :  { %413 = vmax.xlane.f32.xlu0 %v409_v40  ;;  %4303 = vmatprep.subr.mxu1 %v7040_v0 }
 0x226   :  { %v339_v47 = vpop.xlane.xlu0 %338 }
 0x22a   :  { %v414_v48 = vpop.xlane.xlu0 %413 }
 0x22b   :  { %v415_v49 = vmax.f32 %v339_v47, %v414_v48  ;;  %v5779_v48 = vld [vmem:[%s7032_s10 + $0x18] sm:$0xff] }
 0x22d   :  { %v416_v50 = vsub.f32 %v334_v39, %v415_v49  ;;  %v421_v51 = vsub.f32 %v409_v40, %v415_v49  ;;  %v5786_v49 = vld [vmem:[%s7032_s10 + $0x10] sm:$0xff] }
 0x22f   :  { %v417_v52 = vmul.f32 1.442695, %v416_v50  ;;  %v422_v53 = vmul.f32 1.442695, %v421_v51  ;;  %v5791_v50 = vld [vmem:[%s7032_s10 + $0x8] sm:$0xff]  ;;  %v5798_v51 = vld [vmem:[%s7032_s10] sm:$0xff] }
 0x231   :  { %5095 = vpow2.f32 %v417_v52  ;;  %v5805_v52 = vld [vmem:[%s7033_s9 + $0x18] sm:$0xff] }
 0x232   :  { %5097 = vpow2.f32 %v422_v53  ;;  %v5813_v53 = vld [vmem:[%s7033_s9 + $0x10] sm:$0xff] }
 0x23e   :  { %v5096_v54 = vpop.eup %5095 }
 0x23f   :  { %v5098_v55 = vpop.eup %5097  ;;  %419 = vadd.xlane.f32.xlu1 %v5096_v54  ;;  %v427_v56 = vmul.f32 %v5096_v54, %v5575_v26  ;;  %v5822_v54 = vld [vmem:[%s7033_s9 + $0x8] sm:$0xff] }
 0x240   :  { %v428_v57 = vmul.f32 %v5098_v55, %v5580_v27 }
 0x242   :  { %v429_v58 = vadd.f32 %v428_v57, %v427_v56 }
 0x243   :  { %424 = vadd.xlane.f32.xlu1 %v5098_v55  ;;  %v5829_v55 = vld [vmem:[%s7033_s9] sm:$0xff] }
 0x2c8   :  { %v420_v35 = vpop.xlane.xlu1 %419 }
 0x2cc   :  { %v425_v36 = vpop.xlane.xlu1 %424 }
 0x2cd   :  { %v426_v37 = vadd.f32 %v425_v36, %v420_v35 }
 0x2cf   :  { %5099 = vrcp.f32 %v426_v37 }
 0x2dc   :  { %v5100_v38 = vpop.eup %5099 }
 0x2dd   :  { %v431_v39 = vmul.f32 32.0, %v5100_v38 }
 0x2df   :  { %v432_v40 = vmul.f32 %v431_v39, %v429_v58 }
 0x2e1   :  { %4290 = vmatmul.mubr.f32.vlgmr.msra.gmra.mxu0 %v432_v40 }
 0x2e2   :  { %4337 = vmatpush3.msra.mxu0 %v5422_v10  ;;  %4368 = vmatprep.mubr.msk.f32.mxu0 %vm5286_vm0, %v7040_v0 }
 0x2e3   :  { %4338 = vmatprep.subr.mxu0 %v7040_v0 }
 0x2e4   :  { %4339 = vmatpush3.msra.mxu0 %v5432_v11 }
 0x2e5   :  { %4340 = vmatprep.subr.mxu0 %v7040_v0 }
 0x2e6   :  { %4341 = vmatpush3.msra.mxu0 %v5441_v12 }
 0x2e7   :  { %4342 = vmatprep.subr.mxu0 %v7040_v0 }
 0x2e8   :  { %4343 = vmatpush3.msra.mxu0 %v5450_v13 }
 0x2e9   :  { %4344 = vmatprep.subr.mxu0 %v7040_v0 }
 0x2ea   :  { %4345 = vmatpush3.msra.mxu0 %v5459_v14 }
 0x2eb   :  { %4346 = vmatprep.subr.mxu0 %v7040_v0 }
 0x2ec   :  { %4347 = vmatpush3.msra.mxu0 %v5468_v15 }
 0x2ed   :  { %4348 = vmatprep.subr.mxu0 %v7040_v0 }
 0x2ee   :  { %4349 = vmatpush3.msra.mxu0 %v5485_v16 }
 0x2ef   :  { %4350 = vmatprep.subr.mxu0 %v7040_v0 }
 0x2f0   :  { %4351 = vmatpush3.msra.mxu0 %v5494_v17 }
 0x2f1   :  { %4352 = vmatprep.subr.mxu0 %v7040_v0 }
 0x2f2   :  { %4353 = vmatpush3.msra.mxu0 %v5503_v18 }
 0x2f3   :  { %4354 = vmatprep.subr.mxu0 %v7040_v0 }
 0x2f4   :  { %4355 = vmatpush3.msra.mxu0 %v5508_v19 }
 0x2f5   :  { %4356 = vmatprep.subr.mxu0 %v7040_v0 }
 0x2f6   :  { %4357 = vmatpush3.msra.mxu0 %v5517_v20 }
 0x2f7   :  { %4358 = vmatprep.subr.mxu0 %v7040_v0 }
 0x2f8   :  { %4359 = vmatpush3.msra.mxu0 %v5526_v21 }
 0x2f9   :  { %4360 = vmatprep.subr.mxu0 %v7040_v0 }
 0x2fa   :  { %4361 = vmatpush3.msra.mxu0 %v5535_v22 }
 0x2fb   :  { %4362 = vmatprep.subr.mxu0 %v7040_v0 }
 0x2fc   :  { %4363 = vmatpush3.msra.mxu0 %v5544_v23 }
 0x2fd   :  { %4364 = vmatprep.subr.mxu0 %v7040_v0 }
 0x2fe   :  { %4365 = vmatpush3.msra.mxu0 %v5553_v24 }
 0x2ff   :  { %4366 = vmatprep.subr.mxu0 %v7040_v0 }
 0x300   :  { %4367 = vmatpush3.msra.mxu0 %v5562_v25 }
 0x301   :  { %4406 = vmatprep.subr.mxu0 %v7040_v0 }
 0x3a1   :  { %v499_v42 = vpop.f32.mrf.mxu0 }
 0x3a2   :  { %4301 = vmatmul.mubr.msk.f32.vlgmr.msra.gmra.mxu1 %vm118_vm1, %v499_v42 }
 0x3a3   :  { %v4291_v47 = vpop.f32.mrf.mxu0  ;;  %4311 = vmatprep.mubr.msk.f32.mxu1 %vm5286_vm0, %v7040_v0  ;;  %4304 = vmatpush3.msra.mxu1 %v5779_v48 }
 0x3a4   :  { %4305 = vmatprep.subr.mxu1 %v7040_v0 }
 0x3a5   :  { %4306 = vmatpush3.msra.mxu1 %v5786_v49 }
 0x3a6   :  { %4307 = vmatprep.subr.mxu1 %v7040_v0 }
 0x3a7   :  { %4308 = vmatpush3.msra.mxu1 %v5791_v50 }
 0x3a8   :  { %4309 = vmatprep.subr.mxu1 %v7040_v0 }
 0x3a9   :  { %4310 = vmatpush3.msra.mxu1 %v5798_v51 }
 0x3aa   :  { %4312 = vmatmul.mubr.f32.vlgmr.msra.gmra.mxu1 %v7040_v0  ;;  %4314 = vmatprep.subr.mxu1 %v7040_v0 }
 0x3ab   :  { %4315 = vmatpush3.msra.mxu1 %v5805_v52  ;;  %4322 = vmatprep.mubr.msk.f32.mxu1 %vm5286_vm0, %v7040_v0 }
 0x3ac   :  { %4316 = vmatprep.subr.mxu1 %v7040_v0 }
 0x3ad   :  { %4317 = vmatpush3.msra.mxu1 %v5813_v53 }
 0x3ae   :  { %4318 = vmatprep.subr.mxu1 %v7040_v0 }
 0x3af   :  { %4319 = vmatpush3.msra.mxu1 %v5822_v54 }
 0x3b0   :  { %4320 = vmatprep.subr.mxu1 %v7040_v0 }
 0x3b1   :  { %4321 = vmatpush3.msra.mxu1 %v5829_v55 }
 0x3b2   :  { %4325 = vmatprep.subr.mxu1 %v7040_v0 }
 0x462   :  { %v572_v56 = vpop.f32.mrf.mxu1 }
 0x463   :  { %v576_v57 = vadd.f32 %v572_v56, %v5584_v32 }
 0x464   :  { %v4302_v58 = vpop.f32.mrf.mxu1 }
 0x465   :  { %5101 = vtanh.f32 %v576_v57 }
 0x46a   :  { %v644_v36 = vpop.f32.mrf.mxu1 }
 0x46c   :  { %v4313_v37 = vpop.f32.mrf.mxu1 }
 0x472   :  { %v5102_v35 = vpop.eup %5101 }
 0x473   :  { %4323 = vmatmul.mubr.msk.f32.vlgmr.msra.gmra.mxu1 %vm118_vm1, %v5102_v35 }
 0x474   :  { %4326 = vmatpush3.msra.mxu1 %v5373_v1  ;;  %4333 = vmatprep.mubr.msk.f32.mxu1 %vm5286_vm0, %v7040_v0  ;;  %v5850_v1 = vld [vmem:[%s7034_s11] ss:$0 sm:$0xff] }
 0x475   :  { %4327 = vmatprep.subr.mxu1 %v7040_v0 }
 0x476   :  { %4328 = vmatpush3.msra.mxu1 %v5378_v2 }
 0x477   :  { %4329 = vmatprep.subr.mxu1 %v7040_v0 }
 0x478   :  { %4330 = vmatpush3.msra.mxu1 %v5394_v5 }
 0x479   :  { %4331 = vmatprep.subr.mxu1 %v7040_v0 }
 0x47a   :  { %4332 = vmatpush3.msra.mxu1 %v5405_v7 }
 0x47b   :  { %4371 = vmatprep.subr.mxu1 %v7040_v0 }
 0x533   :  { %v717_v38 = vpop.f32.mrf.mxu1 }
 0x534   :  { %v718_v39 = vadd.f32 %v717_v38, %v644_v36 }
 0x535   :  { %v4324_v2 = vpop.f32.mrf.mxu1 }
 0x536   :  { %v721_v40 = vadd.f32 %v5850_v1, %v718_v39 }
 0x538   :  { %5103 = vtanh.f32 %v721_v40  ;;  %v3691_v7 = vmul.f32 -1.442695, %v721_v40 }
 0x53a   :  { %5105 = vpow2.f32 %v3691_v7 }
 0x545   :  { %v5104_v5 = vpop.eup %5103 }
 0x546   :  { %731 = vrot.lane.b32.xlu0 %v5104_v5, %s5287_s22 }
 0x547   :  { %v5106_v42 = vpop.eup %5105 }
 0x548   :  { %v725_v47 = vadd.f32 1.0, %v5106_v42 }
 0x54a   :  { %5107 = vrcp.f32 %v725_v47 }
 0x557   :  { %v5108_v56 = vpop.eup %5107 }
 0x558   :  { %v729_v35 = vmul.f32 0.0, %v5108_v56 }
 0x5b8   :  { %v732_v57 = vpop.permute.xlu0 %731 }
 0x5b9   :  { %v734_v58 = vmul.f32 %v5108_v56, %v732_v57 }
 0x5bb   :  { %736 = vrot.lane.b32.xlu1 %v734_v58, %s5288_s23 }
 0x62d   :  { %v737_v36 = vpop.permute.xlu1 %736 }
 0x62e   :  { %v5855_v37 = vadd.f32 %v737_v36, %v729_v35 }
 0x630   :  { %5109 = vtanh.f32 %v5855_v37 }
 0x63d   :  { %v5110_v38 = vpop.eup %5109 }
 0x63e   :  { %742 = vrot.lane.b32.xlu1 %v5110_v38, %s5287_s22 }
 0x6b0   :  { %v743_v39 = vpop.permute.xlu1 %742 }
 0x6b1   :  { %v745_v2 = vmul.f32 %v5108_v56, %v743_v39 }
 0x6b3   :  { %747 = vrot.lane.b32.xlu1 %v745_v2, %s5288_s23 }
 0x725   :  { %v5860_v40 = vpop.permute.xlu1 %747 }
 0x726   :  { %750 = vst.msk [vmem:[#allocation2] sm:$0xff] %vm118_vm1, %v5860_v40  ;;  %4334 = vmatmul.mubr.msk.f32.vlgmr.msra.gmra.mxu1 %vm118_vm1, %v5860_v40 }
 0x727   :  { %4372 = vmatpush3.msra.mxu1 %v5422_v10  ;;  %4403 = vmatprep.mubr.msk.f32.mxu1 %vm5286_vm0, %v7040_v0 }
 0x728   :  { %4373 = vmatprep.subr.mxu1 %v7040_v0 }
 0x729   :  { %4374 = vmatpush3.msra.mxu1 %v5432_v11 }
 0x72a   :  { %4375 = vmatprep.subr.mxu1 %v7040_v0 }
 0x72b   :  { %4376 = vmatpush3.msra.mxu1 %v5441_v12 }
 0x72c   :  { %4377 = vmatprep.subr.mxu1 %v7040_v0 }
 0x72d   :  { %4378 = vmatpush3.msra.mxu1 %v5450_v13 }
 0x72e   :  { %4379 = vmatprep.subr.mxu1 %v7040_v0 }
 0x72f   :  { %4380 = vmatpush3.msra.mxu1 %v5459_v14 }
 0x730   :  { %4381 = vmatprep.subr.mxu1 %v7040_v0 }
 0x731   :  { %4382 = vmatpush3.msra.mxu1 %v5468_v15 }
 0x732   :  { %4383 = vmatprep.subr.mxu1 %v7040_v0 }
 0x733   :  { %4384 = vmatpush3.msra.mxu1 %v5485_v16 }
 0x734   :  { %4385 = vmatprep.subr.mxu1 %v7040_v0 }
 0x735   :  { %4386 = vmatpush3.msra.mxu1 %v5494_v17 }
 0x736   :  { %4387 = vmatprep.subr.mxu1 %v7040_v0 }
 0x737   :  { %4388 = vmatpush3.msra.mxu1 %v5503_v18 }
 0x738   :  { %4389 = vmatprep.subr.mxu1 %v7040_v0 }
 0x739   :  { %4390 = vmatpush3.msra.mxu1 %v5508_v19 }
 0x73a   :  { %4391 = vmatprep.subr.mxu1 %v7040_v0 }
 0x73b   :  { %4392 = vmatpush3.msra.mxu1 %v5517_v20 }
 0x73c   :  { %4393 = vmatprep.subr.mxu1 %v7040_v0 }
 0x73d   :  { %4394 = vmatpush3.msra.mxu1 %v5526_v21 }
 0x73e   :  { %4395 = vmatprep.subr.mxu1 %v7040_v0 }
 0x73f   :  { %4396 = vmatpush3.msra.mxu1 %v5535_v22 }
 0x740   :  { %4397 = vmatprep.subr.mxu1 %v7040_v0 }
 0x741   :  { %4398 = vmatpush3.msra.mxu1 %v5544_v23 }
 0x742   :  { %4399 = vmatprep.subr.mxu1 %v7040_v0 }
 0x743   :  { %4400 = vmatpush3.msra.mxu1 %v5553_v24 }
 0x744   :  { %4401 = vmatprep.subr.mxu1 %v7040_v0 }
 0x745   :  { %4402 = vmatpush3.msra.mxu1 %v5562_v25 }
 0x746   :  { %4441 = vmatprep.subr.mxu1 %v7040_v0 }
 0x7e6   :  { %v819_v5 = vpop.f32.mrf.mxu1 }
 0x7e7   :  { %v823_v7 = vadd.f32 %v819_v5, %v5575_v26  ;;  %v898_v42 = vadd.f32 %v819_v5, %v5580_v27 }
 0x7e8   :  { %v4335_v47 = vpop.f32.mrf.mxu1 }
 0x7e9   :  { %5111 = vtanh.f32 %v823_v7 }
 0x7ea   :  { %5113 = vtanh.f32 %v898_v42 }
 0x7f6   :  { %v5112_v56 = vpop.eup %5111 }
 0x7f7   :  { %v5114_v57 = vpop.eup %5113  ;;  %v825_v58 = vmul.f32 %v5112_v56, %v5589_v34 }
 0x7f8   :  { %v900_v35 = vmul.f32 %v5114_v57, %v5589_v34 }
 0x7f9   :  { %4369 = vmatmul.mubr.f32.vlgmr.msra.gmra.mxu0 %v825_v58 }
 0x7fa   :  { %4404 = vmatmul.mubr.f32.vlgmr.msra.gmra.mxu1 %v900_v35  ;;  %4407 = vmatpush3.msra.mxu0 %v5600_v43 }
 0x7fb   :  { %4408 = vmatprep.subr.mxu0 %v7040_v0  ;;  %4438 = vmatprep.mubr.msk.f32.mxu0 %vm5286_vm0, %v7040_v0 }
 0x7fc   :  { %4409 = vmatpush3.msra.mxu0 %v5605_v44  ;;  %4442 = vmatpush3.msra.mxu1 %v5713_v30 }
 0x7fd   :  { %4410 = vmatprep.subr.mxu0 %v7040_v0  ;;  %4443 = vmatprep.subr.mxu1 %v7040_v0 }
 0x7fe   :  { %4411 = vmatpush3.msra.mxu0 %v5612_v45  ;;  %4444 = vmatpush3.msra.mxu1 %v5718_v31 }
 0x7ff   :  { %4412 = vmatprep.subr.mxu0 %v7040_v0  ;;  %4445 = vmatprep.subr.mxu1 %v7040_v0 }
 0x800   :  { %4413 = vmatpush3.msra.mxu0 %v5619_v46  ;;  %4446 = vmatpush3.msra.mxu1 %v5726_v33 }
 0x801   :  { %4414 = vmatprep.subr.mxu0 %v7040_v0  ;;  %4447 = vmatprep.subr.mxu1 %v7040_v0 }
 0x802   :  { %4415 = vmatpush3.msra.mxu0 %v5630_v59  ;;  %4448 = vmatpush3.msra.mxu1 %v5769_v41 }
 0x803   :  { %4416 = vmatprep.subr.mxu0 %v7040_v0  ;;  %4449 = vmatprep.mubr.msk.f32.mxu1 %vm5286_vm0, %v7040_v0 }
 0x804   :  { %4417 = vmatpush3.msra.mxu0 %v5635_v60  ;;  %4452 = vmatprep.subr.mxu1 %v7040_v0 }
 0x805   :  { %4418 = vmatprep.subr.mxu0 %v7040_v0 }
 0x806   :  { %4419 = vmatpush3.msra.mxu0 %v5644_v61 }
 0x807   :  { %4420 = vmatprep.subr.mxu0 %v7040_v0 }
 0x808   :  { %4421 = vmatpush3.msra.mxu0 %v5651_v62 }
 0x809   :  { %4422 = vmatprep.subr.mxu0 %v7040_v0 }
 0x80a   :  { %4423 = vmatpush3.msra.mxu0 %v5658_v63 }
 0x80b   :  { %4424 = vmatprep.subr.mxu0 %v7040_v0 }
 0x80c   :  { %4425 = vmatpush3.msra.mxu0 %v5665_v3 }
 0x80d   :  { %4426 = vmatprep.subr.mxu0 %v7040_v0 }
 0x80e   :  { %4427 = vmatpush3.msra.mxu0 %v5672_v4 }
 0x80f   :  { %4428 = vmatprep.subr.mxu0 %v7040_v0 }
 0x810   :  { %4429 = vmatpush3.msra.mxu0 %v5679_v6 }
 0x811   :  { %4430 = vmatprep.subr.mxu0 %v7040_v0 }
 0x812   :  { %4431 = vmatpush3.msra.mxu0 %v5686_v8 }
 0x813   :  { %4432 = vmatprep.subr.mxu0 %v7040_v0 }
 0x814   :  { %4433 = vmatpush3.msra.mxu0 %v5693_v9 }
 0x815   :  { %4434 = vmatprep.subr.mxu0 %v7040_v0 }
 0x816   :  { %4435 = vmatpush3.msra.mxu0 %v5700_v28 }
 0x817   :  { %4436 = vmatprep.subr.mxu0 %v7040_v0 }
 0x818   :  { %4437 = vmatpush3.msra.mxu0 %v5706_v29 }
 0x819   :  { %4485 = vmatprep.subr.mxu0 %v7040_v0 }
 0x8b9   :  { %v892_v36 = vpop.f32.mrf.mxu0 }
 0x8ba   :  { %v967_v38 = vpop.f32.mrf.mxu1  ;;  %896 = vmax.xlane.f32.xlu0 %v892_v36 }
 0x8bb   :  { %971 = vmax.xlane.f32.xlu1 %v967_v38  ;;  %v4370_v39 = vpop.f32.mrf.mxu0 }
 0x8bc   :  { %v4405_v2 = vpop.f32.mrf.mxu1 }
 0x943   :  { %v897_v5 = vpop.xlane.xlu0 %896 }
 0x944   :  { %v972_v7 = vpop.xlane.xlu1 %971 }
 0x945   :  { %v973_v42 = vmax.f32 %v897_v5, %v972_v7  ;;  %v7049_v7 = vmov 0.0  }
 0x947   :  { %v974_v47 = vsub.f32 %v892_v36, %v973_v42  ;;  %v979_v56 = vsub.f32 %v967_v38, %v973_v42 }
 0x949   :  { %v975_v57 = vmul.f32 1.442695, %v974_v47  ;;  %v980_v58 = vmul.f32 1.442695, %v979_v56 }
 0x94b   :  { %5115 = vpow2.f32 %v975_v57 }
 0x94c   :  { %5117 = vpow2.f32 %v980_v58 }
 0x958   :  { %v5116_v35 = vpop.eup %5115 }
 0x959   :  { %v5118_v28 = vpop.eup %5117  ;;  %977 = vadd.xlane.f32.xlu0 %v5116_v35  ;;  %v985_v0 = vmul.f32 %v5116_v35, %v5575_v26 }
 0x95a   :  { %v986_v29 = vmul.f32 %v5118_v28, %v5580_v27 }
 0x95c   :  { %v987_v9 = vadd.f32 %v986_v29, %v985_v0  ;;  %v6028_v29 = vld [vmem:[%s7023_s6 + $0x8] sm:$0xff] }
 0x95d   :  { %982 = vadd.xlane.f32.xlu0 %v5118_v28  ;;  %v6021_v28 = vld [vmem:[%s7023_s6 + $0x10] sm:$0xff] }
 0x9e2   :  { %v978_v39 = vpop.xlane.xlu0 %977 }
 0x9e6   :  { %v983_v2 = vpop.xlane.xlu0 %982 }
 0x9e7   :  { %v984_v8 = vadd.f32 %v983_v2, %v978_v39 }
 0x9e9   :  { %5119 = vrcp.f32 %v984_v8 }
 0x9f6   :  { %v5120_v5 = vpop.eup %5119 }
 0x9f7   :  { %v989_v36 = vmul.f32 32.0, %v5120_v5 }
 0x9f9   :  { %v990_v38 = vmul.f32 %v989_v36, %v987_v9  ;;  %v6012_v9 = vld [vmem:[%s7023_s6 + $0x18] sm:$0xff] }
 0x9fb   :  { %4439 = vmatmul.mubr.f32.vlgmr.msra.gmra.mxu0 %v990_v38 }
 0x9fc   :  { %4486 = vmatpush3.msra.mxu0 %v5422_v10  ;;  %4517 = vmatprep.mubr.msk.f32.mxu0 %vm5286_vm0, %v7049_v7 }
 0x9fd   :  { %4487 = vmatprep.subr.mxu0 %v7049_v7 }
 0x9fe   :  { %4488 = vmatpush3.msra.mxu0 %v5432_v11 }
 0x9ff   :  { %4489 = vmatprep.subr.mxu0 %v7049_v7 }
 0xa00   :  { %4490 = vmatpush3.msra.mxu0 %v5441_v12 }
 0xa01   :  { %4491 = vmatprep.subr.mxu0 %v7049_v7 }
 0xa02   :  { %4492 = vmatpush3.msra.mxu0 %v5450_v13 }
 0xa03   :  { %4493 = vmatprep.subr.mxu0 %v7049_v7 }
 0xa04   :  { %4494 = vmatpush3.msra.mxu0 %v5459_v14 }
 0xa05   :  { %4495 = vmatprep.subr.mxu0 %v7049_v7 }
 0xa06   :  { %4496 = vmatpush3.msra.mxu0 %v5468_v15 }
 0xa07   :  { %4497 = vmatprep.subr.mxu0 %v7049_v7 }
 0xa08   :  { %4498 = vmatpush3.msra.mxu0 %v5485_v16 }
 0xa09   :  { %4499 = vmatprep.subr.mxu0 %v7049_v7 }
 0xa0a   :  { %4500 = vmatpush3.msra.mxu0 %v5494_v17 }
 0xa0b   :  { %4501 = vmatprep.subr.mxu0 %v7049_v7 }
 0xa0c   :  { %4502 = vmatpush3.msra.mxu0 %v5503_v18 }
 0xa0d   :  { %4503 = vmatprep.subr.mxu0 %v7049_v7 }
 0xa0e   :  { %4504 = vmatpush3.msra.mxu0 %v5508_v19 }
 0xa0f   :  { %4505 = vmatprep.subr.mxu0 %v7049_v7 }
 0xa10   :  { %4506 = vmatpush3.msra.mxu0 %v5517_v20 }
 0xa11   :  { %4507 = vmatprep.subr.mxu0 %v7049_v7 }
 0xa12   :  { %4508 = vmatpush3.msra.mxu0 %v5526_v21 }
 0xa13   :  { %4509 = vmatprep.subr.mxu0 %v7049_v7 }
 0xa14   :  { %4510 = vmatpush3.msra.mxu0 %v5535_v22 }
 0xa15   :  { %4511 = vmatprep.subr.mxu0 %v7049_v7 }
 0xa16   :  { %4512 = vmatpush3.msra.mxu0 %v5544_v23 }
 0xa17   :  { %4513 = vmatprep.subr.mxu0 %v7049_v7 }
 0xa18   :  { %4514 = vmatpush3.msra.mxu0 %v5553_v24 }
 0xa19   :  { %4515 = vmatprep.subr.mxu0 %v7049_v7 }
 0xa1a   :  { %4516 = vmatpush3.msra.mxu0 %v5562_v25 }
 0xa1b   :  { %4555 = vmatprep.subr.mxu0 %v7049_v7 }
 0xabb   :  { %v1057_v0 = vpop.f32.mrf.mxu0 }
 0xabc   :  { %4450 = vmatmul.mubr.msk.f32.vlgmr.msra.gmra.mxu1 %vm118_vm1, %v1057_v0 }
 0xabd   :  { %4453 = vmatpush3.msra.mxu1 %v5779_v48  ;;  %v4440_v10 = vpop.f32.mrf.mxu0  ;;  %4460 = vmatprep.mubr.msk.f32.mxu1 %vm5286_vm0, %v7049_v7 }
 0xabe   :  { %4454 = vmatprep.subr.mxu1 %v7049_v7 }
 0xabf   :  { %4455 = vmatpush3.msra.mxu1 %v5786_v49 }
 0xac0   :  { %4456 = vmatprep.subr.mxu1 %v7049_v7 }
 0xac1   :  { %4457 = vmatpush3.msra.mxu1 %v5791_v50 }
 0xac2   :  { %4458 = vmatprep.subr.mxu1 %v7049_v7 }
 0xac3   :  { %4459 = vmatpush3.msra.mxu1 %v5798_v51 }
 0xac4   :  { %4461 = vmatmul.mubr.msk.f32.vlgmr.msra.gmra.mxu1 %vm118_vm1, %v5860_v40  ;;  %4463 = vmatprep.subr.mxu1 %v7049_v7  ;;  %v6035_v40 = vld [vmem:[%s7023_s6] sm:$0xff] }
 0xac5   :  { %4464 = vmatpush3.msra.mxu1 %v5805_v52  ;;  %4471 = vmatprep.mubr.msk.f32.mxu1 %vm5286_vm0, %v7049_v7 }
 0xac6   :  { %4465 = vmatprep.subr.mxu1 %v7049_v7 }
 0xac7   :  { %4466 = vmatpush3.msra.mxu1 %v5813_v53 }
 0xac8   :  { %4467 = vmatprep.subr.mxu1 %v7049_v7 }
 0xac9   :  { %4468 = vmatpush3.msra.mxu1 %v5822_v54 }
 0xaca   :  { %4469 = vmatprep.subr.mxu1 %v7049_v7 }
 0xacb   :  { %4470 = vmatpush3.msra.mxu1 %v5829_v55 }
 0xacc   :  { %4474 = vmatprep.subr.mxu1 %v7049_v7 }
 0xb7c   :  { %v1130_v11 = vpop.f32.mrf.mxu1 }
 0xb7d   :  { %v1134_v12 = vadd.f32 %v1130_v11, %v5584_v32 }
 0xb7e   :  { %v4451_v13 = vpop.f32.mrf.mxu1 }
 0xb7f   :  { %5121 = vtanh.f32 %v1134_v12 }
 0xb84   :  { %v1202_v14 = vpop.f32.mrf.mxu1 }
 0xb86   :  { %v4462_v15 = vpop.f32.mrf.mxu1 }
 0xb8c   :  { %v5122_v8 = vpop.eup %5121 }
 0xb8d   :  { %4472 = vmatmul.mubr.msk.f32.vlgmr.msra.gmra.mxu1 %vm118_vm1, %v5122_v8  ;;  %v6066_v8 = vld [vmem:[%s7027_s7 + $0x70] sm:$0xff] }
 0xb8e   :  { %4475 = vmatpush3.msra.mxu1 %v6012_v9  ;;  %4482 = vmatprep.mubr.msk.f32.mxu1 %vm5286_vm0, %v7049_v7 }
 0xb8f   :  { %4476 = vmatprep.subr.mxu1 %v7049_v7 }
 0xb90   :  { %4477 = vmatpush3.msra.mxu1 %v6021_v28 }
 0xb91   :  { %4478 = vmatprep.subr.mxu1 %v7049_v7 }
 0xb92   :  { %4479 = vmatpush3.msra.mxu1 %v6028_v29 }
 0xb93   :  { %4480 = vmatprep.subr.mxu1 %v7049_v7 }
 0xb94   :  { %4481 = vmatpush3.msra.mxu1 %v6035_v40 }
 0xb95   :  { %4520 = vmatprep.subr.mxu1 %v7049_v7 }
 0xc4d   :  { %v1275_v42 = vpop.f32.mrf.mxu1 }
 0xc4e   :  { %v1276_v47 = vadd.f32 %v1275_v42, %v1202_v14  ;;  %v6073_v42 = vld [vmem:[%s7027_s7 + $0x68] sm:$0xff] }
 0xc4f   :  { %v4473_v56 = vpop.f32.mrf.mxu1 }
 0xc50   :  { %v1279_v57 = vadd.f32 %v5850_v1, %v1276_v47  ;;  %v6080_v47 = vld [vmem:[%s7027_s7 + $0x60] sm:$0xff]  ;;  %v6087_v56 = vld [vmem:[%s7027_s7 + $0x58] sm:$0xff] }
 0xc52   :  { %5123 = vtanh.f32 %v1279_v57  ;;  %v3696_v35 = vmul.f32 -1.442695, %v1279_v57  ;;  %v6094_v57 = vld [vmem:[%s7027_s7 + $0x50] sm:$0xff] }
 0xc54   :  { %5125 = vpow2.f32 %v3696_v35 }
 0xc5f   :  { %v5124_v58 = vpop.eup %5123 }
 0xc60   :  { %1289 = vrot.lane.b32.xlu0 %v5124_v58, %s5287_s22 }
 0xc61   :  { %v5126_v39 = vpop.eup %5125 }
 0xc62   :  { %v1283_v2 = vadd.f32 1.0, %v5126_v39 }
 0xc64   :  { %5127 = vrcp.f32 %v1283_v2 }
 0xc71   :  { %v5128_v5 = vpop.eup %5127 }
 0xc72   :  { %v1287_v0 = vmul.f32 %v5128_v5, %v5855_v37  ;;  %v6057_v37 = vld [vmem:[%s7027_s7 + $0x78] sm:$0xff] }
 0xcd2   :  { %v1290_v36 = vpop.permute.xlu0 %1289 }
 0xcd3   :  { %v1292_v38 = vmul.f32 %v5128_v5, %v1290_v36 }
 0xcd5   :  { %1294 = vrot.lane.b32.xlu1 %v1292_v38, %s5288_s23 }
 0xd47   :  { %v1295_v10 = vpop.permute.xlu1 %1294 }
 0xd48   :  { %v6043_v11 = vadd.f32 %v1295_v10, %v1287_v0  ;;  %v6195_v0 = vld [vmem:[%s7027_s7 + $0x48] sm:$0xff]  ;;  %v6202_v10 = vld [vmem:[%s7027_s7 + $0x40] sm:$0xff] }
 0xd4a   :  { %5129 = vtanh.f32 %v6043_v11 }
 0xd57   :  { %v5130_v12 = vpop.eup %5129 }
 0xd58   :  { %1300 = vrot.lane.b32.xlu1 %v5130_v12, %s5287_s22  ;;  %v6209_v12 = vld [vmem:[%s7027_s7 + $0x38] sm:$0xff] }
 0xdca   :  { %v1301_v13 = vpop.permute.xlu1 %1300 }
 0xdcb   :  { %v1303_v14 = vmul.f32 %v5128_v5, %v1301_v13  ;;  %v6216_v13 = vld [vmem:[%s7027_s7 + $0x30] sm:$0xff] }
 0xdcd   :  { %1305 = vrot.lane.b32.xlu1 %v1303_v14, %s5288_s23  ;;  %v6223_v14 = vld [vmem:[%s7027_s7 + $0x28] sm:$0xff] }
 0xe3f   :  { %v6048_v15 = vpop.permute.xlu1 %1305 }
 0xe40   :  { %1308 = vst.msk [vmem:[#allocation2 + $0x8] sm:$0xff] %vm118_vm1, %v6048_v15  ;;  %4483 = vmatmul.mubr.msk.f32.vlgmr.msra.gmra.mxu1 %vm118_vm1, %v6048_v15 }
 0xe41   :  { %4521 = vmatpush3.msra.mxu1 %v6057_v37  ;;  %4552 = vmatprep.mubr.msk.f32.mxu1 %vm5286_vm0, %v7049_v7 }
 0xe42   :  { %4522 = vmatprep.subr.mxu1 %v7049_v7 }
 0xe43   :  { %4523 = vmatpush3.msra.mxu1 %v6066_v8 }
 0xe44   :  { %4524 = vmatprep.subr.mxu1 %v7049_v7 }
 0xe45   :  { %4525 = vmatpush3.msra.mxu1 %v6073_v42 }
 0xe46   :  { %4526 = vmatprep.subr.mxu1 %v7049_v7 }
 0xe47   :  { %4527 = vmatpush3.msra.mxu1 %v6080_v47 }
 0xe48   :  { %4528 = vmatprep.subr.mxu1 %v7049_v7 }
 0xe49   :  { %4529 = vmatpush3.msra.mxu1 %v6087_v56 }
 0xe4a   :  { %4530 = vmatprep.subr.mxu1 %v7049_v7 }
 0xe4b   :  { %4531 = vmatpush3.msra.mxu1 %v6094_v57 }
 0xe4c   :  { %4532 = vmatprep.subr.mxu1 %v7049_v7 }
 0xe4d   :  { %4533 = vmatpush3.msra.mxu1 %v5485_v16 }
 0xe4e   :  { %4534 = vmatprep.subr.mxu1 %v7049_v7 }
 0xe4f   :  { %4535 = vmatpush3.msra.mxu1 %v5494_v17 }
 0xe50   :  { %4536 = vmatprep.subr.mxu1 %v7049_v7 }
 0xe51   :  { %4537 = vmatpush3.msra.mxu1 %v5503_v18 }
 0xe52   :  { %4538 = vmatprep.subr.mxu1 %v7049_v7 }
 0xe53   :  { %4539 = vmatpush3.msra.mxu1 %v5508_v19 }
 0xe54   :  { %4540 = vmatprep.subr.mxu1 %v7049_v7 }
 0xe55   :  { %4541 = vmatpush3.msra.mxu1 %v5517_v20 }
 0xe56   :  { %4542 = vmatprep.subr.mxu1 %v7049_v7 }
 0xe57   :  { %4543 = vmatpush3.msra.mxu1 %v5526_v21 }
 0xe58   :  { %4544 = vmatprep.subr.mxu1 %v7049_v7 }
 0xe59   :  { %4545 = vmatpush3.msra.mxu1 %v5535_v22 }
 0xe5a   :  { %4546 = vmatprep.subr.mxu1 %v7049_v7 }
 0xe5b   :  { %4547 = vmatpush3.msra.mxu1 %v5544_v23 }
 0xe5c   :  { %4548 = vmatprep.subr.mxu1 %v7049_v7 }
 0xe5d   :  { %4549 = vmatpush3.msra.mxu1 %v5553_v24  ;;  %v7050_v24 = vld [vmem:[#allocation3_spill] sm:$0xff] }
 0xe5e   :  { %4550 = vmatprep.subr.mxu1 %v7049_v7 }
 0xe5f   :  { %4551 = vmatpush3.msra.mxu1 %v5562_v25  ;;  %v7051_v25 = vld [vmem:[#allocation4_spill] sm:$0xff] }
 0xe60   :  { %4590 = vmatprep.subr.mxu1 %v7049_v7 }
 0xf00   :  { %v1377_v16 = vpop.f32.mrf.mxu1 }
 0xf01   :  { %v1381_v17 = vadd.f32 %v1377_v16, %v5575_v26  ;;  %v1456_v18 = vadd.f32 %v1377_v16, %v5580_v27  ;;  %v7052_v26 = vld [vmem:[#allocation5_spill] sm:$0xff]  ;;  %v7053_v27 = vld [vmem:[#allocation6_spill] sm:$0xff] }
 0xf02   :  { %v4484_v19 = vpop.f32.mrf.mxu1  ;;  %v6230_v16 = vld [vmem:[%s7027_s7 + $0x20] sm:$0xff] }
 0xf03   :  { %5131 = vtanh.f32 %v1381_v17  ;;  %v6237_v17 = vld [vmem:[%s7027_s7 + $0x18] sm:$0xff]  ;;  %v6251_v19 = vld [vmem:[%s7027_s7 + $0x8] sm:$0xff] }
 0xf04   :  { %5133 = vtanh.f32 %v1456_v18  ;;  %v6244_v18 = vld [vmem:[%s7027_s7 + $0x10] sm:$0xff] }
 0xf10   :  { %v5132_v20 = vpop.eup %5131 }
 0xf11   :  { %v5134_v21 = vpop.eup %5133  ;;  %v1383_v22 = vmul.f32 %v5132_v20, %v5589_v34  ;;  %v6258_v20 = vld [vmem:[%s7027_s7] sm:$0xff] }
 0xf12   :  { %v1458_v23 = vmul.f32 %v5134_v21, %v5589_v34 }
 0xf13   :  { %4518 = vmatmul.mubr.f32.vlgmr.msra.gmra.mxu0 %v1383_v22 }
 0xf14   :  { %4553 = vmatmul.mubr.f32.vlgmr.msra.gmra.mxu1 %v1458_v23  ;;  %4556 = vmatpush3.msra.mxu0 %v5600_v43 }
 0xf15   :  { %4557 = vmatprep.subr.mxu0 %v7049_v7  ;;  %4587 = vmatprep.mubr.msk.f32.mxu0 %vm5286_vm0, %v7049_v7 }
 0xf16   :  { %4558 = vmatpush3.msra.mxu0 %v5605_v44  ;;  %4591 = vmatpush3.msra.mxu1 %v5713_v30  ;;  %v6169_v30 = vld [vmem:[%s7028_s0] sm:$0xff] }
 0xf17   :  { %4559 = vmatprep.subr.mxu0 %v7049_v7  ;;  %4592 = vmatprep.subr.mxu1 %v7049_v7 }
 0xf18   :  { %4560 = vmatpush3.msra.mxu0 %v5612_v45  ;;  %4593 = vmatpush3.msra.mxu1 %v5718_v31 }
 0xf19   :  { %4561 = vmatprep.subr.mxu0 %v7049_v7  ;;  %4594 = vmatprep.subr.mxu1 %v7049_v7 }
 0xf1a   :  { %4562 = vmatpush3.msra.mxu0 %v5619_v46  ;;  %4595 = vmatpush3.msra.mxu1 %v5726_v33  ;;  %v6175_v33 = vld [vmem:[%s7028_s0 + $0x8] sm:$0xff] }
 0xf1b   :  { %4563 = vmatprep.subr.mxu0 %v7049_v7  ;;  %4596 = vmatprep.subr.mxu1 %v7049_v7 }
 0xf1c   :  { %4564 = vmatpush3.msra.mxu0 %v5630_v59  ;;  %4597 = vmatpush3.msra.mxu1 %v5769_v41 }
 0xf1d   :  { %4565 = vmatprep.subr.mxu0 %v7049_v7  ;;  %4598 = vmatprep.mubr.msk.f32.mxu1 %vm5286_vm0, %v7049_v7 }
 0xf1e   :  { %4566 = vmatpush3.msra.mxu0 %v5635_v60  ;;  %4601 = vmatprep.subr.mxu1 %v7049_v7 }
 0xf1f   :  { %4567 = vmatprep.subr.mxu0 %v7049_v7 }
 0xf20   :  { %4568 = vmatpush3.msra.mxu0 %v5644_v61 }
 0xf21   :  { %4569 = vmatprep.subr.mxu0 %v7049_v7 }
 0xf22   :  { %4570 = vmatpush3.msra.mxu0 %v5651_v62 }
 0xf23   :  { %4571 = vmatprep.subr.mxu0 %v7049_v7 }
 0xf24   :  { %4572 = vmatpush3.msra.mxu0 %v5658_v63 }
 0xf25   :  { %4573 = vmatprep.subr.mxu0 %v7049_v7 }
 0xf26   :  { %4574 = vmatpush3.msra.mxu0 %v5665_v3 }
 0xf27   :  { %4575 = vmatprep.subr.mxu0 %v7049_v7 }
 0xf28   :  { %4576 = vmatpush3.msra.mxu0 %v5672_v4 }
 0xf29   :  { %4577 = vmatprep.subr.mxu0 %v7049_v7 }
 0xf2a   :  { %4578 = vmatpush3.msra.mxu0 %v5679_v6 }
 0xf2b   :  { %4579 = vmatprep.subr.mxu0 %v7049_v7 }
 0xf2c   :  { %4580 = vmatpush3.msra.mxu0 %v7050_v24 }
 0xf2d   :  { %4581 = vmatprep.subr.mxu0 %v7049_v7 }
 0xf2e   :  { %4582 = vmatpush3.msra.mxu0 %v7051_v25 }
 0xf2f   :  { %4583 = vmatprep.subr.mxu0 %v7049_v7 }
 0xf30   :  { %4584 = vmatpush3.msra.mxu0 %v7052_v26 }
 0xf31   :  { %4585 = vmatprep.subr.mxu0 %v7049_v7 }
 0xf32   :  { %4586 = vmatpush3.msra.mxu0 %v7053_v27 }
 0xf33   :  { %4634 = vmatprep.subr.mxu0 %v7049_v7 }
 0xfd3   :  { %v1450_v34 = vpop.f32.mrf.mxu0 }
 0xfd4   :  { %v1525_v43 = vpop.f32.mrf.mxu1  ;;  %1454 = vmax.xlane.f32.xlu0 %v1450_v34 }
 0xfd5   :  { %1529 = vmax.xlane.f32.xlu1 %v1525_v43  ;;  %v4519_v44 = vpop.f32.mrf.mxu0 }
 0xfd6   :  { %v4554_v45 = vpop.f32.mrf.mxu1 }
0x105d   :  { %v1455_v46 = vpop.xlane.xlu0 %1454 }
0x105e   :  { %v1530_v59 = vpop.xlane.xlu1 %1529 }
0x105f   :  { %v1531_v60 = vmax.f32 %v1455_v46, %v1530_v59 }
0x1061   :  { %v1532_v61 = vsub.f32 %v1450_v34, %v1531_v60  ;;  %v1537_v62 = vsub.f32 %v1525_v43, %v1531_v60 }
0x1063   :  { %v1533_v63 = vmul.f32 1.442695, %v1532_v61  ;;  %v1538_v3 = vmul.f32 1.442695, %v1537_v62 }
0x1065   :  { %5135 = vpow2.f32 %v1533_v63 }
0x1066   :  { %5137 = vpow2.f32 %v1538_v3 }
0x1072   :  { %v5136_v4 = vpop.eup %5135 }
0x1073   :  { %v5138_v6 = vpop.eup %5137  ;;  %1535 = vadd.xlane.f32.xlu0 %v5136_v4  ;;  %v1543_v31 = vmul.f32 %v6169_v30, %v5136_v4 }
0x1074   :  { %v1544_v41 = vmul.f32 %v6175_v33, %v5138_v6 }
0x1076   :  { %v1545_v58 = vadd.f32 %v1544_v41, %v1543_v31  ;;  %v6351_v41 = vld [vmem:[%s7029_s3] ss:$0 sm:$0xff] }
0x1077   :  { %1540 = vadd.xlane.f32.xlu0 %v5138_v6 }
0x10fc   :  { %v1536_v35 = vpop.xlane.xlu0 %1535 }
0x1100   :  { %v1541_v39 = vpop.xlane.xlu0 %1540 }
0x1101   :  { %v1542_v2 = vadd.f32 %v1541_v39, %v1536_v35  ;;  %v6358_v39 = vld [vmem:[%s7030_s8 + $0x78] sm:$0xff] }
0x1103   :  { %5139 = vrcp.f32 %v1542_v2  ;;  %v6367_v2 = vld [vmem:[%s7030_s8 + $0x70] sm:$0xff] }
0x1110   :  { %v5140_v5 = vpop.eup %5139 }
0x1111   :  { %v1547_v36 = vmul.f32 32.0, %v5140_v5  ;;  %v6373_v5 = vld [vmem:[%s7031_s5 + $0x18] sm:$0xff] }
0x1113   :  { %v1548_v38 = vmul.f32 %v1547_v36, %v1545_v58  ;;  %v6381_v36 = vld [vmem:[%s7030_s8 + $0x68] sm:$0xff] }
0x1115   :  { %4588 = vmatmul.mubr.f32.vlgmr.msra.gmra.mxu0 %v1548_v38  ;;  %v6387_v38 = vld [vmem:[%s7031_s5 + $0x10] sm:$0xff] }
0x1116   :  { %4635 = vmatpush3.msra.mxu0 %v6057_v37  ;;  %4666 = vmatprep.mubr.msk.f32.mxu0 %vm5286_vm0, %v7049_v7 }
0x1117   :  { %4636 = vmatprep.subr.mxu0 %v7049_v7 }
0x1118   :  { %4637 = vmatpush3.msra.mxu0 %v6066_v8 }
0x1119   :  { %4638 = vmatprep.subr.mxu0 %v7049_v7 }
0x111a   :  { %4639 = vmatpush3.msra.mxu0 %v6073_v42 }
0x111b   :  { %4640 = vmatprep.subr.mxu0 %v7049_v7 }
0x111c   :  { %4641 = vmatpush3.msra.mxu0 %v6080_v47 }
0x111d   :  { %4642 = vmatprep.subr.mxu0 %v7049_v7 }
0x111e   :  { %4643 = vmatpush3.msra.mxu0 %v6087_v56 }
0x111f   :  { %4644 = vmatprep.subr.mxu0 %v7049_v7 }
0x1120   :  { %4645 = vmatpush3.msra.mxu0 %v6094_v57 }
0x1121   :  { %4646 = vmatprep.subr.mxu0 %v7049_v7 }
0x1122   :  { %4647 = vmatpush3.msra.mxu0 %v6195_v0 }
0x1123   :  { %4648 = vmatprep.subr.mxu0 %v7049_v7 }
0x1124   :  { %4649 = vmatpush3.msra.mxu0 %v6202_v10 }
0x1125   :  { %4650 = vmatprep.subr.mxu0 %v7049_v7 }
0x1126   :  { %4651 = vmatpush3.msra.mxu0 %v6209_v12 }
0x1127   :  { %4652 = vmatprep.subr.mxu0 %v7049_v7 }
0x1128   :  { %4653 = vmatpush3.msra.mxu0 %v6216_v13 }
0x1129   :  { %4654 = vmatprep.subr.mxu0 %v7049_v7 }
0x112a   :  { %4655 = vmatpush3.msra.mxu0 %v6223_v14 }
0x112b   :  { %4656 = vmatprep.subr.mxu0 %v7049_v7 }
0x112c   :  { %4657 = vmatpush3.msra.mxu0 %v6230_v16 }
0x112d   :  { %4658 = vmatprep.subr.mxu0 %v7049_v7 }
0x112e   :  { %4659 = vmatpush3.msra.mxu0 %v6237_v17 }
0x112f   :  { %4660 = vmatprep.subr.mxu0 %v7049_v7 }
0x1130   :  { %4661 = vmatpush3.msra.mxu0 %v6244_v18 }
0x1131   :  { %4662 = vmatprep.subr.mxu0 %v7049_v7 }
0x1132   :  { %4663 = vmatpush3.msra.mxu0 %v6251_v19 }
0x1133   :  { %4664 = vmatprep.subr.mxu0 %v7049_v7 }
0x1134   :  { %4665 = vmatpush3.msra.mxu0 %v6258_v20 }
0x1135   :  { %4704 = vmatprep.subr.mxu0 %v7049_v7 }
0x11d5   :  { %v1615_v21 = vpop.f32.mrf.mxu0 }
0x11d6   :  { %4599 = vmatmul.mubr.msk.f32.vlgmr.msra.gmra.mxu1 %vm118_vm1, %v1615_v21  ;;  %v6395_v21 = vld [vmem:[%s7030_s8 + $0x60] sm:$0xff] }
0x11d7   :  { %4602 = vmatpush3.msra.mxu1 %v5779_v48  ;;  %v4589_v22 = vpop.f32.mrf.mxu0  ;;  %4609 = vmatprep.mubr.msk.f32.mxu1 %vm5286_vm0, %v7049_v7 }
0x11d8   :  { %4603 = vmatprep.subr.mxu1 %v7049_v7  ;;  %v6401_v22 = vld [vmem:[%s7031_s5 + $0x8] sm:$0xff] }
0x11d9   :  { %4604 = vmatpush3.msra.mxu1 %v5786_v49 }
0x11da   :  { %4605 = vmatprep.subr.mxu1 %v7049_v7 }
0x11db   :  { %4606 = vmatpush3.msra.mxu1 %v5791_v50 }
0x11dc   :  { %4607 = vmatprep.subr.mxu1 %v7049_v7 }
0x11dd   :  { %4608 = vmatpush3.msra.mxu1 %v5798_v51 }
0x11de   :  { %4610 = vmatmul.mubr.msk.f32.vlgmr.msra.gmra.mxu1 %vm118_vm1, %v6048_v15  ;;  %4612 = vmatprep.subr.mxu1 %v7049_v7 }
0x11df   :  { %4613 = vmatpush3.msra.mxu1 %v5805_v52  ;;  %4620 = vmatprep.mubr.msk.f32.mxu1 %vm5286_vm0, %v7049_v7 }
0x11e0   :  { %4614 = vmatprep.subr.mxu1 %v7049_v7 }
0x11e1   :  { %4615 = vmatpush3.msra.mxu1 %v5813_v53 }
0x11e2   :  { %4616 = vmatprep.subr.mxu1 %v7049_v7 }
0x11e3   :  { %4617 = vmatpush3.msra.mxu1 %v5822_v54 }
0x11e4   :  { %4618 = vmatprep.subr.mxu1 %v7049_v7 }
0x11e5   :  { %4619 = vmatpush3.msra.mxu1 %v5829_v55 }
0x11e6   :  { %4623 = vmatprep.subr.mxu1 %v7049_v7 }
0x1296   :  { %v1688_v48 = vpop.f32.mrf.mxu1 }
0x1297   :  { %v1692_v49 = vadd.f32 %v1688_v48, %v5584_v32  ;;  %v6409_v48 = vld [vmem:[%s7030_s8 + $0x58] sm:$0xff] }
0x1298   :  { %v4600_v50 = vpop.f32.mrf.mxu1 }
0x1299   :  { %5141 = vtanh.f32 %v1692_v49  ;;  %v6415_v49 = vld [vmem:[%s7031_s5] sm:$0xff]  ;;  %v6424_v50 = vld [vmem:[%s7030_s8 + $0x50] sm:$0xff] }
0x129e   :  { %v1760_v51 = vpop.f32.mrf.mxu1 }
0x12a0   :  { %v4611_v52 = vpop.f32.mrf.mxu1 }
0x12a1   :  { %v6439_v52 = vld [vmem:[%s7030_s8 + $0x40] sm:$0xff] }
0x12a6   :  { %v5142_v15 = vpop.eup %5141 }
0x12a7   :  { %4621 = vmatmul.mubr.msk.f32.vlgmr.msra.gmra.mxu1 %vm118_vm1, %v5142_v15  ;;  %v6446_v15 = vld [vmem:[%s7030_s8 + $0x38] sm:$0xff] }
0x12a8   :  { %4624 = vmatpush3.msra.mxu1 %v6012_v9  ;;  %4631 = vmatprep.mubr.msk.f32.mxu1 %vm5286_vm0, %v7049_v7 }
0x12a9   :  { %4625 = vmatprep.subr.mxu1 %v7049_v7 }
0x12aa   :  { %4626 = vmatpush3.msra.mxu1 %v6021_v28 }
0x12ab   :  { %4627 = vmatprep.subr.mxu1 %v7049_v7 }
0x12ac   :  { %4628 = vmatpush3.msra.mxu1 %v6028_v29 }
0x12ad   :  { %4629 = vmatprep.subr.mxu1 %v7049_v7 }
0x12ae   :  { %4630 = vmatpush3.msra.mxu1 %v6035_v40 }
0x12af   :  { %4669 = vmatprep.subr.mxu1 %v7049_v7 }
0x1367   :  { %v1833_v53 = vpop.f32.mrf.mxu1 }
0x1368   :  { %v1834_v54 = vadd.f32 %v1833_v53, %v1760_v51  ;;  %v6432_v51 = vld [vmem:[%s7030_s8 + $0x48] sm:$0xff]  ;;  %v6453_v53 = vld [vmem:[%s7030_s8 + $0x30] sm:$0xff] }
0x1369   :  { %v4622_v55 = vpop.f32.mrf.mxu1 }
0x136a   :  { %v1837_v23 = vadd.f32 %v5850_v1, %v1834_v54  ;;  %v6460_v54 = vld [vmem:[%s7030_s8 + $0x28] sm:$0xff]  ;;  %v6467_v55 = vld [vmem:[%s7030_s8 + $0x20] sm:$0xff] }
0x136c   :  { %5143 = vtanh.f32 %v1837_v23  ;;  %v3701_v25 = vmul.f32 -1.442695, %v1837_v23  ;;  %v6474_v23 = vld [vmem:[%s7030_s8 + $0x18] sm:$0xff] }
0x136e   :  { %5145 = vpow2.f32 %v3701_v25  ;;  %v6488_v25 = vld [vmem:[%s7030_s8 + $0x8] sm:$0xff] }
0x1379   :  { %v5144_v24 = vpop.eup %5143 }
0x137a   :  { %1847 = vrot.lane.b32.xlu0 %v5144_v24, %s5287_s22  ;;  %v6481_v24 = vld [vmem:[%s7030_s8 + $0x10] sm:$0xff] }
0x137b   :  { %v5146_v26 = vpop.eup %5145 }
0x137c   :  { %v1841_v27 = vadd.f32 1.0, %v5146_v26  ;;  %v6495_v26 = vld [vmem:[%s7030_s8] sm:$0xff] }
0x137e   :  { %5147 = vrcp.f32 %v1841_v27 }
0x138b   :  { %v5148_v34 = vpop.eup %5147 }
0x138c   :  { %v1845_v45 = vmul.f32 %v5148_v34, %v6043_v11 }
0x13ec   :  { %v1848_v43 = vpop.permute.xlu0 %1847 }
0x13ed   :  { %v1850_v44 = vmul.f32 %v5148_v34, %v1848_v43 }
0x13ef   :  { %1852 = vrot.lane.b32.xlu1 %v1850_v44, %s5288_s23 }
0x1461   :  { %v1853_v46 = vpop.permute.xlu1 %1852 }
0x1462   :  { %v6301_v59 = vadd.f32 %v1853_v46, %v1845_v45 }
0x1464   :  { %5149 = vtanh.f32 %v6301_v59 }
0x1471   :  { %v5150_v1 = vpop.eup %5149 }
0x1472   :  { %1858 = vrot.lane.b32.xlu1 %v5150_v1, %s5287_s22 }
0x14e4   :  { %v1859_v60 = vpop.permute.xlu1 %1858 }
0x14e5   :  { %v1861_v61 = vmul.f32 %v5148_v34, %v1859_v60 }
0x14e7   :  { %1863 = vrot.lane.b32.xlu1 %v1861_v61, %s5288_s23 }
0x1559   :  { %v6306_v62 = vpop.permute.xlu1 %1863 }
0x155a   :  { %1866 = vst.msk [vmem:[#allocation2 + $0x10] sm:$0xff] %vm118_vm1, %v6306_v62  ;;  %4632 = vmatmul.mubr.msk.f32.vlgmr.msra.gmra.mxu1 %vm118_vm1, %v6306_v62 }
0x155b   :  { %4670 = vmatpush3.msra.mxu1 %v6057_v37  ;;  %4701 = vmatprep.mubr.msk.f32.mxu1 %vm5286_vm0, %v7049_v7 }
0x155c   :  { %4671 = vmatprep.subr.mxu1 %v7049_v7 }
0x155d   :  { %4672 = vmatpush3.msra.mxu1 %v6066_v8 }
0x155e   :  { %4673 = vmatprep.subr.mxu1 %v7049_v7 }
0x155f   :  { %4674 = vmatpush3.msra.mxu1 %v6073_v42 }
0x1560   :  { %4675 = vmatprep.subr.mxu1 %v7049_v7 }
0x1561   :  { %4676 = vmatpush3.msra.mxu1 %v6080_v47 }
0x1562   :  { %4677 = vmatprep.subr.mxu1 %v7049_v7 }
0x1563   :  { %4678 = vmatpush3.msra.mxu1 %v6087_v56 }
0x1564   :  { %4679 = vmatprep.subr.mxu1 %v7049_v7 }
0x1565   :  { %4680 = vmatpush3.msra.mxu1 %v6094_v57 }
0x1566   :  { %4681 = vmatprep.subr.mxu1 %v7049_v7 }
0x1567   :  { %4682 = vmatpush3.msra.mxu1 %v6195_v0 }
0x1568   :  { %4683 = vmatprep.subr.mxu1 %v7049_v7 }
0x1569   :  { %4684 = vmatpush3.msra.mxu1 %v6202_v10 }
0x156a   :  { %4685 = vmatprep.subr.mxu1 %v7049_v7 }
0x156b   :  { %4686 = vmatpush3.msra.mxu1 %v6209_v12 }
0x156c   :  { %4687 = vmatprep.subr.mxu1 %v7049_v7 }
0x156d   :  { %4688 = vmatpush3.msra.mxu1 %v6216_v13 }
0x156e   :  { %4689 = vmatprep.subr.mxu1 %v7049_v7 }
0x156f   :  { %4690 = vmatpush3.msra.mxu1 %v6223_v14 }
0x1570   :  { %4691 = vmatprep.subr.mxu1 %v7049_v7 }
0x1571   :  { %4692 = vmatpush3.msra.mxu1 %v6230_v16 }
0x1572   :  { %4693 = vmatprep.subr.mxu1 %v7049_v7 }
0x1573   :  { %4694 = vmatpush3.msra.mxu1 %v6237_v17 }
0x1574   :  { %4695 = vmatprep.subr.mxu1 %v7049_v7 }
0x1575   :  { %4696 = vmatpush3.msra.mxu1 %v6244_v18 }
0x1576   :  { %4697 = vmatprep.subr.mxu1 %v7049_v7 }
0x1577   :  { %4698 = vmatpush3.msra.mxu1 %v6251_v19 }
0x1578   :  { %4699 = vmatprep.subr.mxu1 %v7049_v7 }
0x1579   :  { %4700 = vmatpush3.msra.mxu1 %v6258_v20 }
0x157a   :  { %4739 = vmatprep.subr.mxu1 %v7049_v7 }
0x161a   :  { %v1935_v11 = vpop.f32.mrf.mxu1 }
0x161b   :  { %v1939_v63 = vadd.f32 %v6169_v30, %v1935_v11  ;;  %v2014_v3 = vadd.f32 %v6175_v33, %v1935_v11 }
0x161c   :  { %v4633_v4 = vpop.f32.mrf.mxu1 }
0x161d   :  { %5151 = vtanh.f32 %v1939_v63 }
0x161e   :  { %5153 = vtanh.f32 %v2014_v3 }
0x162a   :  { %v5152_v6 = vpop.eup %5151 }
0x162b   :  { %v5154_v31 = vpop.eup %5153  ;;  %v1941_v58 = vmul.f32 %v6351_v41, %v5152_v6 }
0x162c   :  { %v2016_v35 = vmul.f32 %v6351_v41, %v5154_v31 }
0x162d   :  { %4667 = vmatmul.mubr.f32.vlgmr.msra.gmra.mxu0 %v1941_v58 }
0x162e   :  { %4702 = vmatmul.mubr.f32.vlgmr.msra.gmra.mxu1 %v2016_v35  ;;  %4705 = vmatpush3.msra.mxu0 %v6358_v39 }
0x162f   :  { %4706 = vmatprep.subr.mxu0 %v7049_v7  ;;  %4736 = vmatprep.mubr.msk.f32.mxu0 %vm5286_vm0, %v7049_v7 }
0x1630   :  { %4707 = vmatpush3.msra.mxu0 %v6367_v2  ;;  %4740 = vmatpush3.msra.mxu1 %v6373_v5 }
0x1631   :  { %4708 = vmatprep.subr.mxu0 %v7049_v7  ;;  %4741 = vmatprep.subr.mxu1 %v7049_v7 }
0x1632   :  { %4709 = vmatpush3.msra.mxu0 %v6381_v36  ;;  %4742 = vmatpush3.msra.mxu1 %v6387_v38 }
0x1633   :  { %4710 = vmatprep.subr.mxu0 %v7049_v7  ;;  %4743 = vmatprep.subr.mxu1 %v7049_v7 }
0x1634   :  { %4711 = vmatpush3.msra.mxu0 %v6395_v21  ;;  %4744 = vmatpush3.msra.mxu1 %v6401_v22 }
0x1635   :  { %4712 = vmatprep.subr.mxu0 %v7049_v7  ;;  %4745 = vmatprep.subr.mxu1 %v7049_v7 }
0x1636   :  { %4713 = vmatpush3.msra.mxu0 %v6409_v48  ;;  %4746 = vmatpush3.msra.mxu1 %v6415_v49 }
0x1637   :  { %4714 = vmatprep.subr.mxu0 %v7049_v7  ;;  %4747 = vmatprep.mubr.msk.f32.mxu1 %vm5286_vm0, %v7049_v7 }
0x1638   :  { %4715 = vmatpush3.msra.mxu0 %v6424_v50  ;;  %4750 = vmatprep.subr.mxu1 %v7049_v7 }
0x1639   :  { %4716 = vmatprep.subr.mxu0 %v7049_v7 }
0x163a   :  { %4717 = vmatpush3.msra.mxu0 %v6432_v51 }
0x163b   :  { %4718 = vmatprep.subr.mxu0 %v7049_v7 }
0x163c   :  { %4719 = vmatpush3.msra.mxu0 %v6439_v52 }
0x163d   :  { %4720 = vmatprep.subr.mxu0 %v7049_v7 }
0x163e   :  { %4721 = vmatpush3.msra.mxu0 %v6446_v15 }
0x163f   :  { %4722 = vmatprep.subr.mxu0 %v7049_v7 }
0x1640   :  { %4723 = vmatpush3.msra.mxu0 %v6453_v53 }
0x1641   :  { %4724 = vmatprep.subr.mxu0 %v7049_v7 }
0x1642   :  { %4725 = vmatpush3.msra.mxu0 %v6460_v54 }
0x1643   :  { %4726 = vmatprep.subr.mxu0 %v7049_v7 }
0x1644   :  { %4727 = vmatpush3.msra.mxu0 %v6467_v55 }
0x1645   :  { %4728 = vmatprep.subr.mxu0 %v7049_v7 }
0x1646   :  { %4729 = vmatpush3.msra.mxu0 %v6474_v23 }
0x1647   :  { %4730 = vmatprep.subr.mxu0 %v7049_v7 }
0x1648   :  { %4731 = vmatpush3.msra.mxu0 %v6481_v24 }
0x1649   :  { %4732 = vmatprep.subr.mxu0 %v7049_v7 }
0x164a   :  { %4733 = vmatpush3.msra.mxu0 %v6488_v25 }
0x164b   :  { %4734 = vmatprep.subr.mxu0 %v7049_v7 }
0x164c   :  { %4735 = vmatpush3.msra.mxu0 %v6495_v26 }
0x164d   :  { %4783 = vmatprep.subr.mxu0 %v7049_v7 }
0x16ed   :  { %v2008_v27 = vpop.f32.mrf.mxu0 }
0x16ee   :  { %v2083_v34 = vpop.f32.mrf.mxu1  ;;  %2012 = vmax.xlane.f32.xlu0 %v2008_v27 }
0x16ef   :  { %2087 = vmax.xlane.f32.xlu1 %v2083_v34  ;;  %v4668_v43 = vpop.f32.mrf.mxu0 }
0x16f0   :  { %v4703_v44 = vpop.f32.mrf.mxu1 }
0x1777   :  { %v2013_v45 = vpop.xlane.xlu0 %2012 }
0x1778   :  { %v2088_v46 = vpop.xlane.xlu1 %2087 }
0x1779   :  { %v2089_v1 = vmax.f32 %v2013_v45, %v2088_v46 }
0x177b   :  { %v2090_v60 = vsub.f32 %v2008_v27, %v2089_v1  ;;  %v2095_v61 = vsub.f32 %v2083_v34, %v2089_v1  ;;  %v6539_v1 = vld [vmem:[%s7032_s10 + $0x18] sm:$0xff] }
0x177d   :  { %v2091_v11 = vmul.f32 1.442695, %v2090_v60  ;;  %v2096_v63 = vmul.f32 1.442695, %v2095_v61  ;;  %v6548_v61 = vld [vmem:[%s7032_s10 + $0x10] sm:$0xff] }
0x177f   :  { %5155 = vpow2.f32 %v2091_v11  ;;  %v6555_v11 = vld [vmem:[%s7032_s10 + $0x8] sm:$0xff] }
0x1780   :  { %5157 = vpow2.f32 %v2096_v63  ;;  %v6562_v63 = vld [vmem:[%s7032_s10] sm:$0xff] }
0x178c   :  { %v5156_v3 = vpop.eup %5155 }
0x178d   :  { %v5158_v4 = vpop.eup %5157  ;;  %2093 = vadd.xlane.f32.xlu0 %v5156_v3  ;;  %v2101_v6 = vmul.f32 %v6169_v30, %v5156_v3  ;;  %v6571_v3 = vld [vmem:[%s7033_s9 + $0x18] sm:$0xff] }
0x178e   :  { %v2102_v31 = vmul.f32 %v6175_v33, %v5158_v4 }
0x1790   :  { %v2103_v58 = vadd.f32 %v2102_v31, %v2101_v6  ;;  %v6594_v6 = vld [vmem:[%s7033_s9] sm:$0xff] }
0x1791   :  { %2098 = vadd.xlane.f32.xlu0 %v5158_v4  ;;  %v6580_v4 = vld [vmem:[%s7033_s9 + $0x10] sm:$0xff] }
0x1816   :  { %v2094_v35 = vpop.xlane.xlu0 %2093 }
0x181a   :  { %v2099_v43 = vpop.xlane.xlu0 %2098 }
0x181b   :  { %v2100_v44 = vadd.f32 %v2099_v43, %v2094_v35 }
0x181d   :  { %5159 = vrcp.f32 %v2100_v44 }
0x182a   :  { %v5160_v45 = vpop.eup %5159 }
0x182b   :  { %v2105_v27 = vmul.f32 32.0, %v5160_v45 }
0x182d   :  { %v2106_v34 = vmul.f32 %v2105_v27, %v2103_v58 }
0x182f   :  { %4737 = vmatmul.mubr.f32.vlgmr.msra.gmra.mxu0 %v2106_v34 }
0x1830   :  { %4784 = vmatpush3.msra.mxu0 %v6057_v37  ;;  %4815 = vmatprep.mubr.msk.f32.mxu0 %vm5286_vm0, %v7049_v7 }
0x1831   :  { %4785 = vmatprep.subr.mxu0 %v7049_v7 }
0x1832   :  { %4786 = vmatpush3.msra.mxu0 %v6066_v8 }
0x1833   :  { %4787 = vmatprep.subr.mxu0 %v7049_v7 }
0x1834   :  { %4788 = vmatpush3.msra.mxu0 %v6073_v42 }
0x1835   :  { %4789 = vmatprep.subr.mxu0 %v7049_v7 }
0x1836   :  { %4790 = vmatpush3.msra.mxu0 %v6080_v47 }
0x1837   :  { %4791 = vmatprep.subr.mxu0 %v7049_v7 }
0x1838   :  { %4792 = vmatpush3.msra.mxu0 %v6087_v56 }
0x1839   :  { %4793 = vmatprep.subr.mxu0 %v7049_v7 }
0x183a   :  { %4794 = vmatpush3.msra.mxu0 %v6094_v57 }
0x183b   :  { %4795 = vmatprep.subr.mxu0 %v7049_v7 }
0x183c   :  { %4796 = vmatpush3.msra.mxu0 %v6195_v0 }
0x183d   :  { %4797 = vmatprep.subr.mxu0 %v7049_v7 }
0x183e   :  { %4798 = vmatpush3.msra.mxu0 %v6202_v10 }
0x183f   :  { %4799 = vmatprep.subr.mxu0 %v7049_v7 }
0x1840   :  { %4800 = vmatpush3.msra.mxu0 %v6209_v12 }
0x1841   :  { %4801 = vmatprep.subr.mxu0 %v7049_v7 }
0x1842   :  { %4802 = vmatpush3.msra.mxu0 %v6216_v13 }
0x1843   :  { %4803 = vmatprep.subr.mxu0 %v7049_v7 }
0x1844   :  { %4804 = vmatpush3.msra.mxu0 %v6223_v14 }
0x1845   :  { %4805 = vmatprep.subr.mxu0 %v7049_v7 }
0x1846   :  { %4806 = vmatpush3.msra.mxu0 %v6230_v16 }
0x1847   :  { %4807 = vmatprep.subr.mxu0 %v7049_v7 }
0x1848   :  { %4808 = vmatpush3.msra.mxu0 %v6237_v17 }
0x1849   :  { %4809 = vmatprep.subr.mxu0 %v7049_v7 }
0x184a   :  { %4810 = vmatpush3.msra.mxu0 %v6244_v18 }
0x184b   :  { %4811 = vmatprep.subr.mxu0 %v7049_v7 }
0x184c   :  { %4812 = vmatpush3.msra.mxu0 %v6251_v19 }
0x184d   :  { %4813 = vmatprep.subr.mxu0 %v7049_v7 }
0x184e   :  { %4814 = vmatpush3.msra.mxu0 %v6258_v20 }
0x184f   :  { %4853 = vmatprep.subr.mxu0 %v7049_v7 }
0x18ef   :  { %v2173_v46 = vpop.f32.mrf.mxu0 }
0x18f0   :  { %4748 = vmatmul.mubr.msk.f32.vlgmr.msra.gmra.mxu1 %vm118_vm1, %v2173_v46  ;;  %v6613_v46 = vld [vmem:[%s7034_s11] ss:$0 sm:$0xff] }
0x18f1   :  { %4751 = vmatpush3.msra.mxu1 %v6539_v1  ;;  %v4738_v60 = vpop.f32.mrf.mxu0  ;;  %4758 = vmatprep.mubr.msk.f32.mxu1 %vm5286_vm0, %v7049_v7 }
0x18f2   :  { %4752 = vmatprep.subr.mxu1 %v7049_v7 }
0x18f3   :  { %4753 = vmatpush3.msra.mxu1 %v6548_v61 }
0x18f4   :  { %4754 = vmatprep.subr.mxu1 %v7049_v7 }
0x18f5   :  { %4755 = vmatpush3.msra.mxu1 %v6555_v11 }
0x18f6   :  { %4756 = vmatprep.subr.mxu1 %v7049_v7 }
0x18f7   :  { %4757 = vmatpush3.msra.mxu1 %v6562_v63 }
0x18f8   :  { %4759 = vmatmul.mubr.msk.f32.vlgmr.msra.gmra.mxu1 %vm118_vm1, %v6306_v62  ;;  %4761 = vmatprep.subr.mxu1 %v7049_v7  ;;  %v6587_v62 = vld [vmem:[%s7033_s9 + $0x8] sm:$0xff] }
0x18f9   :  { %4762 = vmatpush3.msra.mxu1 %v6571_v3  ;;  %4769 = vmatprep.mubr.msk.f32.mxu1 %vm5286_vm0, %v7049_v7 }
0x18fa   :  { %4763 = vmatprep.subr.mxu1 %v7049_v7 }
0x18fb   :  { %4764 = vmatpush3.msra.mxu1 %v6580_v4 }
0x18fc   :  { %4765 = vmatprep.subr.mxu1 %v7049_v7 }
0x18fd   :  { %4766 = vmatpush3.msra.mxu1 %v6587_v62 }
0x18fe   :  { %4767 = vmatprep.subr.mxu1 %v7049_v7 }
0x18ff   :  { %4768 = vmatpush3.msra.mxu1 %v6594_v6 }
0x1900   :  { %4772 = vmatprep.subr.mxu1 %v7049_v7 }
0x19b0   :  { %v2246_v31 = vpop.f32.mrf.mxu1 }
0x19b1   :  { %v2250_v58 = vadd.f32 %v2246_v31, %v5584_v32 }
0x19b2   :  { %v4749_v35 = vpop.f32.mrf.mxu1 }
0x19b3   :  { %5161 = vtanh.f32 %v2250_v58 }
0x19b8   :  { %v2318_v43 = vpop.f32.mrf.mxu1 }
0x19ba   :  { %v4760_v44 = vpop.f32.mrf.mxu1 }
0x19c0   :  { %v5162_v45 = vpop.eup %5161 }
0x19c1   :  { %4770 = vmatmul.mubr.msk.f32.vlgmr.msra.gmra.mxu1 %vm118_vm1, %v5162_v45 }
0x19c2   :  { %4773 = vmatpush3.msra.mxu1 %v6012_v9  ;;  %4780 = vmatprep.mubr.msk.f32.mxu1 %vm5286_vm0, %v7049_v7 }
0x19c3   :  { %4774 = vmatprep.subr.mxu1 %v7049_v7 }
0x19c4   :  { %4775 = vmatpush3.msra.mxu1 %v6021_v28 }
0x19c5   :  { %4776 = vmatprep.subr.mxu1 %v7049_v7 }
0x19c6   :  { %4777 = vmatpush3.msra.mxu1 %v6028_v29 }
0x19c7   :  { %4778 = vmatprep.subr.mxu1 %v7049_v7 }
0x19c8   :  { %4779 = vmatpush3.msra.mxu1 %v6035_v40 }
0x19c9   :  { %4818 = vmatprep.subr.mxu1 %v7049_v7 }
0x1a81   :  { %v2391_v27 = vpop.f32.mrf.mxu1 }
0x1a82   :  { %v2392_v34 = vadd.f32 %v2391_v27, %v2318_v43 }
0x1a83   :  { %v4771_v9 = vpop.f32.mrf.mxu1 }
0x1a84   :  { %v2395_v28 = vadd.f32 %v6613_v46, %v2392_v34 }
0x1a86   :  { %5163 = vtanh.f32 %v2395_v28  ;;  %v3706_v29 = vmul.f32 -1.442695, %v2395_v28 }
0x1a88   :  { %5165 = vpow2.f32 %v3706_v29 }
0x1a93   :  { %v5164_v60 = vpop.eup %5163 }
0x1a94   :  { %2405 = vrot.lane.b32.xlu0 %v5164_v60, %s5287_s22 }
0x1a95   :  { %v5166_v31 = vpop.eup %5165 }
0x1a96   :  { %v2399_v40 = vadd.f32 1.0, %v5166_v31 }
0x1a98   :  { %5167 = vrcp.f32 %v2399_v40 }
0x1aa5   :  { %v5168_v58 = vpop.eup %5167 }
0x1aa6   :  { %v2403_v44 = vmul.f32 %v5168_v58, %v6301_v59 }
0x1b06   :  { %v2406_v35 = vpop.permute.xlu0 %2405 }
0x1b07   :  { %v2408_v43 = vmul.f32 %v5168_v58, %v2406_v35 }
0x1b09   :  { %2410 = vrot.lane.b32.xlu1 %v2408_v43, %s5288_s23 }
0x1b7b   :  { %v2411_v45 = vpop.permute.xlu1 %2410 }
0x1b7c   :  { %v6619_v27 = vadd.f32 %v2411_v45, %v2403_v44 }
0x1b7e   :  { %5169 = vtanh.f32 %v6619_v27 }
0x1b8b   :  { %v5170_v34 = vpop.eup %5169 }
0x1b8c   :  { %2416 = vrot.lane.b32.xlu1 %v5170_v34, %s5287_s22 }
0x1bfe   :  { %v2417_v9 = vpop.permute.xlu1 %2416 }
0x1bff   :  { %v2419_v28 = vmul.f32 %v5168_v58, %v2417_v9 }
0x1c01   :  { %2421 = vrot.lane.b32.xlu1 %v2419_v28, %s5288_s23 }
0x1c73   :  { %v6624_v60 = vpop.permute.xlu1 %2421 }
0x1c74   :  { %2424 = vst.msk [vmem:[#allocation2 + $0x18] sm:$0xff] %vm118_vm1, %v6624_v60  ;;  %4781 = vmatmul.mubr.msk.f32.vlgmr.msra.gmra.mxu1 %vm118_vm1, %v6624_v60 }
0x1c75   :  { %4819 = vmatpush3.msra.mxu1 %v6057_v37  ;;  %4850 = vmatprep.mubr.msk.f32.mxu1 %vm5286_vm0, %v7049_v7 }
0x1c76   :  { %4820 = vmatprep.subr.mxu1 %v7049_v7 }
0x1c77   :  { %4821 = vmatpush3.msra.mxu1 %v6066_v8 }
0x1c78   :  { %4822 = vmatprep.subr.mxu1 %v7049_v7 }
0x1c79   :  { %4823 = vmatpush3.msra.mxu1 %v6073_v42 }
0x1c7a   :  { %4824 = vmatprep.subr.mxu1 %v7049_v7 }
0x1c7b   :  { %4825 = vmatpush3.msra.mxu1 %v6080_v47 }
0x1c7c   :  { %4826 = vmatprep.subr.mxu1 %v7049_v7 }
0x1c7d   :  { %4827 = vmatpush3.msra.mxu1 %v6087_v56 }
0x1c7e   :  { %4828 = vmatprep.subr.mxu1 %v7049_v7 }
0x1c7f   :  { %4829 = vmatpush3.msra.mxu1 %v6094_v57 }
0x1c80   :  { %4830 = vmatprep.subr.mxu1 %v7049_v7 }
0x1c81   :  { %4831 = vmatpush3.msra.mxu1 %v6195_v0 }
0x1c82   :  { %4832 = vmatprep.subr.mxu1 %v7049_v7 }
0x1c83   :  { %4833 = vmatpush3.msra.mxu1 %v6202_v10 }
0x1c84   :  { %4834 = vmatprep.subr.mxu1 %v7049_v7 }
0x1c85   :  { %4835 = vmatpush3.msra.mxu1 %v6209_v12 }
0x1c86   :  { %4836 = vmatprep.subr.mxu1 %v7049_v7 }
0x1c87   :  { %4837 = vmatpush3.msra.mxu1 %v6216_v13 }
0x1c88   :  { %4838 = vmatprep.subr.mxu1 %v7049_v7 }
0x1c89   :  { %4839 = vmatpush3.msra.mxu1 %v6223_v14 }
0x1c8a   :  { %4840 = vmatprep.subr.mxu1 %v7049_v7 }
0x1c8b   :  { %4841 = vmatpush3.msra.mxu1 %v6230_v16 }
0x1c8c   :  { %4842 = vmatprep.subr.mxu1 %v7049_v7 }
0x1c8d   :  { %4843 = vmatpush3.msra.mxu1 %v6237_v17 }
0x1c8e   :  { %4844 = vmatprep.subr.mxu1 %v7049_v7 }
0x1c8f   :  { %4845 = vmatpush3.msra.mxu1 %v6244_v18 }
0x1c90   :  { %4846 = vmatprep.subr.mxu1 %v7049_v7 }
0x1c91   :  { %4847 = vmatpush3.msra.mxu1 %v6251_v19 }
0x1c92   :  { %4848 = vmatprep.subr.mxu1 %v7049_v7 }
0x1c93   :  { %4849 = vmatpush3.msra.mxu1 %v6258_v20 }
0x1c94   :  { %4888 = vmatprep.subr.mxu1 %v7049_v7 }
0x1d34   :  { %v2493_v37 = vpop.f32.mrf.mxu1 }
0x1d35   :  { %v2497_v8 = vadd.f32 %v6169_v30, %v2493_v37  ;;  %v2572_v42 = vadd.f32 %v6175_v33, %v2493_v37 }
0x1d36   :  { %v4782_v47 = vpop.f32.mrf.mxu1 }
0x1d37   :  { %5171 = vtanh.f32 %v2497_v8 }
0x1d38   :  { %5173 = vtanh.f32 %v2572_v42 }
0x1d44   :  { %v5172_v56 = vpop.eup %5171 }
0x1d45   :  { %v5174_v57 = vpop.eup %5173  ;;  %v2499_v59 = vmul.f32 %v6351_v41, %v5172_v56 }
0x1d46   :  { %v2574_v29 = vmul.f32 %v6351_v41, %v5174_v57 }
0x1d47   :  { %4816 = vmatmul.mubr.f32.vlgmr.msra.gmra.mxu0 %v2499_v59 }
0x1d48   :  { %4851 = vmatmul.mubr.f32.vlgmr.msra.gmra.mxu1 %v2574_v29  ;;  %4854 = vmatpush3.msra.mxu0 %v6358_v39 }
0x1d49   :  { %4855 = vmatprep.subr.mxu0 %v7049_v7  ;;  %4885 = vmatprep.mubr.msk.f32.mxu0 %vm5286_vm0, %v7049_v7 }
0x1d4a   :  { %4856 = vmatpush3.msra.mxu0 %v6367_v2  ;;  %4889 = vmatpush3.msra.mxu1 %v6373_v5 }
0x1d4b   :  { %4857 = vmatprep.subr.mxu0 %v7049_v7  ;;  %4890 = vmatprep.subr.mxu1 %v7049_v7 }
0x1d4c   :  { %4858 = vmatpush3.msra.mxu0 %v6381_v36  ;;  %4891 = vmatpush3.msra.mxu1 %v6387_v38 }
0x1d4d   :  { %4859 = vmatprep.subr.mxu0 %v7049_v7  ;;  %4892 = vmatprep.subr.mxu1 %v7049_v7 }
0x1d4e   :  { %4860 = vmatpush3.msra.mxu0 %v6395_v21  ;;  %4893 = vmatpush3.msra.mxu1 %v6401_v22 }
0x1d4f   :  { %4861 = vmatprep.subr.mxu0 %v7049_v7  ;;  %4894 = vmatprep.subr.mxu1 %v7049_v7 }
0x1d50   :  { %4862 = vmatpush3.msra.mxu0 %v6409_v48  ;;  %4895 = vmatpush3.msra.mxu1 %v6415_v49 }
0x1d51   :  { %4863 = vmatprep.subr.mxu0 %v7049_v7  ;;  %4896 = vmatprep.mubr.msk.f32.mxu1 %vm5286_vm0, %v7049_v7 }
0x1d52   :  { %4864 = vmatpush3.msra.mxu0 %v6424_v50  ;;  %4899 = vmatprep.subr.mxu1 %v7049_v7 }
0x1d53   :  { %4865 = vmatprep.subr.mxu0 %v7049_v7 }
0x1d54   :  { %4866 = vmatpush3.msra.mxu0 %v6432_v51 }
0x1d55   :  { %4867 = vmatprep.subr.mxu0 %v7049_v7 }
0x1d56   :  { %4868 = vmatpush3.msra.mxu0 %v6439_v52 }
0x1d57   :  { %4869 = vmatprep.subr.mxu0 %v7049_v7 }
0x1d58   :  { %4870 = vmatpush3.msra.mxu0 %v6446_v15 }
0x1d59   :  { %4871 = vmatprep.subr.mxu0 %v7049_v7 }
0x1d5a   :  { %4872 = vmatpush3.msra.mxu0 %v6453_v53 }
0x1d5b   :  { %4873 = vmatprep.subr.mxu0 %v7049_v7 }
0x1d5c   :  { %4874 = vmatpush3.msra.mxu0 %v6460_v54 }
0x1d5d   :  { %4875 = vmatprep.subr.mxu0 %v7049_v7 }
0x1d5e   :  { %4876 = vmatpush3.msra.mxu0 %v6467_v55 }
0x1d5f   :  { %4877 = vmatprep.subr.mxu0 %v7049_v7 }
0x1d60   :  { %4878 = vmatpush3.msra.mxu0 %v6474_v23 }
0x1d61   :  { %4879 = vmatprep.subr.mxu0 %v7049_v7 }
0x1d62   :  { %4880 = vmatpush3.msra.mxu0 %v6481_v24 }
0x1d63   :  { %4881 = vmatprep.subr.mxu0 %v7049_v7 }
0x1d64   :  { %4882 = vmatpush3.msra.mxu0 %v6488_v25 }
0x1d65   :  { %4883 = vmatprep.subr.mxu0 %v7049_v7 }
0x1d66   :  { %4884 = vmatpush3.msra.mxu0 %v6495_v26 }
0x1d67   :  { %4932 = vmatprep.subr.mxu0 %v7049_v7 }
0x1e07   :  { %v2566_v31 = vpop.f32.mrf.mxu0 }
0x1e08   :  { %v2641_v40 = vpop.f32.mrf.mxu1  ;;  %2570 = vmax.xlane.f32.xlu0 %v2566_v31 }
0x1e09   :  { %2645 = vmax.xlane.f32.xlu1 %v2641_v40  ;;  %v4817_v58 = vpop.f32.mrf.mxu0 }
0x1e0a   :  { %v4852_v35 = vpop.f32.mrf.mxu1 }
0x1e91   :  { %v2571_v43 = vpop.xlane.xlu0 %2570 }
0x1e92   :  { %v2646_v44 = vpop.xlane.xlu1 %2645 }
0x1e93   :  { %v2647_v45 = vmax.f32 %v2571_v43, %v2646_v44  ;;  %v6717_v43 = vld [vmem:[%s7027_s7 + $0x78] sm:$0xff]  ;;  %v6740_v44 = vld [vmem:[%s7027_s7 + $0x60] sm:$0xff] }
0x1e95   :  { %v2648_v34 = vsub.f32 %v2566_v31, %v2647_v45  ;;  %v2653_v9 = vsub.f32 %v2641_v40, %v2647_v45  ;;  %v6747_v45 = vld [vmem:[%s7027_s7 + $0x58] sm:$0xff] }
0x1e97   :  { %v2649_v28 = vmul.f32 1.442695, %v2648_v34  ;;  %v2654_v37 = vmul.f32 1.442695, %v2653_v9  ;;  %v6754_v34 = vld [vmem:[%s7027_s7 + $0x50] sm:$0xff]  ;;  %v5272_v9 = vld [vmem:[%s7023_s6] sm:$0xff] }
0x1e99   :  { %5175 = vpow2.f32 %v2649_v28 }
0x1e9a   :  { %5177 = vpow2.f32 %v2654_v37 }
0x1ea6   :  { %v5176_v8 = vpop.eup %5175 }
0x1ea7   :  { %v5178_v42 = vpop.eup %5177  ;;  %2651 = vadd.xlane.f32.xlu0 %v5176_v8  ;;  %v2659_v47 = vmul.f32 %v6169_v30, %v5176_v8  ;;  %v6726_v30 = vld [vmem:[%s7027_s7 + $0x70] sm:$0xff] }
0x1ea8   :  { %v2660_v56 = vmul.f32 %v6175_v33, %v5178_v42  ;;  %v6733_v33 = vld [vmem:[%s7027_s7 + $0x68] sm:$0xff] }
0x1eaa   :  { %v2661_v57 = vadd.f32 %v2660_v56, %v2659_v47 }
0x1eab   :  { %2656 = vadd.xlane.f32.xlu0 %v5178_v42 }
0x1f30   :  { %v2652_v59 = vpop.xlane.xlu0 %2651 }
0x1f34   :  { %v2657_v29 = vpop.xlane.xlu0 %2656 }
0x1f35   :  { %v2658_v58 = vadd.f32 %v2657_v29, %v2652_v59 }
0x1f37   :  { %5179 = vrcp.f32 %v2658_v58 }
0x1f44   :  { %v5180_v35 = vpop.eup %5179 }
0x1f45   :  { %v2663_v31 = vmul.f32 32.0, %v5180_v35 }
0x1f47   :  { %v2664_v40 = vmul.f32 %v2663_v31, %v2661_v57 }
0x1f49   :  { %4886 = vmatmul.mubr.f32.vlgmr.msra.gmra.mxu0 %v2664_v40 }
0x1f4a   :  { %4933 = vmatpush3.msra.mxu0 %v6717_v43  ;;  %4964 = vmatprep.mubr.msk.f32.mxu0 %vm5286_vm0, %v7049_v7 }
0x1f4b   :  { %4934 = vmatprep.subr.mxu0 %v7049_v7 }
0x1f4c   :  { %4935 = vmatpush3.msra.mxu0 %v6726_v30 }
0x1f4d   :  { %4936 = vmatprep.subr.mxu0 %v7049_v7 }
0x1f4e   :  { %4937 = vmatpush3.msra.mxu0 %v6733_v33 }
0x1f4f   :  { %4938 = vmatprep.subr.mxu0 %v7049_v7 }
0x1f50   :  { %4939 = vmatpush3.msra.mxu0 %v6740_v44 }
0x1f51   :  { %4940 = vmatprep.subr.mxu0 %v7049_v7 }
0x1f52   :  { %4941 = vmatpush3.msra.mxu0 %v6747_v45 }
0x1f53   :  { %4942 = vmatprep.subr.mxu0 %v7049_v7 }
0x1f54   :  { %4943 = vmatpush3.msra.mxu0 %v6754_v34 }
0x1f55   :  { %4944 = vmatprep.subr.mxu0 %v7049_v7 }
0x1f56   :  { %4945 = vmatpush3.msra.mxu0 %v6195_v0 }
0x1f57   :  { %4946 = vmatprep.subr.mxu0 %v7049_v7 }
0x1f58   :  { %4947 = vmatpush3.msra.mxu0 %v6202_v10 }
0x1f59   :  { %4948 = vmatprep.subr.mxu0 %v7049_v7 }
0x1f5a   :  { %4949 = vmatpush3.msra.mxu0 %v6209_v12 }
0x1f5b   :  { %4950 = vmatprep.subr.mxu0 %v7049_v7 }
0x1f5c   :  { %4951 = vmatpush3.msra.mxu0 %v6216_v13 }
0x1f5d   :  { %4952 = vmatprep.subr.mxu0 %v7049_v7 }
0x1f5e   :  { %4953 = vmatpush3.msra.mxu0 %v6223_v14 }
0x1f5f   :  { %4954 = vmatprep.subr.mxu0 %v7049_v7 }
0x1f60   :  { %4955 = vmatpush3.msra.mxu0 %v6230_v16 }
0x1f61   :  { %4956 = vmatprep.subr.mxu0 %v7049_v7 }
0x1f62   :  { %4957 = vmatpush3.msra.mxu0 %v6237_v17 }
0x1f63   :  { %4958 = vmatprep.subr.mxu0 %v7049_v7 }
0x1f64   :  { %4959 = vmatpush3.msra.mxu0 %v6244_v18 }
0x1f65   :  { %4960 = vmatprep.subr.mxu0 %v7049_v7 }
0x1f66   :  { %4961 = vmatpush3.msra.mxu0 %v6251_v19  ;;  %v5269_v19 = vld [vmem:[%s7023_s6 + $0x18] sm:$0xff] }
0x1f67   :  { %4962 = vmatprep.subr.mxu0 %v7049_v7 }
0x1f68   :  { %4963 = vmatpush3.msra.mxu0 %v6258_v20  ;;  %v5270_v20 = vld [vmem:[%s7023_s6 + $0x10] sm:$0xff] }
0x1f69   :  { %5002 = vmatprep.subr.mxu0 %v7049_v7 }
0x2009   :  { %v2731_v0 = vpop.f32.mrf.mxu0 }
0x200a   :  { %4897 = vmatmul.mubr.msk.f32.vlgmr.msra.gmra.mxu1 %vm118_vm1, %v2731_v0 }
0x200b   :  { %4900 = vmatpush3.msra.mxu1 %v6539_v1  ;;  %v4887_v10 = vpop.f32.mrf.mxu0  ;;  %4907 = vmatprep.mubr.msk.f32.mxu1 %vm5286_vm0, %v7049_v7 }
0x200c   :  { %4901 = vmatprep.subr.mxu1 %v7049_v7 }
0x200d   :  { %4902 = vmatpush3.msra.mxu1 %v6548_v61 }
0x200e   :  { %4903 = vmatprep.subr.mxu1 %v7049_v7 }
0x200f   :  { %4904 = vmatpush3.msra.mxu1 %v6555_v11 }
0x2010   :  { %4905 = vmatprep.subr.mxu1 %v7049_v7 }
0x2011   :  { %4906 = vmatpush3.msra.mxu1 %v6562_v63 }
0x2012   :  { %4908 = vmatmul.mubr.msk.f32.vlgmr.msra.gmra.mxu1 %vm118_vm1, %v6624_v60  ;;  %4910 = vmatprep.subr.mxu1 %v7049_v7  ;;  %v5271_v60 = vld [vmem:[%s7023_s6 + $0x8] sm:$0xff] }
0x2013   :  { %4911 = vmatpush3.msra.mxu1 %v6571_v3  ;;  %4918 = vmatprep.mubr.msk.f32.mxu1 %vm5286_vm0, %v7049_v7 }
0x2014   :  { %4912 = vmatprep.subr.mxu1 %v7049_v7 }
0x2015   :  { %4913 = vmatpush3.msra.mxu1 %v6580_v4 }
0x2016   :  { %4914 = vmatprep.subr.mxu1 %v7049_v7 }
0x2017   :  { %4915 = vmatpush3.msra.mxu1 %v6587_v62 }
0x2018   :  { %4916 = vmatprep.subr.mxu1 %v7049_v7 }
0x2019   :  { %4917 = vmatpush3.msra.mxu1 %v6594_v6 }
0x201a   :  { %4921 = vmatprep.subr.mxu1 %v7049_v7 }
0x20ca   :  { %v2804_v12 = vpop.f32.mrf.mxu1 }
0x20cb   :  { %v2808_v13 = vadd.f32 %v2804_v12, %v5584_v32 }
0x20cc   :  { %v4898_v14 = vpop.f32.mrf.mxu1 }
0x20cd   :  { %5181 = vtanh.f32 %v2808_v13 }
0x20d2   :  { %v2876_v16 = vpop.f32.mrf.mxu1 }
0x20d4   :  { %v4909_v17 = vpop.f32.mrf.mxu1 }
0x20d5   :  { %v5281_v17 = vld [vmem:[%s7027_s7 + $0x8] sm:$0xff] }
0x20da   :  { %v5182_v18 = vpop.eup %5181 }
0x20db   :  { %4919 = vmatmul.mubr.msk.f32.vlgmr.msra.gmra.mxu1 %vm118_vm1, %v5182_v18  ;;  %v5282_v18 = vld [vmem:[%s7027_s7] sm:$0xff] }
0x20dc   :  { %4922 = vmatpush3.msra.mxu1 %v5269_v19  ;;  %4929 = vmatprep.mubr.msk.f32.mxu1 %vm5286_vm0, %v7049_v7 }
0x20dd   :  { %4923 = vmatprep.subr.mxu1 %v7049_v7 }
0x20de   :  { %4924 = vmatpush3.msra.mxu1 %v5270_v20  ;;  %v6893_v20 = vld [vmem:[%s7028_s0] sm:$0xff] }
0x20df   :  { %4925 = vmatprep.subr.mxu1 %v7049_v7 }
0x20e0   :  { %4926 = vmatpush3.msra.mxu1 %v5271_v60 }
0x20e1   :  { %4927 = vmatprep.subr.mxu1 %v7049_v7 }
0x20e2   :  { %4928 = vmatpush3.msra.mxu1 %v5272_v9  ;;  %v6899_v9 = vld [vmem:[%s7028_s0 + $0x8] sm:$0xff] }
0x20e3   :  { %4967 = vmatprep.subr.mxu1 %v7049_v7 }
0x219b   :  { %v2949_v28 = vpop.f32.mrf.mxu1 }
0x219c   :  { %v2950_v37 = vadd.f32 %v2949_v28, %v2876_v16  ;;  %v5280_v16 = vld [vmem:[%s7027_s7 + $0x10] sm:$0xff] }
0x219d   :  { %v4920_v8 = vpop.f32.mrf.mxu1 }
0x219e   :  { %v2953_v42 = vadd.f32 %v6613_v46, %v2950_v37 }
0x21a0   :  { %5183 = vtanh.f32 %v2953_v42  ;;  %v3711_v56 = vmul.f32 -1.442695, %v2953_v42 }
0x21a2   :  { %5185 = vpow2.f32 %v3711_v56 }
0x21ad   :  { %v5184_v47 = vpop.eup %5183 }
0x21ae   :  { %2963 = vrot.lane.b32.xlu0 %v5184_v47, %s5287_s22 }
0x21af   :  { %v5186_v57 = vpop.eup %5185 }
0x21b0   :  { %v2957_v59 = vadd.f32 1.0, %v5186_v57 }
0x21b2   :  { %5187 = vrcp.f32 %v2957_v59 }
0x21bf   :  { %v5188_v29 = vpop.eup %5187 }
0x21c0   :  { %v2961_v31 = vmul.f32 %v5188_v29, %v6619_v27  ;;  %v5273_v27 = vld [vmem:[%s7027_s7 + $0x48] sm:$0xff] }
0x2220   :  { %v2964_v58 = vpop.permute.xlu0 %2963 }
0x2221   :  { %v2966_v35 = vmul.f32 %v5188_v29, %v2964_v58 }
0x2223   :  { %2968 = vrot.lane.b32.xlu1 %v2966_v35, %s5288_s23  ;;  %v3549_v35 = vld [vmem:[#allocation2 + $0x8] sm:$0xff] }
0x2295   :  { %v2969_v40 = vpop.permute.xlu1 %2968 }
0x2296   :  { %v6825_v0 = vadd.f32 %v2969_v40, %v2961_v31  ;;  %v3550_v31 = vld [vmem:[#allocation2 + $0x10] sm:$0xff]  ;;  %v3551_v40 = vld [vmem:[#allocation2 + $0x18] sm:$0xff] }
0x2298   :  { %5189 = vtanh.f32 %v6825_v0 }
0x22a5   :  { %v5190_v10 = vpop.eup %5189 }
0x22a6   :  { %2974 = vrot.lane.b32.xlu1 %v5190_v10, %s5287_s22 }
0x2318   :  { %v2975_v12 = vpop.permute.xlu1 %2974 }
0x2319   :  { %v2977_v13 = vmul.f32 %v5188_v29, %v2975_v12 }
0x231b   :  { %2979 = vrot.lane.b32.xlu1 %v2977_v13, %s5288_s23 }
0x238d   :  { %v6830_v14 = vpop.permute.xlu1 %2979 }
0x238e   :  { %2982 = vst.msk [vmem:[#allocation2 + $0x20] sm:$0xff] %vm118_vm1, %v6830_v14  ;;  %4930 = vmatmul.mubr.msk.f32.vlgmr.msra.gmra.mxu1 %vm118_vm1, %v6830_v14 }
0x238f   :  { %4968 = vmatpush3.msra.mxu1 %v6717_v43  ;;  %4999 = vmatprep.mubr.msk.f32.mxu1 %vm5286_vm0, %v7049_v7  ;;  %v5274_v43 = vld [vmem:[%s7027_s7 + $0x40] sm:$0xff] }
0x2390   :  { %4969 = vmatprep.subr.mxu1 %v7049_v7 }
0x2391   :  { %4970 = vmatpush3.msra.mxu1 %v6726_v30  ;;  %v5275_v30 = vld [vmem:[%s7027_s7 + $0x38] sm:$0xff] }
0x2392   :  { %4971 = vmatprep.subr.mxu1 %v7049_v7 }
0x2393   :  { %4972 = vmatpush3.msra.mxu1 %v6733_v33  ;;  %v5276_v33 = vld [vmem:[%s7027_s7 + $0x30] sm:$0xff] }
0x2394   :  { %4973 = vmatprep.subr.mxu1 %v7049_v7 }
0x2395   :  { %4974 = vmatpush3.msra.mxu1 %v6740_v44  ;;  %v5277_v44 = vld [vmem:[%s7027_s7 + $0x28] sm:$0xff]  ;;  %v3552_v10 = vld [vmem:[#allocation2 + $0x20] sm:$0xff] }
0x2396   :  { %4975 = vmatprep.subr.mxu1 %v7049_v7 }
0x2397   :  { %4976 = vmatpush3.msra.mxu1 %v6747_v45  ;;  %v5278_v45 = vld [vmem:[%s7027_s7 + $0x20] sm:$0xff] }
0x2398   :  { %4977 = vmatprep.subr.mxu1 %v7049_v7 }
0x2399   :  { %4978 = vmatpush3.msra.mxu1 %v6754_v34  ;;  %v5279_v34 = vld [vmem:[%s7027_s7 + $0x18] sm:$0xff] }
0x239a   :  { %4979 = vmatprep.subr.mxu1 %v7049_v7 }
0x239b   :  { %4980 = vmatpush3.msra.mxu1 %v5273_v27 }
0x239c   :  { %4981 = vmatprep.subr.mxu1 %v7049_v7 }
0x239d   :  { %4982 = vmatpush3.msra.mxu1 %v5274_v43  ;;  %v3717_v43 = vld [vmem:[%s7036_s13] ss:$0 sm:$0xff] }
0x239e   :  { %4983 = vmatprep.subr.mxu1 %v7049_v7 }
0x239f   :  { %4984 = vmatpush3.msra.mxu1 %v5275_v30 }
0x23a0   :  { %4985 = vmatprep.subr.mxu1 %v7049_v7 }
0x23a1   :  { %4986 = vmatpush3.msra.mxu1 %v5276_v33 }
0x23a2   :  { %4987 = vmatprep.subr.mxu1 %v7049_v7 }
0x23a3   :  { %4988 = vmatpush3.msra.mxu1 %v5277_v44 }
0x23a4   :  { %4989 = vmatprep.subr.mxu1 %v7049_v7 }
0x23a5   :  { %4990 = vmatpush3.msra.mxu1 %v5278_v45 }
0x23a6   :  { %4991 = vmatprep.subr.mxu1 %v7049_v7 }
0x23a7   :  { %4992 = vmatpush3.msra.mxu1 %v5279_v34 }
0x23a8   :  { %4993 = vmatprep.subr.mxu1 %v7049_v7 }
0x23a9   :  { %4994 = vmatpush3.msra.mxu1 %v5280_v16 }
0x23aa   :  { %4995 = vmatprep.subr.mxu1 %v7049_v7 }
0x23ab   :  { %4996 = vmatpush3.msra.mxu1 %v5281_v17 }
0x23ac   :  { %4997 = vmatprep.subr.mxu1 %v7049_v7 }
0x23ad   :  { %4998 = vmatpush3.msra.mxu1 %v5282_v18 }
0x23ae   :  { %5037 = vmatprep.subr.mxu1 %v7049_v7 }
0x244e   :  { %v3051_v19 = vpop.f32.mrf.mxu1 }
0x244f   :  { %v3055_v60 = vadd.f32 %v6893_v20, %v3051_v19  ;;  %v3130_v28 = vadd.f32 %v6899_v9, %v3051_v19 }
0x2450   :  { %v4931_v37 = vpop.f32.mrf.mxu1 }
0x2451   :  { %5191 = vtanh.f32 %v3055_v60 }
0x2452   :  { %5193 = vtanh.f32 %v3130_v28 }
0x245e   :  { %v5192_v8 = vpop.eup %5191 }
0x245f   :  { %v5194_v42 = vpop.eup %5193  ;;  %v3057_v47 = vmul.f32 %v6351_v41, %v5192_v8 }
0x2460   :  { %v3132_v56 = vmul.f32 %v6351_v41, %v5194_v42 }
0x2461   :  { %4965 = vmatmul.mubr.f32.vlgmr.msra.gmra.mxu0 %v3057_v47 }
0x2462   :  { %5000 = vmatmul.mubr.f32.vlgmr.msra.gmra.mxu1 %v3132_v56  ;;  %5003 = vmatpush3.msra.mxu0 %v6358_v39 }
0x2463   :  { %5004 = vmatprep.subr.mxu0 %v7049_v7  ;;  %5034 = vmatprep.mubr.msk.f32.mxu0 %vm5286_vm0, %v7049_v7 }
0x2464   :  { %5005 = vmatpush3.msra.mxu0 %v6367_v2  ;;  %5038 = vmatpush3.msra.mxu1 %v6373_v5 }
0x2465   :  { %5006 = vmatprep.subr.mxu0 %v7049_v7  ;;  %5039 = vmatprep.subr.mxu1 %v7049_v7 }
0x2466   :  { %5007 = vmatpush3.msra.mxu0 %v6381_v36  ;;  %5040 = vmatpush3.msra.mxu1 %v6387_v38 }
0x2467   :  { %5008 = vmatprep.subr.mxu0 %v7049_v7  ;;  %5041 = vmatprep.subr.mxu1 %v7049_v7 }
0x2468   :  { %5009 = vmatpush3.msra.mxu0 %v6395_v21  ;;  %5042 = vmatpush3.msra.mxu1 %v6401_v22 }
0x2469   :  { %5010 = vmatprep.subr.mxu0 %v7049_v7  ;;  %5043 = vmatprep.subr.mxu1 %v7049_v7 }
0x246a   :  { %5011 = vmatpush3.msra.mxu0 %v6409_v48  ;;  %5044 = vmatpush3.msra.mxu1 %v6415_v49 }
0x246b   :  { %5012 = vmatprep.subr.mxu0 %v7049_v7  ;;  %5045 = vmatprep.mubr.msk.f32.mxu1 %vm5286_vm0, %v7049_v7 }
0x246c   :  { %5013 = vmatpush3.msra.mxu0 %v6424_v50  ;;  %5048 = vmatprep.subr.mxu1 %v7049_v7 }
0x246d   :  { %5014 = vmatprep.subr.mxu0 %v7049_v7 }
0x246e   :  { %5015 = vmatpush3.msra.mxu0 %v6432_v51 }
0x246f   :  { %5016 = vmatprep.subr.mxu0 %v7049_v7 }
0x2470   :  { %5017 = vmatpush3.msra.mxu0 %v6439_v52 }
0x2471   :  { %5018 = vmatprep.subr.mxu0 %v7049_v7 }
0x2472   :  { %5019 = vmatpush3.msra.mxu0 %v6446_v15 }
0x2473   :  { %5020 = vmatprep.subr.mxu0 %v7049_v7 }
0x2474   :  { %5021 = vmatpush3.msra.mxu0 %v6453_v53 }
0x2475   :  { %5022 = vmatprep.subr.mxu0 %v7049_v7 }
0x2476   :  { %5023 = vmatpush3.msra.mxu0 %v6460_v54 }
0x2477   :  { %5024 = vmatprep.subr.mxu0 %v7049_v7 }
0x2478   :  { %5025 = vmatpush3.msra.mxu0 %v6467_v55 }
0x2479   :  { %5026 = vmatprep.subr.mxu0 %v7049_v7 }
0x247a   :  { %5027 = vmatpush3.msra.mxu0 %v6474_v23 }
0x247b   :  { %5028 = vmatprep.subr.mxu0 %v7049_v7 }
0x247c   :  { %5029 = vmatpush3.msra.mxu0 %v6481_v24 }
0x247d   :  { %5030 = vmatprep.subr.mxu0 %v7049_v7 }
0x247e   :  { %5031 = vmatpush3.msra.mxu0 %v6488_v25 }
0x247f   :  { %5032 = vmatprep.subr.mxu0 %v7049_v7 }
0x2480   :  { %5033 = vmatpush3.msra.mxu0 %v6495_v26 }
0x2521   :  { %v3124_v41 = vpop.f32.mrf.mxu0 }
0x2522   :  { %v3199_v39 = vpop.f32.mrf.mxu1  ;;  %3128 = vmax.xlane.f32.xlu0 %v3124_v41 }
0x2523   :  { %3203 = vmax.xlane.f32.xlu1 %v3199_v39  ;;  %v4966_v2 = vpop.f32.mrf.mxu0 }
0x2524   :  { %v5001_v5 = vpop.f32.mrf.mxu1 }
0x25ab   :  { %v3129_v36 = vpop.xlane.xlu0 %3128 }
0x25ac   :  { %v3204_v38 = vpop.xlane.xlu1 %3203 }
0x25ad   :  { %v3205_v21 = vmax.f32 %v3129_v36, %v3204_v38 }
0x25af   :  { %v3206_v22 = vsub.f32 %v3124_v41, %v3205_v21  ;;  %v3211_v48 = vsub.f32 %v3199_v39, %v3205_v21 }
0x25b1   :  { %v3207_v49 = vmul.f32 1.442695, %v3206_v22  ;;  %v3212_v50 = vmul.f32 1.442695, %v3211_v48 }
0x25b3   :  { %5195 = vpow2.f32 %v3207_v49 }
0x25b4   :  { %5197 = vpow2.f32 %v3212_v50 }
0x25c0   :  { %v5196_v51 = vpop.eup %5195 }
0x25c1   :  { %v5198_v52 = vpop.eup %5197  ;;  %3209 = vadd.xlane.f32.xlu0 %v5196_v51  ;;  %v3217_v15 = vmul.f32 %v6893_v20, %v5196_v51 }
0x25c2   :  { %v3218_v53 = vmul.f32 %v6899_v9, %v5198_v52 }
0x25c4   :  { %v3219_v54 = vadd.f32 %v3218_v53, %v3217_v15 }
0x25c5   :  { %3214 = vadd.xlane.f32.xlu0 %v5198_v52 }
0x264a   :  { %v3210_v55 = vpop.xlane.xlu0 %3209 }
0x264e   :  { %v3215_v23 = vpop.xlane.xlu0 %3214 }
0x264f   :  { %v3216_v24 = vadd.f32 %v3215_v23, %v3210_v55 }
0x2651   :  { %5199 = vrcp.f32 %v3216_v24 }
0x265e   :  { %v5200_v25 = vpop.eup %5199 }
0x265f   :  { %v3221_v26 = vmul.f32 32.0, %v5200_v25 }
0x2661   :  { %v3222_v57 = vmul.f32 %v3221_v26, %v3219_v54 }
0x2663   :  { %5035 = vmatmul.mubr.f32.vlgmr.msra.gmra.mxu0 %v3222_v57 }
0x2723   :  { %v3289_v59 = vpop.f32.mrf.mxu0 }
0x2724   :  { %5046 = vmatmul.mubr.msk.f32.vlgmr.msra.gmra.mxu1 %vm118_vm1, %v3289_v59 }
0x2725   :  { %5049 = vmatpush3.msra.mxu1 %v6539_v1  ;;  %v5036_v29 = vpop.f32.mrf.mxu0  ;;  %5056 = vmatprep.mubr.msk.f32.mxu1 %vm5286_vm0, %v7049_v7  ;;  %v3557_v1 = vld [vmem:[%s7035_s12 + $0x18] sm:$0xff] }
0x2726   :  { %5050 = vmatprep.subr.mxu1 %v7049_v7 }
0x2727   :  { %5051 = vmatpush3.msra.mxu1 %v6548_v61 }
0x2728   :  { %5052 = vmatprep.subr.mxu1 %v7049_v7 }
0x2729   :  { %5053 = vmatpush3.msra.mxu1 %v6555_v11 }
0x272a   :  { %5054 = vmatprep.subr.mxu1 %v7049_v7 }
0x272b   :  { %5055 = vmatpush3.msra.mxu1 %v6562_v63 }
0x272c   :  { %5057 = vmatmul.mubr.msk.f32.vlgmr.msra.gmra.mxu1 %vm118_vm1, %v6830_v14  ;;  %5059 = vmatprep.subr.mxu1 %v7049_v7 }
0x272d   :  { %5060 = vmatpush3.msra.mxu1 %v6571_v3  ;;  %5067 = vmatprep.mubr.msk.f32.mxu1 %vm5286_vm0, %v7049_v7 }
0x272e   :  { %5061 = vmatprep.subr.mxu1 %v7049_v7 }
0x272f   :  { %5062 = vmatpush3.msra.mxu1 %v6580_v4 }
0x2730   :  { %5063 = vmatprep.subr.mxu1 %v7049_v7 }
0x2731   :  { %5064 = vmatpush3.msra.mxu1 %v6587_v62  ;;  %v3556_v62 = vld [vmem:[%s7035_s12 + $0x10] sm:$0xff] }
0x2732   :  { %5065 = vmatprep.subr.mxu1 %v7049_v7  ;;  %v3548_v7 = vld [vmem:[#allocation2] sm:$0xff] }
0x2733   :  { %5066 = vmatpush3.msra.mxu1 %v6594_v6  ;;  %v3555_v6 = vld [vmem:[%s7035_s12 + $0x8] sm:$0xff] }
0x2734   :  { %5070 = vmatprep.subr.mxu1 %v3557_v1 }
0x27e4   :  { %v3362_v61 = vpop.f32.mrf.mxu1 }
0x27e5   :  { %v3366_v11 = vadd.f32 %v3362_v61, %v5584_v32  ;;  %v3554_v32 = vld [vmem:[%s7035_s12] sm:$0xff] }
0x27e6   :  { %v5047_v63 = vpop.f32.mrf.mxu1 }
0x27e7   :  { %5201 = vtanh.f32 %v3366_v11 }
0x27ec   :  { %v3434_v3 = vpop.f32.mrf.mxu1 }
0x27ee   :  { %v5058_v4 = vpop.f32.mrf.mxu1 }
0x27f4   :  { %v5202_v58 = vpop.eup %5201 }
0x27f5   :  { %5068 = vmatmul.mubr.msk.f32.vlgmr.msra.gmra.mxu1 %vm118_vm1, %v5202_v58 }
0x27f6   :  { %5071 = vmatpush3.msra.mxu1 %v3557_v1  ;;  %5078 = vmatprep.mubr.msk.f32.mxu1 %vm118_vm1, %v3548_v7 }
0x27f7   :  { %5072 = vmatprep.subr.mxu1 %v3556_v62 }
0x27f8   :  { %5073 = vmatpush3.msra.mxu1 %v3556_v62 }
0x27f9   :  { %5074 = vmatprep.subr.mxu1 %v3555_v6 }
0x27fa   :  { %5075 = vmatpush3.msra.mxu1 %v3555_v6 }
0x27fb   :  { %5076 = vmatprep.subr.mxu1 %v3554_v32 }
0x27fc   :  { %5077 = vmatpush3.msra.mxu1 %v3554_v32 }
0x27fd   :  { %5079 = vmatmul.mubr.msk.f32.vlgmr.msra.gmra.mxu1 %vm118_vm1, %v3549_v35 }
0x27fe   :  { %5081 = vmatprep.mubr.msk.f32.mxu1 %vm118_vm1, %v3550_v31 }
0x2801   :  { %5082 = vmatmul.mubr.msk.f32.gmra.mxu1 %vm118_vm1, %v3551_v40 }
0x2802   :  { %5084 = vmatprep.mubr.msk.f32.mxu1 %vm118_vm1, %v3552_v10 }
0x28b5   :  { %v3507_v12 = vpop.f32.mrf.mxu1 }
0x28b6   :  { %v3508_v13 = vadd.f32 %v3507_v12, %v3434_v3 }
0x28b7   :  { %v5069_v14 = vpop.f32.mrf.mxu1 }
0x28b8   :  { %v3511_v27 = vadd.f32 %v6613_v46, %v3508_v13 }
0x28ba   :  { %5203 = vtanh.f32 %v3511_v27  ;;  %v3716_v19 = vmul.f32 -1.442695, %v3511_v27 }
0x28bc   :  { %5205 = vpow2.f32 %v3716_v19 }
0x28bd   :  { %v5080_v30 = vpop.f32.mrf.mxu1 }
0x28be   :  { %v3648_v33 = vadd.f32 %v5080_v30, %v3717_v43 }
0x28bf   :  { %v3642_v44 = vpop.f32.mrf.mxu1 }
0x28c0   :  { %3672 = vst [vmem:[%s7037_s14 + $0x8] sm:$0xff] %v3648_v33  ;;  %v3643_v45 = vadd.f32 %v3717_v43, %v3642_v44 }
0x28c1   :  { %v5083_v34 = vpop.f32.mrf.mxu1 }
0x28c2   :  { %3671 = vst [vmem:[%s7037_s14] sm:$0xff] %v3643_v45  ;;  %v3658_v16 = vadd.f32 %v5083_v34, %v3717_v43 }
0x28c3   :  { %v3652_v46 = vpop.f32.mrf.mxu1 }
0x28c4   :  { %3674 = vst [vmem:[%s7037_s14 + $0x18] sm:$0xff] %v3658_v16  ;;  %v3653_v17 = vadd.f32 %v3717_v43, %v3652_v46 }
0x28c6   :  { %3673 = vst [vmem:[%s7037_s14 + $0x10] sm:$0xff] %v3653_v17 }
0x28c7   :  { %v5204_v18 = vpop.eup %5203 }
0x28c8   :  { %3521 = vrot.lane.b32.xlu0 %v5204_v18, %s5287_s22 }
0x28c9   :  { %v5206_v20 = vpop.eup %5205 }
0x28ca   :  { %v3515_v60 = vadd.f32 1.0, %v5206_v20 }
0x28cc   :  { %5207 = vrcp.f32 %v3515_v60 }
0x28d9   :  { %v5208_v9 = vpop.eup %5207 }
0x28da   :  { %v3519_v8 = vmul.f32 %v5208_v9, %v6825_v0 }
0x293a   :  { %v3522_v28 = vpop.permute.xlu0 %3521 }
0x293b   :  { %v3524_v37 = vmul.f32 %v5208_v9, %v3522_v28 }
0x293d   :  { %3526 = vrot.lane.b32.xlu1 %v3524_v37, %s5288_s23 }
0x29af   :  { %v3527_v42 = vpop.permute.xlu1 %3526 }
0x29b0   :  { %v3529_v47 = vadd.f32 %v3527_v42, %v3519_v8 }
0x29b2   :  { %5209 = vtanh.f32 %v3529_v47 }
0x29bf   :  { %v5210_v56 = vpop.eup %5209 }
0x29c0   :  { %3532 = vrot.lane.b32.xlu1 %v5210_v56, %s5287_s22 }
0x2a32   :  { %v3533_v41 = vpop.permute.xlu1 %3532 }
0x2a33   :  { %v3535_v39 = vmul.f32 %v5208_v9, %v3533_v41 }
0x2a35   :  { %3537 = vrot.lane.b32.xlu1 %v3535_v39, %s5288_s23 }
0x2aa7   :  { %v3538_v2 = vpop.permute.xlu1 %3537 }
0x2aa8   :  { %3540 = vst.msk [vmem:[#allocation2 + $0x28] sm:$0xff] %vm118_vm1, %v3538_v2  ;;  %3677 = vst.msk [vmem:[%s7038_s15] sm:$0xff] %vm118_vm1, %v3538_v2 }
0x2aaf   :  { %v3553_v5 = vld [vmem:[#allocation2 + $0x28] sm:$0xff] }
0x2ab0   :  { %5085 = vmatmul.mubr.msk.f32.gmra.mxu1 %vm118_vm1, %v3553_v5 }
0x2b70   :  { %v5086_v0 = vpop.f32.mrf.mxu1 }
0x2b71   :  { %v3668_v36 = vadd.f32 %v5086_v0, %v3717_v43 }
0x2b72   :  { %v3662_v38 = vpop.f32.mrf.mxu1 }
0x2b73   :  { %3676 = vst [vmem:[%s7037_s14 + $0x28] sm:$0xff] %v3668_v36  ;;  %v3663_v21 = vadd.f32 %v3717_v43, %v3662_v38 }
0x2b75   :  { %3675 = vst [vmem:[%s7037_s14 + $0x20] sm:$0xff] %v3663_v21 }

</bundles_post_ra>
